<compile_context>
chip_gen: v7x
topology: tpu7x:2x2x1
jax: 0.10.0
libtpu: 0.0.40
codegen_flags: <defaults>
</compile_context>

<pallas_src>
import jax
import jax.numpy as jnp
from jax.experimental import pallas as pl
from jax.experimental.pallas import tpu as pltpu


# ----------------------------------------------------------------------------
# Fused kernel (one batch sample per grid step).
# ----------------------------------------------------------------------------
def _build_fused_kernel(oh1, ow1, oh2, ow2, oh3, ow3):
    """All spatial sizes are Python statics; taps are fully unrolled."""
    half = ow1 // 2          # conv1 output width is stored x-phase-major
    k2, k3 = 4, 3            # conv2 / conv3 kernel sizes (fixed by the module)

    def kernel(p1_ref, w1_ref, b1_ref, w2_ref, b2_ref, w3_ref, b3_ref,
               o_ref, a1_ref, a2_ref):
        # ---- conv1 + ReLU: one bf16 MXU matmul over every conv1 output pixel.
        #      p1 rows are ordered (y1, slot) with slot = (x1 % 2)*half + x1 // 2.
        a1 = jnp.dot(p1_ref[0], w1_ref[...], preferred_element_type=jnp.float32)
        a1_ref[...] = jnp.maximum(a1 + b1_ref[...], 0.0)        # (oh1*ow1, 32) f32

        # ---- conv2 + ReLU (k=4, stride=2): per output row, 16 tap matmuls.
        #      Thanks to the phase-major row layout every tap is a contiguous
        #      row window of a1_ref.
        for y2 in range(oh2):
            acc = jnp.zeros((ow2, w2_ref.shape[-1]), jnp.float32)
            for i in range(k2):
                base = (2 * y2 + i) * ow1
                for j in range(k2):
                    start = base + (j % 2) * half + (j // 2)
                    lhs = a1_ref[pl.ds(start, ow2), :].astype(jnp.bfloat16)
                    acc += jnp.dot(lhs, w2_ref[i * k2 + j],
                                   preferred_element_type=jnp.float32)
            a2_ref[pl.ds(y2 * ow2, ow2), :] = jnp.maximum(acc + b2_ref[...], 0.0)

        # ---- conv3 + ReLU (k=3, stride=1): rows of a2_ref are (y2, x2).
        for y3 in range(oh3):
            acc = jnp.zeros((ow3, w3_ref.shape[-1]), jnp.float32)
            for i in range(k3):
                for j in range(k3):
                    start = (y3 + i) * ow2 + j
                    lhs = a2_ref[pl.ds(start, ow3), :].astype(jnp.bfloat16)
                    acc += jnp.dot(lhs, w3_ref[i * k3 + j],
                                   preferred_element_type=jnp.float32)
            o_ref[0, y3] = jnp.maximum(acc + b3_ref[...], 0.0)

    return kernel


# ----------------------------------------------------------------------------
# Plain-JAX glue (jitted): conv1 im2col and one-time parameter preparation.
# ----------------------------------------------------------------------------
def _im2col_nhwc(x, kh, kw, stride):
    """x: (N, C, H, W) -> (N, OH, OW, C*kh*kw); column index = c*kh*kw + i*kw + j
    (matches torch Conv2d weight.reshape(OC, C*kh*kw) flattening)."""
    N, C, H, W = x.shape
    oh = (H - kh) // stride + 1
    ow = (W - kw) // stride + 1
    cols = []
    for i in range(kh):
        for j in range(kw):
            cols.append(x[:, :, i:i + stride * oh:stride, j:j + stride * ow:stride])
    p = jnp.stack(cols, axis=2).reshape(N, C * kh * kw, oh, ow)
    return p.transpose(0, 2, 3, 1), oh, ow


def prepare_params(params):
    """One-time hoist: flatten / per-tap reorder weights, cast to bf16."""
    (w1, b1), (w2, b2), (w3, b3) = params
    oc1, c, kh1, kw1 = w1.shape
    w1f = w1.reshape(oc1, c * kh1 * kw1).T.astype(jnp.bfloat16)         # (C*64, 32)
    # per-tap (kh*kw, IC, OC) matrices: tap t = i*kw + j, matmul is act @ W[t]
    w2t = w2.transpose(2, 3, 1, 0).reshape(-1, w2.shape[1], w2.shape[0]).astype(jnp.bfloat16)
    w3t = w3.transpose(2, 3, 1, 0).reshape(-1, w3.shape[1], w3.shape[0]).astype(jnp.bfloat16)
    return dict(w1=w1f, b1=b1.reshape(1, -1).astype(jnp.float32),
                w2=w2t, b2=b2.reshape(1, -1).astype(jnp.float32),
                w3=w3t, b3=b3.reshape(1, -1).astype(jnp.float32))


def init_params(key, input_channels):
    """Deterministic init mirroring PyTorch Conv2d default (uniform +/- 1/sqrt(fan_in)),
    returned in torch layout (OC, IC, KH, KW)."""
    defs = [
        (32, input_channels, 8),  # conv1: k=8, stride=4
        (64, 32, 4),              # conv2: k=4, stride=2
        (64, 64, 3),              # conv3: k=3, stride=1
    ]
    params = []
    for oc, ic, k in defs:
        key, kw_, kb_ = jax.random.split(key, 3)
        fan_in = ic * k * k
        bound = 1.0 / jnp.sqrt(fan_in)
        w = jax.random.uniform(kw_, (oc, ic, k, k), jnp.float32, -bound, bound)
        b = jax.random.uniform(kb_, (oc,), jnp.float32, -bound, bound)
        params.append((w, b))
    return params


# ----------------------------------------------------------------------------
# Forward pass.
# ----------------------------------------------------------------------------
def feature_extractor(x, prep):
    """x: (N, C, H, W) float32 -> (N, 64, OH3, OW3) float32 (NCHW, matches PyTorch)."""
    N = x.shape[0]
    w1f, b1 = prep["w1"], prep["b1"]
    w2t, b2 = prep["w2"], prep["b2"]
    w3t, b3 = prep["w3"], prep["b3"]
    K1, OC1 = w1f.shape
    OC2 = w2t.shape[-1]
    OC3 = w3t.shape[-1]

    # conv1 im2col (XLA, jitted). Rows are re-ordered so that x1 is stored
    # phase-major (slot = (x1 % 2) * (ow1 // 2) + x1 // 2); the in-kernel
    # stride-2 conv2 then only needs contiguous row windows.
    p, oh1, ow1 = _im2col_nhwc(x, 8, 8, 4)
    assert ow1 % 2 == 0, "fused kernel assumes even conv1 output width"
    half = ow1 // 2
    p1 = (p.reshape(N, oh1, half, 2, K1)
           .transpose(0, 1, 3, 2, 4)
           .reshape(N, oh1 * ow1, K1)
           .astype(jnp.bfloat16))

    oh2, ow2 = (oh1 - 4) // 2 + 1, (ow1 - 4) // 2 + 1
    oh3, ow3 = oh2 - 2, ow2 - 2

    kernel = _build_fused_kernel(oh1, ow1, oh2, ow2, oh3, ow3)
    out_nhwc = pl.pallas_call(
        kernel,
        out_shape=jax.ShapeDtypeStruct((N, oh3, ow3, OC3), jnp.float32),
        grid=(N,),
        in_specs=[
            pl.BlockSpec((1, oh1 * ow1, K1), lambda n: (n, 0, 0)),
            pl.BlockSpec((K1, OC1), lambda n: (0, 0)),
            pl.BlockSpec((1, OC1), lambda n: (0, 0)),
            pl.BlockSpec((w2t.shape[0], OC1, OC2), lambda n: (0, 0, 0)),
            pl.BlockSpec((1, OC2), lambda n: (0, 0)),
            pl.BlockSpec((w3t.shape[0], OC2, OC3), lambda n: (0, 0, 0)),
            pl.BlockSpec((1, OC3), lambda n: (0, 0)),
        ],
        out_specs=pl.BlockSpec((1, oh3, ow3, OC3), lambda n: (n, 0, 0, 0)),
        scratch_shapes=[
            pltpu.VMEM((oh1 * ow1, OC1), jnp.float32),   # conv1 activations
            pltpu.VMEM((oh2 * ow2, OC2), jnp.float32),   # conv2 activations
        ],
        compiler_params=pltpu.CompilerParams(
            dimension_semantics=("parallel",)),
    )(p1, w1f, b1, w2t, b2, w3t, b3)

    # single NHWC -> NCHW conversion at the very end
    return out_nhwc.transpose(0, 3, 1, 2)


def _reference(x, params):
    """Pure-JAX f32 reference (lax.conv) for the correctness check."""
    strides = [4, 2, 1]
    for (w, b), s in zip(params, strides):
        x = jax.lax.conv_general_dilated(
            x, w, window_strides=(s, s), padding="VALID",
            dimension_numbers=("NCHW", "OIHW", "NCHW"))
        x = jnp.maximum(x + b[None, :, None, None], 0.0)
    return x


if __name__ == "__main__":
    key = jax.random.PRNGKey(0)
    kx, kp = jax.random.split(key)

    # Small NCHW input: batch=2, channels=4, spatial=44 (smallest clean size
    # surviving all three stride/kernel reductions: 44 -> 10 -> 4 -> 2).
    x = jax.random.normal(kx, (2, 4, 44, 44), jnp.float32)
    params = init_params(kp, input_channels=4)
    prep = prepare_params(params)          # weights flattened / bf16 once

    fe = jax.jit(feature_extractor)
    out = jax.block_until_ready(fe(x, prep))
    assert out.shape == (2, 64, 2, 2), out.shape

    ref = jax.block_until_ready(_reference(x, params))
    # bf16 MXU operands with f32 accumulation -> relaxed tolerance.
    assert jnp.allclose(out, ref, rtol=3e-2, atol=3e-2), float(jnp.max(jnp.abs(out - ref)))

    print("KERNEL_OK")
</pallas_src>

<mosaic_0001>
module attributes {stable_mosaic.version = 11 : i64} {
  func.func @kernel(%arg0: i32, %arg1: memref<1x100x256xbf16, #tpu.memory_space<vmem>>, %arg2: memref<256x32xbf16, #tpu.memory_space<vmem>>, %arg3: memref<1x32xf32, #tpu.memory_space<vmem>>, %arg4: memref<16x32x64xbf16, #tpu.memory_space<vmem>>, %arg5: memref<1x64xf32, #tpu.memory_space<vmem>>, %arg6: memref<9x64x64xbf16, #tpu.memory_space<vmem>>, %arg7: memref<1x64xf32, #tpu.memory_space<vmem>>, %arg8: memref<1x2x2x64xf32, #tpu.memory_space<vmem>>, %arg9: memref<100x32xf32, #tpu.memory_space<vmem>>, %arg10: memref<16x64xf32, #tpu.memory_space<vmem>>) attributes {dimension_semantics = [#tpu.dimension_semantics<parallel>], iteration_bounds = array<i64: 2>, scalar_prefetch = 0 : i64, scratch_operands = 2 : i64, tpu.core_type = #tpu.core_type<tc>, window_params = [{transform_indices = @transform_0, window_bounds = array<i64: 1, 100, 256>}, {pipeline_mode = #tpu.pipeline_mode<synchronous>, transform_indices = @transform_1, window_bounds = array<i64: 256, 32>}, {pipeline_mode = #tpu.pipeline_mode<synchronous>, transform_indices = @transform_2, window_bounds = array<i64: 1, 32>}, {pipeline_mode = #tpu.pipeline_mode<synchronous>, transform_indices = @transform_3, window_bounds = array<i64: 16, 32, 64>}, {pipeline_mode = #tpu.pipeline_mode<synchronous>, transform_indices = @transform_4, window_bounds = array<i64: 1, 64>}, {pipeline_mode = #tpu.pipeline_mode<synchronous>, transform_indices = @transform_5, window_bounds = array<i64: 9, 64, 64>}, {pipeline_mode = #tpu.pipeline_mode<synchronous>, transform_indices = @transform_6, window_bounds = array<i64: 1, 64>}, {transform_indices = @transform_7, window_bounds = array<i64: 1, 2, 2, 64>}]} {
    %c0 = arith.constant 0 : index
    %c0_0 = arith.constant 0 : index
    %c0_1 = arith.constant 0 : index
    %0 = vector.load %arg1[%c0, %c0_0, %c0_1] : memref<1x100x256xbf16, #tpu.memory_space<vmem>>, vector<1x100x256xbf16>
    %1 = vector.shape_cast %0 : vector<1x100x256xbf16> to vector<100x256xbf16>
    %c0_2 = arith.constant 0 : index
    %c0_3 = arith.constant 0 : index
    %2 = vector.load %arg2[%c0_2, %c0_3] : memref<256x32xbf16, #tpu.memory_space<vmem>>, vector<256x32xbf16>
    %cst = arith.constant dense<0.000000e+00> : vector<100x32xf32>
    %3 = tpu.matmul %1, %2, %cst {dimension_numbers = #tpu.dot_dimension_numbers<[1], [0], [0], [1], [0, 0, 1, 1], [], []>} : vector<100x256xbf16>, vector<256x32xbf16>, vector<100x32xf32> -> vector<100x32xf32>
    %c0_4 = arith.constant 0 : index
    %c0_5 = arith.constant 0 : index
    %4 = vector.load %arg3[%c0_4, %c0_5] : memref<1x32xf32, #tpu.memory_space<vmem>>, vector<1x32xf32>
    %5 = vector.broadcast %4 : vector<1x32xf32> to vector<100x32xf32>
    %6 = arith.addf %3, %5 : vector<100x32xf32>
    %cst_6 = arith.constant 0.000000e+00 : f32
    %7 = vector.broadcast %cst_6 : f32 to vector<100x32xf32>
    %8 = arith.maximumf %6, %7 : vector<100x32xf32>
    %c0_7 = arith.constant 0 : index
    %c0_8 = arith.constant 0 : index
    %9 = vector.load %arg9[%c0_7, %c0_8] : memref<100x32xf32, #tpu.memory_space<vmem>>, vector<100x32xf32>
    tpu.vector_store %arg9[%c0_7, %c0_8], %8 {strides = array<i32>} : memref<100x32xf32, #tpu.memory_space<vmem>>, vector<100x32xf32>,
    %cst_9 = arith.constant 0.000000e+00 : f32
    %10 = vector.broadcast %cst_9 : f32 to vector<4x64xf32>
    %c0_10 = arith.constant 0 : index
    %c0_11 = arith.constant 0 : index
    %11 = vector.load %arg9[%c0_10, %c0_11] : memref<100x32xf32, #tpu.memory_space<vmem>>, vector<4x32xf32>
    %12 = arith.truncf %11 : vector<4x32xf32> to vector<4x32xbf16>
    %c0_12 = arith.constant 0 : index
    %c0_13 = arith.constant 0 : index
    %c0_14 = arith.constant 0 : index
    %13 = vector.load %arg4[%c0_12, %c0_13, %c0_14] : memref<16x32x64xbf16, #tpu.memory_space<vmem>>, vector<1x32x64xbf16>
    %14 = vector.shape_cast %13 : vector<1x32x64xbf16> to vector<32x64xbf16>
    %cst_15 = arith.constant dense<0.000000e+00> : vector<4x64xf32>
    %15 = tpu.matmul %12, %14, %cst_15 {dimension_numbers = #tpu.dot_dimension_numbers<[1], [0], [0], [1], [0, 0, 1, 1], [], []>} : vector<4x32xbf16>, vector<32x64xbf16>, vector<4x64xf32> -> vector<4x64xf32>
    %16 = arith.addf %10, %15 : vector<4x64xf32>
    %c5 = arith.constant 5 : index
    %c0_16 = arith.constant 0 : index
    %17 = vector.load %arg9[%c5, %c0_16] : memref<100x32xf32, #tpu.memory_space<vmem>>, vector<4x32xf32>
    %18 = arith.truncf %17 : vector<4x32xf32> to vector<4x32xbf16>
    %c1 = arith.constant 1 : index
    %c0_17 = arith.constant 0 : index
    %c0_18 = arith.constant 0 : index
    %19 = vector.load %arg4[%c1, %c0_17, %c0_18] : memref<16x32x64xbf16, #tpu.memory_space<vmem>>, vector<1x32x64xbf16>
    %20 = vector.shape_cast %19 : vector<1x32x64xbf16> to vector<32x64xbf16>
    %cst_19 = arith.constant dense<0.000000e+00> : vector<4x64xf32>
    %21 = tpu.matmul %18, %20, %cst_19 {dimension_numbers = #tpu.dot_dimension_numbers<[1], [0], [0], [1], [0, 0, 1, 1], [], []>} : vector<4x32xbf16>, vector<32x64xbf16>, vector<4x64xf32> -> vector<4x64xf32>
    %22 = arith.addf %16, %21 : vector<4x64xf32>
    %c1_20 = arith.constant 1 : index
    %c0_21 = arith.constant 0 : index
    %23 = vector.load %arg9[%c1_20, %c0_21] : memref<100x32xf32, #tpu.memory_space<vmem>>, vector<4x32xf32>
    %24 = arith.truncf %23 : vector<4x32xf32> to vector<4x32xbf16>
    %c2 = arith.constant 2 : index
    %c0_22 = arith.constant 0 : index
    %c0_23 = arith.constant 0 : index
    %25 = vector.load %arg4[%c2, %c0_22, %c0_23] : memref<16x32x64xbf16, #tpu.memory_space<vmem>>, vector<1x32x64xbf16>
    %26 = vector.shape_cast %25 : vector<1x32x64xbf16> to vector<32x64xbf16>
    %cst_24 = arith.constant dense<0.000000e+00> : vector<4x64xf32>
    %27 = tpu.matmul %24, %26, %cst_24 {dimension_numbers = #tpu.dot_dimension_numbers<[1], [0], [0], [1], [0, 0, 1, 1], [], []>} : vector<4x32xbf16>, vector<32x64xbf16>, vector<4x64xf32> -> vector<4x64xf32>
    %28 = arith.addf %22, %27 : vector<4x64xf32>
    %c6 = arith.constant 6 : index
    %c0_25 = arith.constant 0 : index
    %29 = vector.load %arg9[%c6, %c0_25] : memref<100x32xf32, #tpu.memory_space<vmem>>, vector<4x32xf32>
    %30 = arith.truncf %29 : vector<4x32xf32> to vector<4x32xbf16>
    %c3 = arith.constant 3 : index
    %c0_26 = arith.constant 0 : index
    %c0_27 = arith.constant 0 : index
    %31 = vector.load %arg4[%c3, %c0_26, %c0_27] : memref<16x32x64xbf16, #tpu.memory_space<vmem>>, vector<1x32x64xbf16>
    %32 = vector.shape_cast %31 : vector<1x32x64xbf16> to vector<32x64xbf16>
    %cst_28 = arith.constant dense<0.000000e+00> : vector<4x64xf32>
    %33 = tpu.matmul %30, %32, %cst_28 {dimension_numbers = #tpu.dot_dimension_numbers<[1], [0], [0], [1], [0, 0, 1, 1], [], []>} : vector<4x32xbf16>, vector<32x64xbf16>, vector<4x64xf32> -> vector<4x64xf32>
    %34 = arith.addf %28, %33 : vector<4x64xf32>
    %c10 = arith.constant 10 : index
    %c0_29 = arith.constant 0 : index
    %35 = vector.load %arg9[%c10, %c0_29] : memref<100x32xf32, #tpu.memory_space<vmem>>, vector<4x32xf32>
    %36 = arith.truncf %35 : vector<4x32xf32> to vector<4x32xbf16>
    %c4 = arith.constant 4 : index
    %c0_30 = arith.constant 0 : index
    %c0_31 = arith.constant 0 : index
    %37 = vector.load %arg4[%c4, %c0_30, %c0_31] : memref<16x32x64xbf16, #tpu.memory_space<vmem>>, vector<1x32x64xbf16>
    %38 = vector.shape_cast %37 : vector<1x32x64xbf16> to vector<32x64xbf16>
    %cst_32 = arith.constant dense<0.000000e+00> : vector<4x64xf32>
    %39 = tpu.matmul %36, %38, %cst_32 {dimension_numbers = #tpu.dot_dimension_numbers<[1], [0], [0], [1], [0, 0, 1, 1], [], []>} : vector<4x32xbf16>, vector<32x64xbf16>, vector<4x64xf32> -> vector<4x64xf32>
    %40 = arith.addf %34, %39 : vector<4x64xf32>
    %c15 = arith.constant 15 : index
    %c0_33 = arith.constant 0 : index
    %41 = vector.load %arg9[%c15, %c0_33] : memref<100x32xf32, #tpu.memory_space<vmem>>, vector<4x32xf32>
    %42 = arith.truncf %41 : vector<4x32xf32> to vector<4x32xbf16>
    %c5_34 = arith.constant 5 : index
    %c0_35 = arith.constant 0 : index
    %c0_36 = arith.constant 0 : index
    %43 = vector.load %arg4[%c5_34, %c0_35, %c0_36] : memref<16x32x64xbf16, #tpu.memory_space<vmem>>, vector<1x32x64xbf16>
    %44 = vector.shape_cast %43 : vector<1x32x64xbf16> to vector<32x64xbf16>
    %cst_37 = arith.constant dense<0.000000e+00> : vector<4x64xf32>
    %45 = tpu.matmul %42, %44, %cst_37 {dimension_numbers = #tpu.dot_dimension_numbers<[1], [0], [0], [1], [0, 0, 1, 1], [], []>} : vector<4x32xbf16>, vector<32x64xbf16>, vector<4x64xf32> -> vector<4x64xf32>
    %46 = arith.addf %40, %45 : vector<4x64xf32>
    %c11 = arith.constant 11 : index
    %c0_38 = arith.constant 0 : index
    %47 = vector.load %arg9[%c11, %c0_38] : memref<100x32xf32, #tpu.memory_space<vmem>>, vector<4x32xf32>
    %48 = arith.truncf %47 : vector<4x32xf32> to vector<4x32xbf16>
    %c6_39 = arith.constant 6 : index
    %c0_40 = arith.constant 0 : index
    %c0_41 = arith.constant 0 : index
    %49 = vector.load %arg4[%c6_39, %c0_40, %c0_41] : memref<16x32x64xbf16, #tpu.memory_space<vmem>>, vector<1x32x64xbf16>
    %50 = vector.shape_cast %49 : vector<1x32x64xbf16> to vector<32x64xbf16>
    %cst_42 = arith.constant dense<0.000000e+00> : vector<4x64xf32>
    %51 = tpu.matmul %48, %50, %cst_42 {dimension_numbers = #tpu.dot_dimension_numbers<[1], [0], [0], [1], [0, 0, 1, 1], [], []>} : vector<4x32xbf16>, vector<32x64xbf16>, vector<4x64xf32> -> vector<4x64xf32>
    %52 = arith.addf %46, %51 : vector<4x64xf32>
    %c16 = arith.constant 16 : index
    %c0_43 = arith.constant 0 : index
    %53 = vector.load %arg9[%c16, %c0_43] : memref<100x32xf32, #tpu.memory_space<vmem>>, vector<4x32xf32>
    %54 = arith.truncf %53 : vector<4x32xf32> to vector<4x32xbf16>
    %c7 = arith.constant 7 : index
    %c0_44 = arith.constant 0 : index
    %c0_45 = arith.constant 0 : index
    %55 = vector.load %arg4[%c7, %c0_44, %c0_45] : memref<16x32x64xbf16, #tpu.memory_space<vmem>>, vector<1x32x64xbf16>
    %56 = vector.shape_cast %55 : vector<1x32x64xbf16> to vector<32x64xbf16>
    %cst_46 = arith.constant dense<0.000000e+00> : vector<4x64xf32>
    %57 = tpu.matmul %54, %56, %cst_46 {dimension_numbers = #tpu.dot_dimension_numbers<[1], [0], [0], [1], [0, 0, 1, 1], [], []>} : vector<4x32xbf16>, vector<32x64xbf16>, vector<4x64xf32> -> vector<4x64xf32>
    %58 = arith.addf %52, %57 : vector<4x64xf32>
    %c20 = arith.constant 20 : index
    %c0_47 = arith.constant 0 : index
    %59 = vector.load %arg9[%c20, %c0_47] : memref<100x32xf32, #tpu.memory_space<vmem>>, vector<4x32xf32>
    %60 = arith.truncf %59 : vector<4x32xf32> to vector<4x32xbf16>
    %c8 = arith.constant 8 : index
    %c0_48 = arith.constant 0 : index
    %c0_49 = arith.constant 0 : index
    %61 = vector.load %arg4[%c8, %c0_48, %c0_49] : memref<16x32x64xbf16, #tpu.memory_space<vmem>>, vector<1x32x64xbf16>
    %62 = vector.shape_cast %61 : vector<1x32x64xbf16> to vector<32x64xbf16>
    %cst_50 = arith.constant dense<0.000000e+00> : vector<4x64xf32>
    %63 = tpu.matmul %60, %62, %cst_50 {dimension_numbers = #tpu.dot_dimension_numbers<[1], [0], [0], [1], [0, 0, 1, 1], [], []>} : vector<4x32xbf16>, vector<32x64xbf16>, vector<4x64xf32> -> vector<4x64xf32>
    %64 = arith.addf %58, %63 : vector<4x64xf32>
    %c25 = arith.constant 25 : index
    %c0_51 = arith.constant 0 : index
    %65 = vector.load %arg9[%c25, %c0_51] : memref<100x32xf32, #tpu.memory_space<vmem>>, vector<4x32xf32>
    %66 = arith.truncf %65 : vector<4x32xf32> to vector<4x32xbf16>
    %c9 = arith.constant 9 : index
    %c0_52 = arith.constant 0 : index
    %c0_53 = arith.constant 0 : index
    %67 = vector.load %arg4[%c9, %c0_52, %c0_53] : memref<16x32x64xbf16, #tpu.memory_space<vmem>>, vector<1x32x64xbf16>
    %68 = vector.shape_cast %67 : vector<1x32x64xbf16> to vector<32x64xbf16>
    %cst_54 = arith.constant dense<0.000000e+00> : vector<4x64xf32>
    %69 = tpu.matmul %66, %68, %cst_54 {dimension_numbers = #tpu.dot_dimension_numbers<[1], [0], [0], [1], [0, 0, 1, 1], [], []>} : vector<4x32xbf16>, vector<32x64xbf16>, vector<4x64xf32> -> vector<4x64xf32>
    %70 = arith.addf %64, %69 : vector<4x64xf32>
    %c21 = arith.constant 21 : index
    %c0_55 = arith.constant 0 : index
    %71 = vector.load %arg9[%c21, %c0_55] : memref<100x32xf32, #tpu.memory_space<vmem>>, vector<4x32xf32>
    %72 = arith.truncf %71 : vector<4x32xf32> to vector<4x32xbf16>
    %c10_56 = arith.constant 10 : index
    %c0_57 = arith.constant 0 : index
    %c0_58 = arith.constant 0 : index
    %73 = vector.load %arg4[%c10_56, %c0_57, %c0_58] : memref<16x32x64xbf16, #tpu.memory_space<vmem>>, vector<1x32x64xbf16>
    %74 = vector.shape_cast %73 : vector<1x32x64xbf16> to vector<32x64xbf16>
    %cst_59 = arith.constant dense<0.000000e+00> : vector<4x64xf32>
    %75 = tpu.matmul %72, %74, %cst_59 {dimension_numbers = #tpu.dot_dimension_numbers<[1], [0], [0], [1], [0, 0, 1, 1], [], []>} : vector<4x32xbf16>, vector<32x64xbf16>, vector<4x64xf32> -> vector<4x64xf32>
    %76 = arith.addf %70, %75 : vector<4x64xf32>
    %c26 = arith.constant 26 : index
    %c0_60 = arith.constant 0 : index
    %77 = vector.load %arg9[%c26, %c0_60] : memref<100x32xf32, #tpu.memory_space<vmem>>, vector<4x32xf32>
    %78 = arith.truncf %77 : vector<4x32xf32> to vector<4x32xbf16>
    %c11_61 = arith.constant 11 : index
    %c0_62 = arith.constant 0 : index
    %c0_63 = arith.constant 0 : index
    %79 = vector.load %arg4[%c11_61, %c0_62, %c0_63] : memref<16x32x64xbf16, #tpu.memory_space<vmem>>, vector<1x32x64xbf16>
    %80 = vector.shape_cast %79 : vector<1x32x64xbf16> to vector<32x64xbf16>
    %cst_64 = arith.constant dense<0.000000e+00> : vector<4x64xf32>
    %81 = tpu.matmul %78, %80, %cst_64 {dimension_numbers = #tpu.dot_dimension_numbers<[1], [0], [0], [1], [0, 0, 1, 1], [], []>} : vector<4x32xbf16>, vector<32x64xbf16>, vector<4x64xf32> -> vector<4x64xf32>
    %82 = arith.addf %76, %81 : vector<4x64xf32>
    %c30 = arith.constant 30 : index
    %c0_65 = arith.constant 0 : index
    %83 = vector.load %arg9[%c30, %c0_65] : memref<100x32xf32, #tpu.memory_space<vmem>>, vector<4x32xf32>
    %84 = arith.truncf %83 : vector<4x32xf32> to vector<4x32xbf16>
    %c12 = arith.constant 12 : index
    %c0_66 = arith.constant 0 : index
    %c0_67 = arith.constant 0 : index
    %85 = vector.load %arg4[%c12, %c0_66, %c0_67] : memref<16x32x64xbf16, #tpu.memory_space<vmem>>, vector<1x32x64xbf16>
    %86 = vector.shape_cast %85 : vector<1x32x64xbf16> to vector<32x64xbf16>
    %cst_68 = arith.constant dense<0.000000e+00> : vector<4x64xf32>
    %87 = tpu.matmul %84, %86, %cst_68 {dimension_numbers = #tpu.dot_dimension_numbers<[1], [0], [0], [1], [0, 0, 1, 1], [], []>} : vector<4x32xbf16>, vector<32x64xbf16>, vector<4x64xf32> -> vector<4x64xf32>
    %88 = arith.addf %82, %87 : vector<4x64xf32>
    %c35 = arith.constant 35 : index
    %c0_69 = arith.constant 0 : index
    %89 = vector.load %arg9[%c35, %c0_69] : memref<100x32xf32, #tpu.memory_space<vmem>>, vector<4x32xf32>
    %90 = arith.truncf %89 : vector<4x32xf32> to vector<4x32xbf16>
    %c13 = arith.constant 13 : index
    %c0_70 = arith.constant 0 : index
    %c0_71 = arith.constant 0 : index
    %91 = vector.load %arg4[%c13, %c0_70, %c0_71] : memref<16x32x64xbf16, #tpu.memory_space<vmem>>, vector<1x32x64xbf16>
    %92 = vector.shape_cast %91 : vector<1x32x64xbf16> to vector<32x64xbf16>
    %cst_72 = arith.constant dense<0.000000e+00> : vector<4x64xf32>
    %93 = tpu.matmul %90, %92, %cst_72 {dimension_numbers = #tpu.dot_dimension_numbers<[1], [0], [0], [1], [0, 0, 1, 1], [], []>} : vector<4x32xbf16>, vector<32x64xbf16>, vector<4x64xf32> -> vector<4x64xf32>
    %94 = arith.addf %88, %93 : vector<4x64xf32>
    %c31 = arith.constant 31 : index
    %c0_73 = arith.constant 0 : index
    %95 = vector.load %arg9[%c31, %c0_73] : memref<100x32xf32, #tpu.memory_space<vmem>>, vector<4x32xf32>
    %96 = arith.truncf %95 : vector<4x32xf32> to vector<4x32xbf16>
    %c14 = arith.constant 14 : index
    %c0_74 = arith.constant 0 : index
    %c0_75 = arith.constant 0 : index
    %97 = vector.load %arg4[%c14, %c0_74, %c0_75] : memref<16x32x64xbf16, #tpu.memory_space<vmem>>, vector<1x32x64xbf16>
    %98 = vector.shape_cast %97 : vector<1x32x64xbf16> to vector<32x64xbf16>
    %cst_76 = arith.constant dense<0.000000e+00> : vector<4x64xf32>
    %99 = tpu.matmul %96, %98, %cst_76 {dimension_numbers = #tpu.dot_dimension_numbers<[1], [0], [0], [1], [0, 0, 1, 1], [], []>} : vector<4x32xbf16>, vector<32x64xbf16>, vector<4x64xf32> -> vector<4x64xf32>
    %100 = arith.addf %94, %99 : vector<4x64xf32>
    %c36 = arith.constant 36 : index
    %c0_77 = arith.constant 0 : index
    %101 = vector.load %arg9[%c36, %c0_77] : memref<100x32xf32, #tpu.memory_space<vmem>>, vector<4x32xf32>
    %102 = arith.truncf %101 : vector<4x32xf32> to vector<4x32xbf16>
    %c15_78 = arith.constant 15 : index
    %c0_79 = arith.constant 0 : index
    %c0_80 = arith.constant 0 : index
    %103 = vector.load %arg4[%c15_78, %c0_79, %c0_80] : memref<16x32x64xbf16, #tpu.memory_space<vmem>>, vector<1x32x64xbf16>
    %104 = vector.shape_cast %103 : vector<1x32x64xbf16> to vector<32x64xbf16>
    %cst_81 = arith.constant dense<0.000000e+00> : vector<4x64xf32>
    %105 = tpu.matmul %102, %104, %cst_81 {dimension_numbers = #tpu.dot_dimension_numbers<[1], [0], [0], [1], [0, 0, 1, 1], [], []>} : vector<4x32xbf16>, vector<32x64xbf16>, vector<4x64xf32> -> vector<4x64xf32>
    %106 = arith.addf %100, %105 : vector<4x64xf32>
    %c0_82 = arith.constant 0 : index
    %c0_83 = arith.constant 0 : index
    %107 = vector.load %arg5[%c0_82, %c0_83] : memref<1x64xf32, #tpu.memory_space<vmem>>, vector<1x64xf32>
    %108 = vector.broadcast %107 : vector<1x64xf32> to vector<4x64xf32>
    %109 = arith.addf %106, %108 : vector<4x64xf32>
    %cst_84 = arith.constant 0.000000e+00 : f32
    %110 = vector.broadcast %cst_84 : f32 to vector<4x64xf32>
    %111 = arith.maximumf %109, %110 : vector<4x64xf32>
    %c0_85 = arith.constant 0 : index
    %c0_86 = arith.constant 0 : index
    %112 = vector.load %arg10[%c0_85, %c0_86] : memref<16x64xf32, #tpu.memory_space<vmem>>, vector<4x64xf32>
    tpu.vector_store %arg10[%c0_85, %c0_86], %111 {strides = array<i32>} : memref<16x64xf32, #tpu.memory_space<vmem>>, vector<4x64xf32>,
    %cst_87 = arith.constant 0.000000e+00 : f32
    %113 = vector.broadcast %cst_87 : f32 to vector<4x64xf32>
    %c20_88 = arith.constant 20 : index
    %c0_89 = arith.constant 0 : index
    %114 = vector.load %arg9[%c20_88, %c0_89] : memref<100x32xf32, #tpu.memory_space<vmem>>, vector<4x32xf32>
    %115 = arith.truncf %114 : vector<4x32xf32> to vector<4x32xbf16>
    %c0_90 = arith.constant 0 : index
    %c0_91 = arith.constant 0 : index
    %c0_92 = arith.constant 0 : index
    %116 = vector.load %arg4[%c0_90, %c0_91, %c0_92] : memref<16x32x64xbf16, #tpu.memory_space<vmem>>, vector<1x32x64xbf16>
    %117 = vector.shape_cast %116 : vector<1x32x64xbf16> to vector<32x64xbf16>
    %cst_93 = arith.constant dense<0.000000e+00> : vector<4x64xf32>
    %118 = tpu.matmul %115, %117, %cst_93 {dimension_numbers = #tpu.dot_dimension_numbers<[1], [0], [0], [1], [0, 0, 1, 1], [], []>} : vector<4x32xbf16>, vector<32x64xbf16>, vector<4x64xf32> -> vector<4x64xf32>
    %119 = arith.addf %113, %118 : vector<4x64xf32>
    %c25_94 = arith.constant 25 : index
    %c0_95 = arith.constant 0 : index
    %120 = vector.load %arg9[%c25_94, %c0_95] : memref<100x32xf32, #tpu.memory_space<vmem>>, vector<4x32xf32>
    %121 = arith.truncf %120 : vector<4x32xf32> to vector<4x32xbf16>
    %c1_96 = arith.constant 1 : index
    %c0_97 = arith.constant 0 : index
    %c0_98 = arith.constant 0 : index
    %122 = vector.load %arg4[%c1_96, %c0_97, %c0_98] : memref<16x32x64xbf16, #tpu.memory_space<vmem>>, vector<1x32x64xbf16>
    %123 = vector.shape_cast %122 : vector<1x32x64xbf16> to vector<32x64xbf16>
    %cst_99 = arith.constant dense<0.000000e+00> : vector<4x64xf32>
    %124 = tpu.matmul %121, %123, %cst_99 {dimension_numbers = #tpu.dot_dimension_numbers<[1], [0], [0], [1], [0, 0, 1, 1], [], []>} : vector<4x32xbf16>, vector<32x64xbf16>, vector<4x64xf32> -> vector<4x64xf32>
    %125 = arith.addf %119, %124 : vector<4x64xf32>
    %c21_100 = arith.constant 21 : index
    %c0_101 = arith.constant 0 : index
    %126 = vector.load %arg9[%c21_100, %c0_101] : memref<100x32xf32, #tpu.memory_space<vmem>>, vector<4x32xf32>
    %127 = arith.truncf %126 : vector<4x32xf32> to vector<4x32xbf16>
    %c2_102 = arith.constant 2 : index
    %c0_103 = arith.constant 0 : index
    %c0_104 = arith.constant 0 : index
    %128 = vector.load %arg4[%c2_102, %c0_103, %c0_104] : memref<16x32x64xbf16, #tpu.memory_space<vmem>>, vector<1x32x64xbf16>
    %129 = vector.shape_cast %128 : vector<1x32x64xbf16> to vector<32x64xbf16>
    %cst_105 = arith.constant dense<0.000000e+00> : vector<4x64xf32>
    %130 = tpu.matmul %127, %129, %cst_105 {dimension_numbers = #tpu.dot_dimension_numbers<[1], [0], [0], [1], [0, 0, 1, 1], [], []>} : vector<4x32xbf16>, vector<32x64xbf16>, vector<4x64xf32> -> vector<4x64xf32>
    %131 = arith.addf %125, %130 : vector<4x64xf32>
    %c26_106 = arith.constant 26 : index
    %c0_107 = arith.constant 0 : index
    %132 = vector.load %arg9[%c26_106, %c0_107] : memref<100x32xf32, #tpu.memory_space<vmem>>, vector<4x32xf32>
    %133 = arith.truncf %132 : vector<4x32xf32> to vector<4x32xbf16>
    %c3_108 = arith.constant 3 : index
    %c0_109 = arith.constant 0 : index
    %c0_110 = arith.constant 0 : index
    %134 = vector.load %arg4[%c3_108, %c0_109, %c0_110] : memref<16x32x64xbf16, #tpu.memory_space<vmem>>, vector<1x32x64xbf16>
    %135 = vector.shape_cast %134 : vector<1x32x64xbf16> to vector<32x64xbf16>
    %cst_111 = arith.constant dense<0.000000e+00> : vector<4x64xf32>
    %136 = tpu.matmul %133, %135, %cst_111 {dimension_numbers = #tpu.dot_dimension_numbers<[1], [0], [0], [1], [0, 0, 1, 1], [], []>} : vector<4x32xbf16>, vector<32x64xbf16>, vector<4x64xf32> -> vector<4x64xf32>
    %137 = arith.addf %131, %136 : vector<4x64xf32>
    %c30_112 = arith.constant 30 : index
    %c0_113 = arith.constant 0 : index
    %138 = vector.load %arg9[%c30_112, %c0_113] : memref<100x32xf32, #tpu.memory_space<vmem>>, vector<4x32xf32>
    %139 = arith.truncf %138 : vector<4x32xf32> to vector<4x32xbf16>
    %c4_114 = arith.constant 4 : index
    %c0_115 = arith.constant 0 : index
    %c0_116 = arith.constant 0 : index
    %140 = vector.load %arg4[%c4_114, %c0_115, %c0_116] : memref<16x32x64xbf16, #tpu.memory_space<vmem>>, vector<1x32x64xbf16>
    %141 = vector.shape_cast %140 : vector<1x32x64xbf16> to vector<32x64xbf16>
    %cst_117 = arith.constant dense<0.000000e+00> : vector<4x64xf32>
    %142 = tpu.matmul %139, %141, %cst_117 {dimension_numbers = #tpu.dot_dimension_numbers<[1], [0], [0], [1], [0, 0, 1, 1], [], []>} : vector<4x32xbf16>, vector<32x64xbf16>, vector<4x64xf32> -> vector<4x64xf32>
    %143 = arith.addf %137, %142 : vector<4x64xf32>
    %c35_118 = arith.constant 35 : index
    %c0_119 = arith.constant 0 : index
    %144 = vector.load %arg9[%c35_118, %c0_119] : memref<100x32xf32, #tpu.memory_space<vmem>>, vector<4x32xf32>
    %145 = arith.truncf %144 : vector<4x32xf32> to vector<4x32xbf16>
    %c5_120 = arith.constant 5 : index
    %c0_121 = arith.constant 0 : index
    %c0_122 = arith.constant 0 : index
    %146 = vector.load %arg4[%c5_120, %c0_121, %c0_122] : memref<16x32x64xbf16, #tpu.memory_space<vmem>>, vector<1x32x64xbf16>
    %147 = vector.shape_cast %146 : vector<1x32x64xbf16> to vector<32x64xbf16>
    %cst_123 = arith.constant dense<0.000000e+00> : vector<4x64xf32>
    %148 = tpu.matmul %145, %147, %cst_123 {dimension_numbers = #tpu.dot_dimension_numbers<[1], [0], [0], [1], [0, 0, 1, 1], [], []>} : vector<4x32xbf16>, vector<32x64xbf16>, vector<4x64xf32> -> vector<4x64xf32>
    %149 = arith.addf %143, %148 : vector<4x64xf32>
    %c31_124 = arith.constant 31 : index
    %c0_125 = arith.constant 0 : index
    %150 = vector.load %arg9[%c31_124, %c0_125] : memref<100x32xf32, #tpu.memory_space<vmem>>, vector<4x32xf32>
    %151 = arith.truncf %150 : vector<4x32xf32> to vector<4x32xbf16>
    %c6_126 = arith.constant 6 : index
    %c0_127 = arith.constant 0 : index
    %c0_128 = arith.constant 0 : index
    %152 = vector.load %arg4[%c6_126, %c0_127, %c0_128] : memref<16x32x64xbf16, #tpu.memory_space<vmem>>, vector<1x32x64xbf16>
    %153 = vector.shape_cast %152 : vector<1x32x64xbf16> to vector<32x64xbf16>
    %cst_129 = arith.constant dense<0.000000e+00> : vector<4x64xf32>
    %154 = tpu.matmul %151, %153, %cst_129 {dimension_numbers = #tpu.dot_dimension_numbers<[1], [0], [0], [1], [0, 0, 1, 1], [], []>} : vector<4x32xbf16>, vector<32x64xbf16>, vector<4x64xf32> -> vector<4x64xf32>
    %155 = arith.addf %149, %154 : vector<4x64xf32>
    %c36_130 = arith.constant 36 : index
    %c0_131 = arith.constant 0 : index
    %156 = vector.load %arg9[%c36_130, %c0_131] : memref<100x32xf32, #tpu.memory_space<vmem>>, vector<4x32xf32>
    %157 = arith.truncf %156 : vector<4x32xf32> to vector<4x32xbf16>
    %c7_132 = arith.constant 7 : index
    %c0_133 = arith.constant 0 : index
    %c0_134 = arith.constant 0 : index
    %158 = vector.load %arg4[%c7_132, %c0_133, %c0_134] : memref<16x32x64xbf16, #tpu.memory_space<vmem>>, vector<1x32x64xbf16>
    %159 = vector.shape_cast %158 : vector<1x32x64xbf16> to vector<32x64xbf16>
    %cst_135 = arith.constant dense<0.000000e+00> : vector<4x64xf32>
    %160 = tpu.matmul %157, %159, %cst_135 {dimension_numbers = #tpu.dot_dimension_numbers<[1], [0], [0], [1], [0, 0, 1, 1], [], []>} : vector<4x32xbf16>, vector<32x64xbf16>, vector<4x64xf32> -> vector<4x64xf32>
    %161 = arith.addf %155, %160 : vector<4x64xf32>
    %c40 = arith.constant 40 : index
    %c0_136 = arith.constant 0 : index
    %162 = vector.load %arg9[%c40, %c0_136] : memref<100x32xf32, #tpu.memory_space<vmem>>, vector<4x32xf32>
    %163 = arith.truncf %162 : vector<4x32xf32> to vector<4x32xbf16>
    %c8_137 = arith.constant 8 : index
    %c0_138 = arith.constant 0 : index
    %c0_139 = arith.constant 0 : index
    %164 = vector.load %arg4[%c8_137, %c0_138, %c0_139] : memref<16x32x64xbf16, #tpu.memory_space<vmem>>, vector<1x32x64xbf16>
    %165 = vector.shape_cast %164 : vector<1x32x64xbf16> to vector<32x64xbf16>
    %cst_140 = arith.constant dense<0.000000e+00> : vector<4x64xf32>
    %166 = tpu.matmul %163, %165, %cst_140 {dimension_numbers = #tpu.dot_dimension_numbers<[1], [0], [0], [1], [0, 0, 1, 1], [], []>} : vector<4x32xbf16>, vector<32x64xbf16>, vector<4x64xf32> -> vector<4x64xf32>
    %167 = arith.addf %161, %166 : vector<4x64xf32>
    %c45 = arith.constant 45 : index
    %c0_141 = arith.constant 0 : index
    %168 = vector.load %arg9[%c45, %c0_141] : memref<100x32xf32, #tpu.memory_space<vmem>>, vector<4x32xf32>
    %169 = arith.truncf %168 : vector<4x32xf32> to vector<4x32xbf16>
    %c9_142 = arith.constant 9 : index
    %c0_143 = arith.constant 0 : index
    %c0_144 = arith.constant 0 : index
    %170 = vector.load %arg4[%c9_142, %c0_143, %c0_144] : memref<16x32x64xbf16, #tpu.memory_space<vmem>>, vector<1x32x64xbf16>
    %171 = vector.shape_cast %170 : vector<1x32x64xbf16> to vector<32x64xbf16>
    %cst_145 = arith.constant dense<0.000000e+00> : vector<4x64xf32>
    %172 = tpu.matmul %169, %171, %cst_145 {dimension_numbers = #tpu.dot_dimension_numbers<[1], [0], [0], [1], [0, 0, 1, 1], [], []>} : vector<4x32xbf16>, vector<32x64xbf16>, vector<4x64xf32> -> vector<4x64xf32>
    %173 = arith.addf %167, %172 : vector<4x64xf32>
    %c41 = arith.constant 41 : index
    %c0_146 = arith.constant 0 : index
    %174 = vector.load %arg9[%c41, %c0_146] : memref<100x32xf32, #tpu.memory_space<vmem>>, vector<4x32xf32>
    %175 = arith.truncf %174 : vector<4x32xf32> to vector<4x32xbf16>
    %c10_147 = arith.constant 10 : index
    %c0_148 = arith.constant 0 : index
    %c0_149 = arith.constant 0 : index
    %176 = vector.load %arg4[%c10_147, %c0_148, %c0_149] : memref<16x32x64xbf16, #tpu.memory_space<vmem>>, vector<1x32x64xbf16>
    %177 = vector.shape_cast %176 : vector<1x32x64xbf16> to vector<32x64xbf16>
    %cst_150 = arith.constant dense<0.000000e+00> : vector<4x64xf32>
    %178 = tpu.matmul %175, %177, %cst_150 {dimension_numbers = #tpu.dot_dimension_numbers<[1], [0], [0], [1], [0, 0, 1, 1], [], []>} : vector<4x32xbf16>, vector<32x64xbf16>, vector<4x64xf32> -> vector<4x64xf32>
    %179 = arith.addf %173, %178 : vector<4x64xf32>
    %c46 = arith.constant 46 : index
    %c0_151 = arith.constant 0 : index
    %180 = vector.load %arg9[%c46, %c0_151] : memref<100x32xf32, #tpu.memory_space<vmem>>, vector<4x32xf32>
    %181 = arith.truncf %180 : vector<4x32xf32> to vector<4x32xbf16>
    %c11_152 = arith.constant 11 : index
    %c0_153 = arith.constant 0 : index
    %c0_154 = arith.constant 0 : index
    %182 = vector.load %arg4[%c11_152, %c0_153, %c0_154] : memref<16x32x64xbf16, #tpu.memory_space<vmem>>, vector<1x32x64xbf16>
    %183 = vector.shape_cast %182 : vector<1x32x64xbf16> to vector<32x64xbf16>
    %cst_155 = arith.constant dense<0.000000e+00> : vector<4x64xf32>
    %184 = tpu.matmul %181, %183, %cst_155 {dimension_numbers = #tpu.dot_dimension_numbers<[1], [0], [0], [1], [0, 0, 1, 1], [], []>} : vector<4x32xbf16>, vector<32x64xbf16>, vector<4x64xf32> -> vector<4x64xf32>
    %185 = arith.addf %179, %184 : vector<4x64xf32>
    %c50 = arith.constant 50 : index
    %c0_156 = arith.constant 0 : index
    %186 = vector.load %arg9[%c50, %c0_156] : memref<100x32xf32, #tpu.memory_space<vmem>>, vector<4x32xf32>
    %187 = arith.truncf %186 : vector<4x32xf32> to vector<4x32xbf16>
    %c12_157 = arith.constant 12 : index
    %c0_158 = arith.constant 0 : index
    %c0_159 = arith.constant 0 : index
    %188 = vector.load %arg4[%c12_157, %c0_158, %c0_159] : memref<16x32x64xbf16, #tpu.memory_space<vmem>>, vector<1x32x64xbf16>
    %189 = vector.shape_cast %188 : vector<1x32x64xbf16> to vector<32x64xbf16>
    %cst_160 = arith.constant dense<0.000000e+00> : vector<4x64xf32>
    %190 = tpu.matmul %187, %189, %cst_160 {dimension_numbers = #tpu.dot_dimension_numbers<[1], [0], [0], [1], [0, 0, 1, 1], [], []>} : vector<4x32xbf16>, vector<32x64xbf16>, vector<4x64xf32> -> vector<4x64xf32>
    %191 = arith.addf %185, %190 : vector<4x64xf32>
    %c55 = arith.constant 55 : index
    %c0_161 = arith.constant 0 : index
    %192 = vector.load %arg9[%c55, %c0_161] : memref<100x32xf32, #tpu.memory_space<vmem>>, vector<4x32xf32>
    %193 = arith.truncf %192 : vector<4x32xf32> to vector<4x32xbf16>
    %c13_162 = arith.constant 13 : index
    %c0_163 = arith.constant 0 : index
    %c0_164 = arith.constant 0 : index
    %194 = vector.load %arg4[%c13_162, %c0_163, %c0_164] : memref<16x32x64xbf16, #tpu.memory_space<vmem>>, vector<1x32x64xbf16>
    %195 = vector.shape_cast %194 : vector<1x32x64xbf16> to vector<32x64xbf16>
    %cst_165 = arith.constant dense<0.000000e+00> : vector<4x64xf32>
    %196 = tpu.matmul %193, %195, %cst_165 {dimension_numbers = #tpu.dot_dimension_numbers<[1], [0], [0], [1], [0, 0, 1, 1], [], []>} : vector<4x32xbf16>, vector<32x64xbf16>, vector<4x64xf32> -> vector<4x64xf32>
    %197 = arith.addf %191, %196 : vector<4x64xf32>
    %c51 = arith.constant 51 : index
    %c0_166 = arith.constant 0 : index
    %198 = vector.load %arg9[%c51, %c0_166] : memref<100x32xf32, #tpu.memory_space<vmem>>, vector<4x32xf32>
    %199 = arith.truncf %198 : vector<4x32xf32> to vector<4x32xbf16>
    %c14_167 = arith.constant 14 : index
    %c0_168 = arith.constant 0 : index
    %c0_169 = arith.constant 0 : index
    %200 = vector.load %arg4[%c14_167, %c0_168, %c0_169] : memref<16x32x64xbf16, #tpu.memory_space<vmem>>, vector<1x32x64xbf16>
    %201 = vector.shape_cast %200 : vector<1x32x64xbf16> to vector<32x64xbf16>
    %cst_170 = arith.constant dense<0.000000e+00> : vector<4x64xf32>
    %202 = tpu.matmul %199, %201, %cst_170 {dimension_numbers = #tpu.dot_dimension_numbers<[1], [0], [0], [1], [0, 0, 1, 1], [], []>} : vector<4x32xbf16>, vector<32x64xbf16>, vector<4x64xf32> -> vector<4x64xf32>
    %203 = arith.addf %197, %202 : vector<4x64xf32>
    %c56 = arith.constant 56 : index
    %c0_171 = arith.constant 0 : index
    %204 = vector.load %arg9[%c56, %c0_171] : memref<100x32xf32, #tpu.memory_space<vmem>>, vector<4x32xf32>
    %205 = arith.truncf %204 : vector<4x32xf32> to vector<4x32xbf16>
    %c15_172 = arith.constant 15 : index
    %c0_173 = arith.constant 0 : index
    %c0_174 = arith.constant 0 : index
    %206 = vector.load %arg4[%c15_172, %c0_173, %c0_174] : memref<16x32x64xbf16, #tpu.memory_space<vmem>>, vector<1x32x64xbf16>
    %207 = vector.shape_cast %206 : vector<1x32x64xbf16> to vector<32x64xbf16>
    %cst_175 = arith.constant dense<0.000000e+00> : vector<4x64xf32>
    %208 = tpu.matmul %205, %207, %cst_175 {dimension_numbers = #tpu.dot_dimension_numbers<[1], [0], [0], [1], [0, 0, 1, 1], [], []>} : vector<4x32xbf16>, vector<32x64xbf16>, vector<4x64xf32> -> vector<4x64xf32>
    %209 = arith.addf %203, %208 : vector<4x64xf32>
    %c0_176 = arith.constant 0 : index
    %c0_177 = arith.constant 0 : index
    %210 = vector.load %arg5[%c0_176, %c0_177] : memref<1x64xf32, #tpu.memory_space<vmem>>, vector<1x64xf32>
    %211 = vector.broadcast %210 : vector<1x64xf32> to vector<4x64xf32>
    %212 = arith.addf %209, %211 : vector<4x64xf32>
    %cst_178 = arith.constant 0.000000e+00 : f32
    %213 = vector.broadcast %cst_178 : f32 to vector<4x64xf32>
    %214 = arith.maximumf %212, %213 : vector<4x64xf32>
    %c4_179 = arith.constant 4 : index
    %c0_180 = arith.constant 0 : index
    %215 = vector.load %arg10[%c4_179, %c0_180] : memref<16x64xf32, #tpu.memory_space<vmem>>, vector<4x64xf32>
    tpu.vector_store %arg10[%c4_179, %c0_180], %214 {strides = array<i32>} : memref<16x64xf32, #tpu.memory_space<vmem>>, vector<4x64xf32>,
    %cst_181 = arith.constant 0.000000e+00 : f32
    %216 = vector.broadcast %cst_181 : f32 to vector<4x64xf32>
    %c40_182 = arith.constant 40 : index
    %c0_183 = arith.constant 0 : index
    %217 = vector.load %arg9[%c40_182, %c0_183] : memref<100x32xf32, #tpu.memory_space<vmem>>, vector<4x32xf32>
    %218 = arith.truncf %217 : vector<4x32xf32> to vector<4x32xbf16>
    %c0_184 = arith.constant 0 : index
    %c0_185 = arith.constant 0 : index
    %c0_186 = arith.constant 0 : index
    %219 = vector.load %arg4[%c0_184, %c0_185, %c0_186] : memref<16x32x64xbf16, #tpu.memory_space<vmem>>, vector<1x32x64xbf16>
    %220 = vector.shape_cast %219 : vector<1x32x64xbf16> to vector<32x64xbf16>
    %cst_187 = arith.constant dense<0.000000e+00> : vector<4x64xf32>
    %221 = tpu.matmul %218, %220, %cst_187 {dimension_numbers = #tpu.dot_dimension_numbers<[1], [0], [0], [1], [0, 0, 1, 1], [], []>} : vector<4x32xbf16>, vector<32x64xbf16>, vector<4x64xf32> -> vector<4x64xf32>
    %222 = arith.addf %216, %221 : vector<4x64xf32>
    %c45_188 = arith.constant 45 : index
    %c0_189 = arith.constant 0 : index
    %223 = vector.load %arg9[%c45_188, %c0_189] : memref<100x32xf32, #tpu.memory_space<vmem>>, vector<4x32xf32>
    %224 = arith.truncf %223 : vector<4x32xf32> to vector<4x32xbf16>
    %c1_190 = arith.constant 1 : index
    %c0_191 = arith.constant 0 : index
    %c0_192 = arith.constant 0 : index
    %225 = vector.load %arg4[%c1_190, %c0_191, %c0_192] : memref<16x32x64xbf16, #tpu.memory_space<vmem>>, vector<1x32x64xbf16>
    %226 = vector.shape_cast %225 : vector<1x32x64xbf16> to vector<32x64xbf16>
    %cst_193 = arith.constant dense<0.000000e+00> : vector<4x64xf32>
    %227 = tpu.matmul %224, %226, %cst_193 {dimension_numbers = #tpu.dot_dimension_numbers<[1], [0], [0], [1], [0, 0, 1, 1], [], []>} : vector<4x32xbf16>, vector<32x64xbf16>, vector<4x64xf32> -> vector<4x64xf32>
    %228 = arith.addf %222, %227 : vector<4x64xf32>
    %c41_194 = arith.constant 41 : index
    %c0_195 = arith.constant 0 : index
    %229 = vector.load %arg9[%c41_194, %c0_195] : memref<100x32xf32, #tpu.memory_space<vmem>>, vector<4x32xf32>
    %230 = arith.truncf %229 : vector<4x32xf32> to vector<4x32xbf16>
    %c2_196 = arith.constant 2 : index
    %c0_197 = arith.constant 0 : index
    %c0_198 = arith.constant 0 : index
    %231 = vector.load %arg4[%c2_196, %c0_197, %c0_198] : memref<16x32x64xbf16, #tpu.memory_space<vmem>>, vector<1x32x64xbf16>
    %232 = vector.shape_cast %231 : vector<1x32x64xbf16> to vector<32x64xbf16>
    %cst_199 = arith.constant dense<0.000000e+00> : vector<4x64xf32>
    %233 = tpu.matmul %230, %232, %cst_199 {dimension_numbers = #tpu.dot_dimension_numbers<[1], [0], [0], [1], [0, 0, 1, 1], [], []>} : vector<4x32xbf16>, vector<32x64xbf16>, vector<4x64xf32> -> vector<4x64xf32>
    %234 = arith.addf %228, %233 : vector<4x64xf32>
    %c46_200 = arith.constant 46 : index
    %c0_201 = arith.constant 0 : index
    %235 = vector.load %arg9[%c46_200, %c0_201] : memref<100x32xf32, #tpu.memory_space<vmem>>, vector<4x32xf32>
    %236 = arith.truncf %235 : vector<4x32xf32> to vector<4x32xbf16>
    %c3_202 = arith.constant 3 : index
    %c0_203 = arith.constant 0 : index
    %c0_204 = arith.constant 0 : index
    %237 = vector.load %arg4[%c3_202, %c0_203, %c0_204] : memref<16x32x64xbf16, #tpu.memory_space<vmem>>, vector<1x32x64xbf16>
    %238 = vector.shape_cast %237 : vector<1x32x64xbf16> to vector<32x64xbf16>
    %cst_205 = arith.constant dense<0.000000e+00> : vector<4x64xf32>
    %239 = tpu.matmul %236, %238, %cst_205 {dimension_numbers = #tpu.dot_dimension_numbers<[1], [0], [0], [1], [0, 0, 1, 1], [], []>} : vector<4x32xbf16>, vector<32x64xbf16>, vector<4x64xf32> -> vector<4x64xf32>
    %240 = arith.addf %234, %239 : vector<4x64xf32>
    %c50_206 = arith.constant 50 : index
    %c0_207 = arith.constant 0 : index
    %241 = vector.load %arg9[%c50_206, %c0_207] : memref<100x32xf32, #tpu.memory_space<vmem>>, vector<4x32xf32>
    %242 = arith.truncf %241 : vector<4x32xf32> to vector<4x32xbf16>
    %c4_208 = arith.constant 4 : index
    %c0_209 = arith.constant 0 : index
    %c0_210 = arith.constant 0 : index
    %243 = vector.load %arg4[%c4_208, %c0_209, %c0_210] : memref<16x32x64xbf16, #tpu.memory_space<vmem>>, vector<1x32x64xbf16>
    %244 = vector.shape_cast %243 : vector<1x32x64xbf16> to vector<32x64xbf16>
    %cst_211 = arith.constant dense<0.000000e+00> : vector<4x64xf32>
    %245 = tpu.matmul %242, %244, %cst_211 {dimension_numbers = #tpu.dot_dimension_numbers<[1], [0], [0], [1], [0, 0, 1, 1], [], []>} : vector<4x32xbf16>, vector<32x64xbf16>, vector<4x64xf32> -> vector<4x64xf32>
    %246 = arith.addf %240, %245 : vector<4x64xf32>
    %c55_212 = arith.constant 55 : index
    %c0_213 = arith.constant 0 : index
    %247 = vector.load %arg9[%c55_212, %c0_213] : memref<100x32xf32, #tpu.memory_space<vmem>>, vector<4x32xf32>
    %248 = arith.truncf %247 : vector<4x32xf32> to vector<4x32xbf16>
    %c5_214 = arith.constant 5 : index
    %c0_215 = arith.constant 0 : index
    %c0_216 = arith.constant 0 : index
    %249 = vector.load %arg4[%c5_214, %c0_215, %c0_216] : memref<16x32x64xbf16, #tpu.memory_space<vmem>>, vector<1x32x64xbf16>
    %250 = vector.shape_cast %249 : vector<1x32x64xbf16> to vector<32x64xbf16>
    %cst_217 = arith.constant dense<0.000000e+00> : vector<4x64xf32>
    %251 = tpu.matmul %248, %250, %cst_217 {dimension_numbers = #tpu.dot_dimension_numbers<[1], [0], [0], [1], [0, 0, 1, 1], [], []>} : vector<4x32xbf16>, vector<32x64xbf16>, vector<4x64xf32> -> vector<4x64xf32>
    %252 = arith.addf %246, %251 : vector<4x64xf32>
    %c51_218 = arith.constant 51 : index
    %c0_219 = arith.constant 0 : index
    %253 = vector.load %arg9[%c51_218, %c0_219] : memref<100x32xf32, #tpu.memory_space<vmem>>, vector<4x32xf32>
    %254 = arith.truncf %253 : vector<4x32xf32> to vector<4x32xbf16>
    %c6_220 = arith.constant 6 : index
    %c0_221 = arith.constant 0 : index
    %c0_222 = arith.constant 0 : index
    %255 = vector.load %arg4[%c6_220, %c0_221, %c0_222] : memref<16x32x64xbf16, #tpu.memory_space<vmem>>, vector<1x32x64xbf16>
    %256 = vector.shape_cast %255 : vector<1x32x64xbf16> to vector<32x64xbf16>
    %cst_223 = arith.constant dense<0.000000e+00> : vector<4x64xf32>
    %257 = tpu.matmul %254, %256, %cst_223 {dimension_numbers = #tpu.dot_dimension_numbers<[1], [0], [0], [1], [0, 0, 1, 1], [], []>} : vector<4x32xbf16>, vector<32x64xbf16>, vector<4x64xf32> -> vector<4x64xf32>
    %258 = arith.addf %252, %257 : vector<4x64xf32>
    %c56_224 = arith.constant 56 : index
    %c0_225 = arith.constant 0 : index
    %259 = vector.load %arg9[%c56_224, %c0_225] : memref<100x32xf32, #tpu.memory_space<vmem>>, vector<4x32xf32>
    %260 = arith.truncf %259 : vector<4x32xf32> to vector<4x32xbf16>
    %c7_226 = arith.constant 7 : index
    %c0_227 = arith.constant 0 : index
    %c0_228 = arith.constant 0 : index
    %261 = vector.load %arg4[%c7_226, %c0_227, %c0_228] : memref<16x32x64xbf16, #tpu.memory_space<vmem>>, vector<1x32x64xbf16>
    %262 = vector.shape_cast %261 : vector<1x32x64xbf16> to vector<32x64xbf16>
    %cst_229 = arith.constant dense<0.000000e+00> : vector<4x64xf32>
    %263 = tpu.matmul %260, %262, %cst_229 {dimension_numbers = #tpu.dot_dimension_numbers<[1], [0], [0], [1], [0, 0, 1, 1], [], []>} : vector<4x32xbf16>, vector<32x64xbf16>, vector<4x64xf32> -> vector<4x64xf32>
    %264 = arith.addf %258, %263 : vector<4x64xf32>
    %c60 = arith.constant 60 : index
    %c0_230 = arith.constant 0 : index
    %265 = vector.load %arg9[%c60, %c0_230] : memref<100x32xf32, #tpu.memory_space<vmem>>, vector<4x32xf32>
    %266 = arith.truncf %265 : vector<4x32xf32> to vector<4x32xbf16>
    %c8_231 = arith.constant 8 : index
    %c0_232 = arith.constant 0 : index
    %c0_233 = arith.constant 0 : index
    %267 = vector.load %arg4[%c8_231, %c0_232, %c0_233] : memref<16x32x64xbf16, #tpu.memory_space<vmem>>, vector<1x32x64xbf16>
    %268 = vector.shape_cast %267 : vector<1x32x64xbf16> to vector<32x64xbf16>
    %cst_234 = arith.constant dense<0.000000e+00> : vector<4x64xf32>
    %269 = tpu.matmul %266, %268, %cst_234 {dimension_numbers = #tpu.dot_dimension_numbers<[1], [0], [0], [1], [0, 0, 1, 1], [], []>} : vector<4x32xbf16>, vector<32x64xbf16>, vector<4x64xf32> -> vector<4x64xf32>
    %270 = arith.addf %264, %269 : vector<4x64xf32>
    %c65 = arith.constant 65 : index
    %c0_235 = arith.constant 0 : index
    %271 = vector.load %arg9[%c65, %c0_235] : memref<100x32xf32, #tpu.memory_space<vmem>>, vector<4x32xf32>
    %272 = arith.truncf %271 : vector<4x32xf32> to vector<4x32xbf16>
    %c9_236 = arith.constant 9 : index
    %c0_237 = arith.constant 0 : index
    %c0_238 = arith.constant 0 : index
    %273 = vector.load %arg4[%c9_236, %c0_237, %c0_238] : memref<16x32x64xbf16, #tpu.memory_space<vmem>>, vector<1x32x64xbf16>
    %274 = vector.shape_cast %273 : vector<1x32x64xbf16> to vector<32x64xbf16>
    %cst_239 = arith.constant dense<0.000000e+00> : vector<4x64xf32>
    %275 = tpu.matmul %272, %274, %cst_239 {dimension_numbers = #tpu.dot_dimension_numbers<[1], [0], [0], [1], [0, 0, 1, 1], [], []>} : vector<4x32xbf16>, vector<32x64xbf16>, vector<4x64xf32> -> vector<4x64xf32>
    %276 = arith.addf %270, %275 : vector<4x64xf32>
    %c61 = arith.constant 61 : index
    %c0_240 = arith.constant 0 : index
    %277 = vector.load %arg9[%c61, %c0_240] : memref<100x32xf32, #tpu.memory_space<vmem>>, vector<4x32xf32>
    %278 = arith.truncf %277 : vector<4x32xf32> to vector<4x32xbf16>
    %c10_241 = arith.constant 10 : index
    %c0_242 = arith.constant 0 : index
    %c0_243 = arith.constant 0 : index
    %279 = vector.load %arg4[%c10_241, %c0_242, %c0_243] : memref<16x32x64xbf16, #tpu.memory_space<vmem>>, vector<1x32x64xbf16>
    %280 = vector.shape_cast %279 : vector<1x32x64xbf16> to vector<32x64xbf16>
    %cst_244 = arith.constant dense<0.000000e+00> : vector<4x64xf32>
    %281 = tpu.matmul %278, %280, %cst_244 {dimension_numbers = #tpu.dot_dimension_numbers<[1], [0], [0], [1], [0, 0, 1, 1], [], []>} : vector<4x32xbf16>, vector<32x64xbf16>, vector<4x64xf32> -> vector<4x64xf32>
    %282 = arith.addf %276, %281 : vector<4x64xf32>
    %c66 = arith.constant 66 : index
    %c0_245 = arith.constant 0 : index
    %283 = vector.load %arg9[%c66, %c0_245] : memref<100x32xf32, #tpu.memory_space<vmem>>, vector<4x32xf32>
    %284 = arith.truncf %283 : vector<4x32xf32> to vector<4x32xbf16>
    %c11_246 = arith.constant 11 : index
    %c0_247 = arith.constant 0 : index
    %c0_248 = arith.constant 0 : index
    %285 = vector.load %arg4[%c11_246, %c0_247, %c0_248] : memref<16x32x64xbf16, #tpu.memory_space<vmem>>, vector<1x32x64xbf16>
    %286 = vector.shape_cast %285 : vector<1x32x64xbf16> to vector<32x64xbf16>
    %cst_249 = arith.constant dense<0.000000e+00> : vector<4x64xf32>
    %287 = tpu.matmul %284, %286, %cst_249 {dimension_numbers = #tpu.dot_dimension_numbers<[1], [0], [0], [1], [0, 0, 1, 1], [], []>} : vector<4x32xbf16>, vector<32x64xbf16>, vector<4x64xf32> -> vector<4x64xf32>
    %288 = arith.addf %282, %287 : vector<4x64xf32>
    %c70 = arith.constant 70 : index
    %c0_250 = arith.constant 0 : index
    %289 = vector.load %arg9[%c70, %c0_250] : memref<100x32xf32, #tpu.memory_space<vmem>>, vector<4x32xf32>
    %290 = arith.truncf %289 : vector<4x32xf32> to vector<4x32xbf16>
    %c12_251 = arith.constant 12 : index
    %c0_252 = arith.constant 0 : index
    %c0_253 = arith.constant 0 : index
    %291 = vector.load %arg4[%c12_251, %c0_252, %c0_253] : memref<16x32x64xbf16, #tpu.memory_space<vmem>>, vector<1x32x64xbf16>
    %292 = vector.shape_cast %291 : vector<1x32x64xbf16> to vector<32x64xbf16>
    %cst_254 = arith.constant dense<0.000000e+00> : vector<4x64xf32>
    %293 = tpu.matmul %290, %292, %cst_254 {dimension_numbers = #tpu.dot_dimension_numbers<[1], [0], [0], [1], [0, 0, 1, 1], [], []>} : vector<4x32xbf16>, vector<32x64xbf16>, vector<4x64xf32> -> vector<4x64xf32>
    %294 = arith.addf %288, %293 : vector<4x64xf32>
    %c75 = arith.constant 75 : index
    %c0_255 = arith.constant 0 : index
    %295 = vector.load %arg9[%c75, %c0_255] : memref<100x32xf32, #tpu.memory_space<vmem>>, vector<4x32xf32>
    %296 = arith.truncf %295 : vector<4x32xf32> to vector<4x32xbf16>
    %c13_256 = arith.constant 13 : index
    %c0_257 = arith.constant 0 : index
    %c0_258 = arith.constant 0 : index
    %297 = vector.load %arg4[%c13_256, %c0_257, %c0_258] : memref<16x32x64xbf16, #tpu.memory_space<vmem>>, vector<1x32x64xbf16>
    %298 = vector.shape_cast %297 : vector<1x32x64xbf16> to vector<32x64xbf16>
    %cst_259 = arith.constant dense<0.000000e+00> : vector<4x64xf32>
    %299 = tpu.matmul %296, %298, %cst_259 {dimension_numbers = #tpu.dot_dimension_numbers<[1], [0], [0], [1], [0, 0, 1, 1], [], []>} : vector<4x32xbf16>, vector<32x64xbf16>, vector<4x64xf32> -> vector<4x64xf32>
    %300 = arith.addf %294, %299 : vector<4x64xf32>
    %c71 = arith.constant 71 : index
    %c0_260 = arith.constant 0 : index
    %301 = vector.load %arg9[%c71, %c0_260] : memref<100x32xf32, #tpu.memory_space<vmem>>, vector<4x32xf32>
    %302 = arith.truncf %301 : vector<4x32xf32> to vector<4x32xbf16>
    %c14_261 = arith.constant 14 : index
    %c0_262 = arith.constant 0 : index
    %c0_263 = arith.constant 0 : index
    %303 = vector.load %arg4[%c14_261, %c0_262, %c0_263] : memref<16x32x64xbf16, #tpu.memory_space<vmem>>, vector<1x32x64xbf16>
    %304 = vector.shape_cast %303 : vector<1x32x64xbf16> to vector<32x64xbf16>
    %cst_264 = arith.constant dense<0.000000e+00> : vector<4x64xf32>
    %305 = tpu.matmul %302, %304, %cst_264 {dimension_numbers = #tpu.dot_dimension_numbers<[1], [0], [0], [1], [0, 0, 1, 1], [], []>} : vector<4x32xbf16>, vector<32x64xbf16>, vector<4x64xf32> -> vector<4x64xf32>
    %306 = arith.addf %300, %305 : vector<4x64xf32>
    %c76 = arith.constant 76 : index
    %c0_265 = arith.constant 0 : index
    %307 = vector.load %arg9[%c76, %c0_265] : memref<100x32xf32, #tpu.memory_space<vmem>>, vector<4x32xf32>
    %308 = arith.truncf %307 : vector<4x32xf32> to vector<4x32xbf16>
    %c15_266 = arith.constant 15 : index
    %c0_267 = arith.constant 0 : index
    %c0_268 = arith.constant 0 : index
    %309 = vector.load %arg4[%c15_266, %c0_267, %c0_268] : memref<16x32x64xbf16, #tpu.memory_space<vmem>>, vector<1x32x64xbf16>
    %310 = vector.shape_cast %309 : vector<1x32x64xbf16> to vector<32x64xbf16>
    %cst_269 = arith.constant dense<0.000000e+00> : vector<4x64xf32>
    %311 = tpu.matmul %308, %310, %cst_269 {dimension_numbers = #tpu.dot_dimension_numbers<[1], [0], [0], [1], [0, 0, 1, 1], [], []>} : vector<4x32xbf16>, vector<32x64xbf16>, vector<4x64xf32> -> vector<4x64xf32>
    %312 = arith.addf %306, %311 : vector<4x64xf32>
    %c0_270 = arith.constant 0 : index
    %c0_271 = arith.constant 0 : index
    %313 = vector.load %arg5[%c0_270, %c0_271] : memref<1x64xf32, #tpu.memory_space<vmem>>, vector<1x64xf32>
    %314 = vector.broadcast %313 : vector<1x64xf32> to vector<4x64xf32>
    %315 = arith.addf %312, %314 : vector<4x64xf32>
    %cst_272 = arith.constant 0.000000e+00 : f32
    %316 = vector.broadcast %cst_272 : f32 to vector<4x64xf32>
    %317 = arith.maximumf %315, %316 : vector<4x64xf32>
    %c8_273 = arith.constant 8 : index
    %c0_274 = arith.constant 0 : index
    %318 = vector.load %arg10[%c8_273, %c0_274] : memref<16x64xf32, #tpu.memory_space<vmem>>, vector<4x64xf32>
    tpu.vector_store %arg10[%c8_273, %c0_274], %317 {strides = array<i32>} : memref<16x64xf32, #tpu.memory_space<vmem>>, vector<4x64xf32>,
    %cst_275 = arith.constant 0.000000e+00 : f32
    %319 = vector.broadcast %cst_275 : f32 to vector<4x64xf32>
    %c60_276 = arith.constant 60 : index
    %c0_277 = arith.constant 0 : index
    %320 = vector.load %arg9[%c60_276, %c0_277] : memref<100x32xf32, #tpu.memory_space<vmem>>, vector<4x32xf32>
    %321 = arith.truncf %320 : vector<4x32xf32> to vector<4x32xbf16>
    %c0_278 = arith.constant 0 : index
    %c0_279 = arith.constant 0 : index
    %c0_280 = arith.constant 0 : index
    %322 = vector.load %arg4[%c0_278, %c0_279, %c0_280] : memref<16x32x64xbf16, #tpu.memory_space<vmem>>, vector<1x32x64xbf16>
    %323 = vector.shape_cast %322 : vector<1x32x64xbf16> to vector<32x64xbf16>
    %cst_281 = arith.constant dense<0.000000e+00> : vector<4x64xf32>
    %324 = tpu.matmul %321, %323, %cst_281 {dimension_numbers = #tpu.dot_dimension_numbers<[1], [0], [0], [1], [0, 0, 1, 1], [], []>} : vector<4x32xbf16>, vector<32x64xbf16>, vector<4x64xf32> -> vector<4x64xf32>
    %325 = arith.addf %319, %324 : vector<4x64xf32>
    %c65_282 = arith.constant 65 : index
    %c0_283 = arith.constant 0 : index
    %326 = vector.load %arg9[%c65_282, %c0_283] : memref<100x32xf32, #tpu.memory_space<vmem>>, vector<4x32xf32>
    %327 = arith.truncf %326 : vector<4x32xf32> to vector<4x32xbf16>
    %c1_284 = arith.constant 1 : index
    %c0_285 = arith.constant 0 : index
    %c0_286 = arith.constant 0 : index
    %328 = vector.load %arg4[%c1_284, %c0_285, %c0_286] : memref<16x32x64xbf16, #tpu.memory_space<vmem>>, vector<1x32x64xbf16>
    %329 = vector.shape_cast %328 : vector<1x32x64xbf16> to vector<32x64xbf16>
    %cst_287 = arith.constant dense<0.000000e+00> : vector<4x64xf32>
    %330 = tpu.matmul %327, %329, %cst_287 {dimension_numbers = #tpu.dot_dimension_numbers<[1], [0], [0], [1], [0, 0, 1, 1], [], []>} : vector<4x32xbf16>, vector<32x64xbf16>, vector<4x64xf32> -> vector<4x64xf32>
    %331 = arith.addf %325, %330 : vector<4x64xf32>
    %c61_288 = arith.constant 61 : index
    %c0_289 = arith.constant 0 : index
    %332 = vector.load %arg9[%c61_288, %c0_289] : memref<100x32xf32, #tpu.memory_space<vmem>>, vector<4x32xf32>
    %333 = arith.truncf %332 : vector<4x32xf32> to vector<4x32xbf16>
    %c2_290 = arith.constant 2 : index
    %c0_291 = arith.constant 0 : index
    %c0_292 = arith.constant 0 : index
    %334 = vector.load %arg4[%c2_290, %c0_291, %c0_292] : memref<16x32x64xbf16, #tpu.memory_space<vmem>>, vector<1x32x64xbf16>
    %335 = vector.shape_cast %334 : vector<1x32x64xbf16> to vector<32x64xbf16>
    %cst_293 = arith.constant dense<0.000000e+00> : vector<4x64xf32>
    %336 = tpu.matmul %333, %335, %cst_293 {dimension_numbers = #tpu.dot_dimension_numbers<[1], [0], [0], [1], [0, 0, 1, 1], [], []>} : vector<4x32xbf16>, vector<32x64xbf16>, vector<4x64xf32> -> vector<4x64xf32>
    %337 = arith.addf %331, %336 : vector<4x64xf32>
    %c66_294 = arith.constant 66 : index
    %c0_295 = arith.constant 0 : index
    %338 = vector.load %arg9[%c66_294, %c0_295] : memref<100x32xf32, #tpu.memory_space<vmem>>, vector<4x32xf32>
    %339 = arith.truncf %338 : vector<4x32xf32> to vector<4x32xbf16>
    %c3_296 = arith.constant 3 : index
    %c0_297 = arith.constant 0 : index
    %c0_298 = arith.constant 0 : index
    %340 = vector.load %arg4[%c3_296, %c0_297, %c0_298] : memref<16x32x64xbf16, #tpu.memory_space<vmem>>, vector<1x32x64xbf16>
    %341 = vector.shape_cast %340 : vector<1x32x64xbf16> to vector<32x64xbf16>
    %cst_299 = arith.constant dense<0.000000e+00> : vector<4x64xf32>
    %342 = tpu.matmul %339, %341, %cst_299 {dimension_numbers = #tpu.dot_dimension_numbers<[1], [0], [0], [1], [0, 0, 1, 1], [], []>} : vector<4x32xbf16>, vector<32x64xbf16>, vector<4x64xf32> -> vector<4x64xf32>
    %343 = arith.addf %337, %342 : vector<4x64xf32>
    %c70_300 = arith.constant 70 : index
    %c0_301 = arith.constant 0 : index
    %344 = vector.load %arg9[%c70_300, %c0_301] : memref<100x32xf32, #tpu.memory_space<vmem>>, vector<4x32xf32>
    %345 = arith.truncf %344 : vector<4x32xf32> to vector<4x32xbf16>
    %c4_302 = arith.constant 4 : index
    %c0_303 = arith.constant 0 : index
    %c0_304 = arith.constant 0 : index
    %346 = vector.load %arg4[%c4_302, %c0_303, %c0_304] : memref<16x32x64xbf16, #tpu.memory_space<vmem>>, vector<1x32x64xbf16>
    %347 = vector.shape_cast %346 : vector<1x32x64xbf16> to vector<32x64xbf16>
    %cst_305 = arith.constant dense<0.000000e+00> : vector<4x64xf32>
    %348 = tpu.matmul %345, %347, %cst_305 {dimension_numbers = #tpu.dot_dimension_numbers<[1], [0], [0], [1], [0, 0, 1, 1], [], []>} : vector<4x32xbf16>, vector<32x64xbf16>, vector<4x64xf32> -> vector<4x64xf32>
    %349 = arith.addf %343, %348 : vector<4x64xf32>
    %c75_306 = arith.constant 75 : index
    %c0_307 = arith.constant 0 : index
    %350 = vector.load %arg9[%c75_306, %c0_307] : memref<100x32xf32, #tpu.memory_space<vmem>>, vector<4x32xf32>
    %351 = arith.truncf %350 : vector<4x32xf32> to vector<4x32xbf16>
    %c5_308 = arith.constant 5 : index
    %c0_309 = arith.constant 0 : index
    %c0_310 = arith.constant 0 : index
    %352 = vector.load %arg4[%c5_308, %c0_309, %c0_310] : memref<16x32x64xbf16, #tpu.memory_space<vmem>>, vector<1x32x64xbf16>
    %353 = vector.shape_cast %352 : vector<1x32x64xbf16> to vector<32x64xbf16>
    %cst_311 = arith.constant dense<0.000000e+00> : vector<4x64xf32>
    %354 = tpu.matmul %351, %353, %cst_311 {dimension_numbers = #tpu.dot_dimension_numbers<[1], [0], [0], [1], [0, 0, 1, 1], [], []>} : vector<4x32xbf16>, vector<32x64xbf16>, vector<4x64xf32> -> vector<4x64xf32>
    %355 = arith.addf %349, %354 : vector<4x64xf32>
    %c71_312 = arith.constant 71 : index
    %c0_313 = arith.constant 0 : index
    %356 = vector.load %arg9[%c71_312, %c0_313] : memref<100x32xf32, #tpu.memory_space<vmem>>, vector<4x32xf32>
    %357 = arith.truncf %356 : vector<4x32xf32> to vector<4x32xbf16>
    %c6_314 = arith.constant 6 : index
    %c0_315 = arith.constant 0 : index
    %c0_316 = arith.constant 0 : index
    %358 = vector.load %arg4[%c6_314, %c0_315, %c0_316] : memref<16x32x64xbf16, #tpu.memory_space<vmem>>, vector<1x32x64xbf16>
    %359 = vector.shape_cast %358 : vector<1x32x64xbf16> to vector<32x64xbf16>
    %cst_317 = arith.constant dense<0.000000e+00> : vector<4x64xf32>
    %360 = tpu.matmul %357, %359, %cst_317 {dimension_numbers = #tpu.dot_dimension_numbers<[1], [0], [0], [1], [0, 0, 1, 1], [], []>} : vector<4x32xbf16>, vector<32x64xbf16>, vector<4x64xf32> -> vector<4x64xf32>
    %361 = arith.addf %355, %360 : vector<4x64xf32>
    %c76_318 = arith.constant 76 : index
    %c0_319 = arith.constant 0 : index
    %362 = vector.load %arg9[%c76_318, %c0_319] : memref<100x32xf32, #tpu.memory_space<vmem>>, vector<4x32xf32>
    %363 = arith.truncf %362 : vector<4x32xf32> to vector<4x32xbf16>
    %c7_320 = arith.constant 7 : index
    %c0_321 = arith.constant 0 : index
    %c0_322 = arith.constant 0 : index
    %364 = vector.load %arg4[%c7_320, %c0_321, %c0_322] : memref<16x32x64xbf16, #tpu.memory_space<vmem>>, vector<1x32x64xbf16>
    %365 = vector.shape_cast %364 : vector<1x32x64xbf16> to vector<32x64xbf16>
    %cst_323 = arith.constant dense<0.000000e+00> : vector<4x64xf32>
    %366 = tpu.matmul %363, %365, %cst_323 {dimension_numbers = #tpu.dot_dimension_numbers<[1], [0], [0], [1], [0, 0, 1, 1], [], []>} : vector<4x32xbf16>, vector<32x64xbf16>, vector<4x64xf32> -> vector<4x64xf32>
    %367 = arith.addf %361, %366 : vector<4x64xf32>
    %c80 = arith.constant 80 : index
    %c0_324 = arith.constant 0 : index
    %368 = vector.load %arg9[%c80, %c0_324] : memref<100x32xf32, #tpu.memory_space<vmem>>, vector<4x32xf32>
    %369 = arith.truncf %368 : vector<4x32xf32> to vector<4x32xbf16>
    %c8_325 = arith.constant 8 : index
    %c0_326 = arith.constant 0 : index
    %c0_327 = arith.constant 0 : index
    %370 = vector.load %arg4[%c8_325, %c0_326, %c0_327] : memref<16x32x64xbf16, #tpu.memory_space<vmem>>, vector<1x32x64xbf16>
    %371 = vector.shape_cast %370 : vector<1x32x64xbf16> to vector<32x64xbf16>
    %cst_328 = arith.constant dense<0.000000e+00> : vector<4x64xf32>
    %372 = tpu.matmul %369, %371, %cst_328 {dimension_numbers = #tpu.dot_dimension_numbers<[1], [0], [0], [1], [0, 0, 1, 1], [], []>} : vector<4x32xbf16>, vector<32x64xbf16>, vector<4x64xf32> -> vector<4x64xf32>
    %373 = arith.addf %367, %372 : vector<4x64xf32>
    %c85 = arith.constant 85 : index
    %c0_329 = arith.constant 0 : index
    %374 = vector.load %arg9[%c85, %c0_329] : memref<100x32xf32, #tpu.memory_space<vmem>>, vector<4x32xf32>
    %375 = arith.truncf %374 : vector<4x32xf32> to vector<4x32xbf16>
    %c9_330 = arith.constant 9 : index
    %c0_331 = arith.constant 0 : index
    %c0_332 = arith.constant 0 : index
    %376 = vector.load %arg4[%c9_330, %c0_331, %c0_332] : memref<16x32x64xbf16, #tpu.memory_space<vmem>>, vector<1x32x64xbf16>
    %377 = vector.shape_cast %376 : vector<1x32x64xbf16> to vector<32x64xbf16>
    %cst_333 = arith.constant dense<0.000000e+00> : vector<4x64xf32>
    %378 = tpu.matmul %375, %377, %cst_333 {dimension_numbers = #tpu.dot_dimension_numbers<[1], [0], [0], [1], [0, 0, 1, 1], [], []>} : vector<4x32xbf16>, vector<32x64xbf16>, vector<4x64xf32> -> vector<4x64xf32>
    %379 = arith.addf %373, %378 : vector<4x64xf32>
    %c81 = arith.constant 81 : index
    %c0_334 = arith.constant 0 : index
    %380 = vector.load %arg9[%c81, %c0_334] : memref<100x32xf32, #tpu.memory_space<vmem>>, vector<4x32xf32>
    %381 = arith.truncf %380 : vector<4x32xf32> to vector<4x32xbf16>
    %c10_335 = arith.constant 10 : index
    %c0_336 = arith.constant 0 : index
    %c0_337 = arith.constant 0 : index
    %382 = vector.load %arg4[%c10_335, %c0_336, %c0_337] : memref<16x32x64xbf16, #tpu.memory_space<vmem>>, vector<1x32x64xbf16>
    %383 = vector.shape_cast %382 : vector<1x32x64xbf16> to vector<32x64xbf16>
    %cst_338 = arith.constant dense<0.000000e+00> : vector<4x64xf32>
    %384 = tpu.matmul %381, %383, %cst_338 {dimension_numbers = #tpu.dot_dimension_numbers<[1], [0], [0], [1], [0, 0, 1, 1], [], []>} : vector<4x32xbf16>, vector<32x64xbf16>, vector<4x64xf32> -> vector<4x64xf32>
    %385 = arith.addf %379, %384 : vector<4x64xf32>
    %c86 = arith.constant 86 : index
    %c0_339 = arith.constant 0 : index
    %386 = vector.load %arg9[%c86, %c0_339] : memref<100x32xf32, #tpu.memory_space<vmem>>, vector<4x32xf32>
    %387 = arith.truncf %386 : vector<4x32xf32> to vector<4x32xbf16>
    %c11_340 = arith.constant 11 : index
    %c0_341 = arith.constant 0 : index
    %c0_342 = arith.constant 0 : index
    %388 = vector.load %arg4[%c11_340, %c0_341, %c0_342] : memref<16x32x64xbf16, #tpu.memory_space<vmem>>, vector<1x32x64xbf16>
    %389 = vector.shape_cast %388 : vector<1x32x64xbf16> to vector<32x64xbf16>
    %cst_343 = arith.constant dense<0.000000e+00> : vector<4x64xf32>
    %390 = tpu.matmul %387, %389, %cst_343 {dimension_numbers = #tpu.dot_dimension_numbers<[1], [0], [0], [1], [0, 0, 1, 1], [], []>} : vector<4x32xbf16>, vector<32x64xbf16>, vector<4x64xf32> -> vector<4x64xf32>
    %391 = arith.addf %385, %390 : vector<4x64xf32>
    %c90 = arith.constant 90 : index
    %c0_344 = arith.constant 0 : index
    %392 = vector.load %arg9[%c90, %c0_344] : memref<100x32xf32, #tpu.memory_space<vmem>>, vector<4x32xf32>
    %393 = arith.truncf %392 : vector<4x32xf32> to vector<4x32xbf16>
    %c12_345 = arith.constant 12 : index
    %c0_346 = arith.constant 0 : index
    %c0_347 = arith.constant 0 : index
    %394 = vector.load %arg4[%c12_345, %c0_346, %c0_347] : memref<16x32x64xbf16, #tpu.memory_space<vmem>>, vector<1x32x64xbf16>
    %395 = vector.shape_cast %394 : vector<1x32x64xbf16> to vector<32x64xbf16>
    %cst_348 = arith.constant dense<0.000000e+00> : vector<4x64xf32>
    %396 = tpu.matmul %393, %395, %cst_348 {dimension_numbers = #tpu.dot_dimension_numbers<[1], [0], [0], [1], [0, 0, 1, 1], [], []>} : vector<4x32xbf16>, vector<32x64xbf16>, vector<4x64xf32> -> vector<4x64xf32>
    %397 = arith.addf %391, %396 : vector<4x64xf32>
    %c95 = arith.constant 95 : index
    %c0_349 = arith.constant 0 : index
    %398 = vector.load %arg9[%c95, %c0_349] : memref<100x32xf32, #tpu.memory_space<vmem>>, vector<4x32xf32>
    %399 = arith.truncf %398 : vector<4x32xf32> to vector<4x32xbf16>
    %c13_350 = arith.constant 13 : index
    %c0_351 = arith.constant 0 : index
    %c0_352 = arith.constant 0 : index
    %400 = vector.load %arg4[%c13_350, %c0_351, %c0_352] : memref<16x32x64xbf16, #tpu.memory_space<vmem>>, vector<1x32x64xbf16>
    %401 = vector.shape_cast %400 : vector<1x32x64xbf16> to vector<32x64xbf16>
    %cst_353 = arith.constant dense<0.000000e+00> : vector<4x64xf32>
    %402 = tpu.matmul %399, %401, %cst_353 {dimension_numbers = #tpu.dot_dimension_numbers<[1], [0], [0], [1], [0, 0, 1, 1], [], []>} : vector<4x32xbf16>, vector<32x64xbf16>, vector<4x64xf32> -> vector<4x64xf32>
    %403 = arith.addf %397, %402 : vector<4x64xf32>
    %c91 = arith.constant 91 : index
    %c0_354 = arith.constant 0 : index
    %404 = vector.load %arg9[%c91, %c0_354] : memref<100x32xf32, #tpu.memory_space<vmem>>, vector<4x32xf32>
    %405 = arith.truncf %404 : vector<4x32xf32> to vector<4x32xbf16>
    %c14_355 = arith.constant 14 : index
    %c0_356 = arith.constant 0 : index
    %c0_357 = arith.constant 0 : index
    %406 = vector.load %arg4[%c14_355, %c0_356, %c0_357] : memref<16x32x64xbf16, #tpu.memory_space<vmem>>, vector<1x32x64xbf16>
    %407 = vector.shape_cast %406 : vector<1x32x64xbf16> to vector<32x64xbf16>
    %cst_358 = arith.constant dense<0.000000e+00> : vector<4x64xf32>
    %408 = tpu.matmul %405, %407, %cst_358 {dimension_numbers = #tpu.dot_dimension_numbers<[1], [0], [0], [1], [0, 0, 1, 1], [], []>} : vector<4x32xbf16>, vector<32x64xbf16>, vector<4x64xf32> -> vector<4x64xf32>
    %409 = arith.addf %403, %408 : vector<4x64xf32>
    %c96 = arith.constant 96 : index
    %c0_359 = arith.constant 0 : index
    %410 = vector.load %arg9[%c96, %c0_359] : memref<100x32xf32, #tpu.memory_space<vmem>>, vector<4x32xf32>
    %411 = arith.truncf %410 : vector<4x32xf32> to vector<4x32xbf16>
    %c15_360 = arith.constant 15 : index
    %c0_361 = arith.constant 0 : index
    %c0_362 = arith.constant 0 : index
    %412 = vector.load %arg4[%c15_360, %c0_361, %c0_362] : memref<16x32x64xbf16, #tpu.memory_space<vmem>>, vector<1x32x64xbf16>
    %413 = vector.shape_cast %412 : vector<1x32x64xbf16> to vector<32x64xbf16>
    %cst_363 = arith.constant dense<0.000000e+00> : vector<4x64xf32>
    %414 = tpu.matmul %411, %413, %cst_363 {dimension_numbers = #tpu.dot_dimension_numbers<[1], [0], [0], [1], [0, 0, 1, 1], [], []>} : vector<4x32xbf16>, vector<32x64xbf16>, vector<4x64xf32> -> vector<4x64xf32>
    %415 = arith.addf %409, %414 : vector<4x64xf32>
    %c0_364 = arith.constant 0 : index
    %c0_365 = arith.constant 0 : index
    %416 = vector.load %arg5[%c0_364, %c0_365] : memref<1x64xf32, #tpu.memory_space<vmem>>, vector<1x64xf32>
    %417 = vector.broadcast %416 : vector<1x64xf32> to vector<4x64xf32>
    %418 = arith.addf %415, %417 : vector<4x64xf32>
    %cst_366 = arith.constant 0.000000e+00 : f32
    %419 = vector.broadcast %cst_366 : f32 to vector<4x64xf32>
    %420 = arith.maximumf %418, %419 : vector<4x64xf32>
    %c12_367 = arith.constant 12 : index
    %c0_368 = arith.constant 0 : index
    %421 = vector.load %arg10[%c12_367, %c0_368] : memref<16x64xf32, #tpu.memory_space<vmem>>, vector<4x64xf32>
    tpu.vector_store %arg10[%c12_367, %c0_368], %420 {strides = array<i32>} : memref<16x64xf32, #tpu.memory_space<vmem>>, vector<4x64xf32>,
    %cst_369 = arith.constant 0.000000e+00 : f32
    %422 = vector.broadcast %cst_369 : f32 to vector<2x64xf32>
    %c0_370 = arith.constant 0 : index
    %c0_371 = arith.constant 0 : index
    %423 = vector.load %arg10[%c0_370, %c0_371] : memref<16x64xf32, #tpu.memory_space<vmem>>, vector<2x64xf32>
    %424 = arith.truncf %423 : vector<2x64xf32> to vector<2x64xbf16>
    %c0_372 = arith.constant 0 : index
    %c0_373 = arith.constant 0 : index
    %c0_374 = arith.constant 0 : index
    %425 = vector.load %arg6[%c0_372, %c0_373, %c0_374] : memref<9x64x64xbf16, #tpu.memory_space<vmem>>, vector<1x64x64xbf16>
    %426 = vector.shape_cast %425 : vector<1x64x64xbf16> to vector<64x64xbf16>
    %cst_375 = arith.constant dense<0.000000e+00> : vector<2x64xf32>
    %427 = tpu.matmul %424, %426, %cst_375 {dimension_numbers = #tpu.dot_dimension_numbers<[1], [0], [0], [1], [0, 0, 1, 1], [], []>} : vector<2x64xbf16>, vector<64x64xbf16>, vector<2x64xf32> -> vector<2x64xf32>
    %428 = arith.addf %422, %427 : vector<2x64xf32>
    %c1_376 = arith.constant 1 : index
    %c0_377 = arith.constant 0 : index
    %429 = vector.load %arg10[%c1_376, %c0_377] : memref<16x64xf32, #tpu.memory_space<vmem>>, vector<2x64xf32>
    %430 = arith.truncf %429 : vector<2x64xf32> to vector<2x64xbf16>
    %c1_378 = arith.constant 1 : index
    %c0_379 = arith.constant 0 : index
    %c0_380 = arith.constant 0 : index
    %431 = vector.load %arg6[%c1_378, %c0_379, %c0_380] : memref<9x64x64xbf16, #tpu.memory_space<vmem>>, vector<1x64x64xbf16>
    %432 = vector.shape_cast %431 : vector<1x64x64xbf16> to vector<64x64xbf16>
    %cst_381 = arith.constant dense<0.000000e+00> : vector<2x64xf32>
    %433 = tpu.matmul %430, %432, %cst_381 {dimension_numbers = #tpu.dot_dimension_numbers<[1], [0], [0], [1], [0, 0, 1, 1], [], []>} : vector<2x64xbf16>, vector<64x64xbf16>, vector<2x64xf32> -> vector<2x64xf32>
    %434 = arith.addf %428, %433 : vector<2x64xf32>
    %c2_382 = arith.constant 2 : index
    %c0_383 = arith.constant 0 : index
    %435 = vector.load %arg10[%c2_382, %c0_383] : memref<16x64xf32, #tpu.memory_space<vmem>>, vector<2x64xf32>
    %436 = arith.truncf %435 : vector<2x64xf32> to vector<2x64xbf16>
    %c2_384 = arith.constant 2 : index
    %c0_385 = arith.constant 0 : index
    %c0_386 = arith.constant 0 : index
    %437 = vector.load %arg6[%c2_384, %c0_385, %c0_386] : memref<9x64x64xbf16, #tpu.memory_space<vmem>>, vector<1x64x64xbf16>
    %438 = vector.shape_cast %437 : vector<1x64x64xbf16> to vector<64x64xbf16>
    %cst_387 = arith.constant dense<0.000000e+00> : vector<2x64xf32>
    %439 = tpu.matmul %436, %438, %cst_387 {dimension_numbers = #tpu.dot_dimension_numbers<[1], [0], [0], [1], [0, 0, 1, 1], [], []>} : vector<2x64xbf16>, vector<64x64xbf16>, vector<2x64xf32> -> vector<2x64xf32>
    %440 = arith.addf %434, %439 : vector<2x64xf32>
    %c4_388 = arith.constant 4 : index
    %c0_389 = arith.constant 0 : index
    %441 = vector.load %arg10[%c4_388, %c0_389] : memref<16x64xf32, #tpu.memory_space<vmem>>, vector<2x64xf32>
    %442 = arith.truncf %441 : vector<2x64xf32> to vector<2x64xbf16>
    %c3_390 = arith.constant 3 : index
    %c0_391 = arith.constant 0 : index
    %c0_392 = arith.constant 0 : index
    %443 = vector.load %arg6[%c3_390, %c0_391, %c0_392] : memref<9x64x64xbf16, #tpu.memory_space<vmem>>, vector<1x64x64xbf16>
    %444 = vector.shape_cast %443 : vector<1x64x64xbf16> to vector<64x64xbf16>
    %cst_393 = arith.constant dense<0.000000e+00> : vector<2x64xf32>
    %445 = tpu.matmul %442, %444, %cst_393 {dimension_numbers = #tpu.dot_dimension_numbers<[1], [0], [0], [1], [0, 0, 1, 1], [], []>} : vector<2x64xbf16>, vector<64x64xbf16>, vector<2x64xf32> -> vector<2x64xf32>
    %446 = arith.addf %440, %445 : vector<2x64xf32>
    %c5_394 = arith.constant 5 : index
    %c0_395 = arith.constant 0 : index
    %447 = vector.load %arg10[%c5_394, %c0_395] : memref<16x64xf32, #tpu.memory_space<vmem>>, vector<2x64xf32>
    %448 = arith.truncf %447 : vector<2x64xf32> to vector<2x64xbf16>
    %c4_396 = arith.constant 4 : index
    %c0_397 = arith.constant 0 : index
    %c0_398 = arith.constant 0 : index
    %449 = vector.load %arg6[%c4_396, %c0_397, %c0_398] : memref<9x64x64xbf16, #tpu.memory_space<vmem>>, vector<1x64x64xbf16>
    %450 = vector.shape_cast %449 : vector<1x64x64xbf16> to vector<64x64xbf16>
    %cst_399 = arith.constant dense<0.000000e+00> : vector<2x64xf32>
    %451 = tpu.matmul %448, %450, %cst_399 {dimension_numbers = #tpu.dot_dimension_numbers<[1], [0], [0], [1], [0, 0, 1, 1], [], []>} : vector<2x64xbf16>, vector<64x64xbf16>, vector<2x64xf32> -> vector<2x64xf32>
    %452 = arith.addf %446, %451 : vector<2x64xf32>
    %c6_400 = arith.constant 6 : index
    %c0_401 = arith.constant 0 : index
    %453 = vector.load %arg10[%c6_400, %c0_401] : memref<16x64xf32, #tpu.memory_space<vmem>>, vector<2x64xf32>
    %454 = arith.truncf %453 : vector<2x64xf32> to vector<2x64xbf16>
    %c5_402 = arith.constant 5 : index
    %c0_403 = arith.constant 0 : index
    %c0_404 = arith.constant 0 : index
    %455 = vector.load %arg6[%c5_402, %c0_403, %c0_404] : memref<9x64x64xbf16, #tpu.memory_space<vmem>>, vector<1x64x64xbf16>
    %456 = vector.shape_cast %455 : vector<1x64x64xbf16> to vector<64x64xbf16>
    %cst_405 = arith.constant dense<0.000000e+00> : vector<2x64xf32>
    %457 = tpu.matmul %454, %456, %cst_405 {dimension_numbers = #tpu.dot_dimension_numbers<[1], [0], [0], [1], [0, 0, 1, 1], [], []>} : vector<2x64xbf16>, vector<64x64xbf16>, vector<2x64xf32> -> vector<2x64xf32>
    %458 = arith.addf %452, %457 : vector<2x64xf32>
    %c8_406 = arith.constant 8 : index
    %c0_407 = arith.constant 0 : index
    %459 = vector.load %arg10[%c8_406, %c0_407] : memref<16x64xf32, #tpu.memory_space<vmem>>, vector<2x64xf32>
    %460 = arith.truncf %459 : vector<2x64xf32> to vector<2x64xbf16>
    %c6_408 = arith.constant 6 : index
    %c0_409 = arith.constant 0 : index
    %c0_410 = arith.constant 0 : index
    %461 = vector.load %arg6[%c6_408, %c0_409, %c0_410] : memref<9x64x64xbf16, #tpu.memory_space<vmem>>, vector<1x64x64xbf16>
    %462 = vector.shape_cast %461 : vector<1x64x64xbf16> to vector<64x64xbf16>
    %cst_411 = arith.constant dense<0.000000e+00> : vector<2x64xf32>
    %463 = tpu.matmul %460, %462, %cst_411 {dimension_numbers = #tpu.dot_dimension_numbers<[1], [0], [0], [1], [0, 0, 1, 1], [], []>} : vector<2x64xbf16>, vector<64x64xbf16>, vector<2x64xf32> -> vector<2x64xf32>
    %464 = arith.addf %458, %463 : vector<2x64xf32>
    %c9_412 = arith.constant 9 : index
    %c0_413 = arith.constant 0 : index
    %465 = vector.load %arg10[%c9_412, %c0_413] : memref<16x64xf32, #tpu.memory_space<vmem>>, vector<2x64xf32>
    %466 = arith.truncf %465 : vector<2x64xf32> to vector<2x64xbf16>
    %c7_414 = arith.constant 7 : index
    %c0_415 = arith.constant 0 : index
    %c0_416 = arith.constant 0 : index
    %467 = vector.load %arg6[%c7_414, %c0_415, %c0_416] : memref<9x64x64xbf16, #tpu.memory_space<vmem>>, vector<1x64x64xbf16>
    %468 = vector.shape_cast %467 : vector<1x64x64xbf16> to vector<64x64xbf16>
    %cst_417 = arith.constant dense<0.000000e+00> : vector<2x64xf32>
    %469 = tpu.matmul %466, %468, %cst_417 {dimension_numbers = #tpu.dot_dimension_numbers<[1], [0], [0], [1], [0, 0, 1, 1], [], []>} : vector<2x64xbf16>, vector<64x64xbf16>, vector<2x64xf32> -> vector<2x64xf32>
    %470 = arith.addf %464, %469 : vector<2x64xf32>
    %c10_418 = arith.constant 10 : index
    %c0_419 = arith.constant 0 : index
    %471 = vector.load %arg10[%c10_418, %c0_419] : memref<16x64xf32, #tpu.memory_space<vmem>>, vector<2x64xf32>
    %472 = arith.truncf %471 : vector<2x64xf32> to vector<2x64xbf16>
    %c8_420 = arith.constant 8 : index
    %c0_421 = arith.constant 0 : index
    %c0_422 = arith.constant 0 : index
    %473 = vector.load %arg6[%c8_420, %c0_421, %c0_422] : memref<9x64x64xbf16, #tpu.memory_space<vmem>>, vector<1x64x64xbf16>
    %474 = vector.shape_cast %473 : vector<1x64x64xbf16> to vector<64x64xbf16>
    %cst_423 = arith.constant dense<0.000000e+00> : vector<2x64xf32>
    %475 = tpu.matmul %472, %474, %cst_423 {dimension_numbers = #tpu.dot_dimension_numbers<[1], [0], [0], [1], [0, 0, 1, 1], [], []>} : vector<2x64xbf16>, vector<64x64xbf16>, vector<2x64xf32> -> vector<2x64xf32>
    %476 = arith.addf %470, %475 : vector<2x64xf32>
    %c0_424 = arith.constant 0 : index
    %c0_425 = arith.constant 0 : index
    %477 = vector.load %arg7[%c0_424, %c0_425] : memref<1x64xf32, #tpu.memory_space<vmem>>, vector<1x64xf32>
    %478 = vector.broadcast %477 : vector<1x64xf32> to vector<2x64xf32>
    %479 = arith.addf %476, %478 : vector<2x64xf32>
    %cst_426 = arith.constant 0.000000e+00 : f32
    %480 = vector.broadcast %cst_426 : f32 to vector<2x64xf32>
    %481 = arith.maximumf %479, %480 : vector<2x64xf32>
    %c0_427 = arith.constant 0 : index
    %c0_428 = arith.constant 0 : index
    %c0_429 = arith.constant 0 : index
    %c0_430 = arith.constant 0 : index
    %482 = vector.load %arg8[%c0_427, %c0_428, %c0_429, %c0_430] : memref<1x2x2x64xf32, #tpu.memory_space<vmem>>, vector<1x1x2x64xf32>
    %483 = vector.shape_cast %482 : vector<1x1x2x64xf32> to vector<2x64xf32>
    %484 = vector.shape_cast %481 : vector<2x64xf32> to vector<1x1x2x64xf32>
    tpu.vector_store %arg8[%c0_427, %c0_428, %c0_429, %c0_430], %484 {strides = array<i32>} : memref<1x2x2x64xf32, #tpu.memory_space<vmem>>, vector<1x1x2x64xf32>,
    %cst_431 = arith.constant 0.000000e+00 : f32
    %485 = vector.broadcast %cst_431 : f32 to vector<2x64xf32>
    %c4_432 = arith.constant 4 : index
    %c0_433 = arith.constant 0 : index
    %486 = vector.load %arg10[%c4_432, %c0_433] : memref<16x64xf32, #tpu.memory_space<vmem>>, vector<2x64xf32>
    %487 = arith.truncf %486 : vector<2x64xf32> to vector<2x64xbf16>
    %c0_434 = arith.constant 0 : index
    %c0_435 = arith.constant 0 : index
    %c0_436 = arith.constant 0 : index
    %488 = vector.load %arg6[%c0_434, %c0_435, %c0_436] : memref<9x64x64xbf16, #tpu.memory_space<vmem>>, vector<1x64x64xbf16>
    %489 = vector.shape_cast %488 : vector<1x64x64xbf16> to vector<64x64xbf16>
    %cst_437 = arith.constant dense<0.000000e+00> : vector<2x64xf32>
    %490 = tpu.matmul %487, %489, %cst_437 {dimension_numbers = #tpu.dot_dimension_numbers<[1], [0], [0], [1], [0, 0, 1, 1], [], []>} : vector<2x64xbf16>, vector<64x64xbf16>, vector<2x64xf32> -> vector<2x64xf32>
    %491 = arith.addf %485, %490 : vector<2x64xf32>
    %c5_438 = arith.constant 5 : index
    %c0_439 = arith.constant 0 : index
    %492 = vector.load %arg10[%c5_438, %c0_439] : memref<16x64xf32, #tpu.memory_space<vmem>>, vector<2x64xf32>
    %493 = arith.truncf %492 : vector<2x64xf32> to vector<2x64xbf16>
    %c1_440 = arith.constant 1 : index
    %c0_441 = arith.constant 0 : index
    %c0_442 = arith.constant 0 : index
    %494 = vector.load %arg6[%c1_440, %c0_441, %c0_442] : memref<9x64x64xbf16, #tpu.memory_space<vmem>>, vector<1x64x64xbf16>
    %495 = vector.shape_cast %494 : vector<1x64x64xbf16> to vector<64x64xbf16>
    %cst_443 = arith.constant dense<0.000000e+00> : vector<2x64xf32>
    %496 = tpu.matmul %493, %495, %cst_443 {dimension_numbers = #tpu.dot_dimension_numbers<[1], [0], [0], [1], [0, 0, 1, 1], [], []>} : vector<2x64xbf16>, vector<64x64xbf16>, vector<2x64xf32> -> vector<2x64xf32>
    %497 = arith.addf %491, %496 : vector<2x64xf32>
    %c6_444 = arith.constant 6 : index
    %c0_445 = arith.constant 0 : index
    %498 = vector.load %arg10[%c6_444, %c0_445] : memref<16x64xf32, #tpu.memory_space<vmem>>, vector<2x64xf32>
    %499 = arith.truncf %498 : vector<2x64xf32> to vector<2x64xbf16>
    %c2_446 = arith.constant 2 : index
    %c0_447 = arith.constant 0 : index
    %c0_448 = arith.constant 0 : index
    %500 = vector.load %arg6[%c2_446, %c0_447, %c0_448] : memref<9x64x64xbf16, #tpu.memory_space<vmem>>, vector<1x64x64xbf16>
    %501 = vector.shape_cast %500 : vector<1x64x64xbf16> to vector<64x64xbf16>
    %cst_449 = arith.constant dense<0.000000e+00> : vector<2x64xf32>
    %502 = tpu.matmul %499, %501, %cst_449 {dimension_numbers = #tpu.dot_dimension_numbers<[1], [0], [0], [1], [0, 0, 1, 1], [], []>} : vector<2x64xbf16>, vector<64x64xbf16>, vector<2x64xf32> -> vector<2x64xf32>
    %503 = arith.addf %497, %502 : vector<2x64xf32>
    %c8_450 = arith.constant 8 : index
    %c0_451 = arith.constant 0 : index
    %504 = vector.load %arg10[%c8_450, %c0_451] : memref<16x64xf32, #tpu.memory_space<vmem>>, vector<2x64xf32>
    %505 = arith.truncf %504 : vector<2x64xf32> to vector<2x64xbf16>
    %c3_452 = arith.constant 3 : index
    %c0_453 = arith.constant 0 : index
    %c0_454 = arith.constant 0 : index
    %506 = vector.load %arg6[%c3_452, %c0_453, %c0_454] : memref<9x64x64xbf16, #tpu.memory_space<vmem>>, vector<1x64x64xbf16>
    %507 = vector.shape_cast %506 : vector<1x64x64xbf16> to vector<64x64xbf16>
    %cst_455 = arith.constant dense<0.000000e+00> : vector<2x64xf32>
    %508 = tpu.matmul %505, %507, %cst_455 {dimension_numbers = #tpu.dot_dimension_numbers<[1], [0], [0], [1], [0, 0, 1, 1], [], []>} : vector<2x64xbf16>, vector<64x64xbf16>, vector<2x64xf32> -> vector<2x64xf32>
    %509 = arith.addf %503, %508 : vector<2x64xf32>
    %c9_456 = arith.constant 9 : index
    %c0_457 = arith.constant 0 : index
    %510 = vector.load %arg10[%c9_456, %c0_457] : memref<16x64xf32, #tpu.memory_space<vmem>>, vector<2x64xf32>
    %511 = arith.truncf %510 : vector<2x64xf32> to vector<2x64xbf16>
    %c4_458 = arith.constant 4 : index
    %c0_459 = arith.constant 0 : index
    %c0_460 = arith.constant 0 : index
    %512 = vector.load %arg6[%c4_458, %c0_459, %c0_460] : memref<9x64x64xbf16, #tpu.memory_space<vmem>>, vector<1x64x64xbf16>
    %513 = vector.shape_cast %512 : vector<1x64x64xbf16> to vector<64x64xbf16>
    %cst_461 = arith.constant dense<0.000000e+00> : vector<2x64xf32>
    %514 = tpu.matmul %511, %513, %cst_461 {dimension_numbers = #tpu.dot_dimension_numbers<[1], [0], [0], [1], [0, 0, 1, 1], [], []>} : vector<2x64xbf16>, vector<64x64xbf16>, vector<2x64xf32> -> vector<2x64xf32>
    %515 = arith.addf %509, %514 : vector<2x64xf32>
    %c10_462 = arith.constant 10 : index
    %c0_463 = arith.constant 0 : index
    %516 = vector.load %arg10[%c10_462, %c0_463] : memref<16x64xf32, #tpu.memory_space<vmem>>, vector<2x64xf32>
    %517 = arith.truncf %516 : vector<2x64xf32> to vector<2x64xbf16>
    %c5_464 = arith.constant 5 : index
    %c0_465 = arith.constant 0 : index
    %c0_466 = arith.constant 0 : index
    %518 = vector.load %arg6[%c5_464, %c0_465, %c0_466] : memref<9x64x64xbf16, #tpu.memory_space<vmem>>, vector<1x64x64xbf16>
    %519 = vector.shape_cast %518 : vector<1x64x64xbf16> to vector<64x64xbf16>
    %cst_467 = arith.constant dense<0.000000e+00> : vector<2x64xf32>
    %520 = tpu.matmul %517, %519, %cst_467 {dimension_numbers = #tpu.dot_dimension_numbers<[1], [0], [0], [1], [0, 0, 1, 1], [], []>} : vector<2x64xbf16>, vector<64x64xbf16>, vector<2x64xf32> -> vector<2x64xf32>
    %521 = arith.addf %515, %520 : vector<2x64xf32>
    %c12_468 = arith.constant 12 : index
    %c0_469 = arith.constant 0 : index
    %522 = vector.load %arg10[%c12_468, %c0_469] : memref<16x64xf32, #tpu.memory_space<vmem>>, vector<2x64xf32>
    %523 = arith.truncf %522 : vector<2x64xf32> to vector<2x64xbf16>
    %c6_470 = arith.constant 6 : index
    %c0_471 = arith.constant 0 : index
    %c0_472 = arith.constant 0 : index
    %524 = vector.load %arg6[%c6_470, %c0_471, %c0_472] : memref<9x64x64xbf16, #tpu.memory_space<vmem>>, vector<1x64x64xbf16>
    %525 = vector.shape_cast %524 : vector<1x64x64xbf16> to vector<64x64xbf16>
    %cst_473 = arith.constant dense<0.000000e+00> : vector<2x64xf32>
    %526 = tpu.matmul %523, %525, %cst_473 {dimension_numbers = #tpu.dot_dimension_numbers<[1], [0], [0], [1], [0, 0, 1, 1], [], []>} : vector<2x64xbf16>, vector<64x64xbf16>, vector<2x64xf32> -> vector<2x64xf32>
    %527 = arith.addf %521, %526 : vector<2x64xf32>
    %c13_474 = arith.constant 13 : index
    %c0_475 = arith.constant 0 : index
    %528 = vector.load %arg10[%c13_474, %c0_475] : memref<16x64xf32, #tpu.memory_space<vmem>>, vector<2x64xf32>
    %529 = arith.truncf %528 : vector<2x64xf32> to vector<2x64xbf16>
    %c7_476 = arith.constant 7 : index
    %c0_477 = arith.constant 0 : index
    %c0_478 = arith.constant 0 : index
    %530 = vector.load %arg6[%c7_476, %c0_477, %c0_478] : memref<9x64x64xbf16, #tpu.memory_space<vmem>>, vector<1x64x64xbf16>
    %531 = vector.shape_cast %530 : vector<1x64x64xbf16> to vector<64x64xbf16>
    %cst_479 = arith.constant dense<0.000000e+00> : vector<2x64xf32>
    %532 = tpu.matmul %529, %531, %cst_479 {dimension_numbers = #tpu.dot_dimension_numbers<[1], [0], [0], [1], [0, 0, 1, 1], [], []>} : vector<2x64xbf16>, vector<64x64xbf16>, vector<2x64xf32> -> vector<2x64xf32>
    %533 = arith.addf %527, %532 : vector<2x64xf32>
    %c14_480 = arith.constant 14 : index
    %c0_481 = arith.constant 0 : index
    %534 = vector.load %arg10[%c14_480, %c0_481] : memref<16x64xf32, #tpu.memory_space<vmem>>, vector<2x64xf32>
    %535 = arith.truncf %534 : vector<2x64xf32> to vector<2x64xbf16>
    %c8_482 = arith.constant 8 : index
    %c0_483 = arith.constant 0 : index
    %c0_484 = arith.constant 0 : index
    %536 = vector.load %arg6[%c8_482, %c0_483, %c0_484] : memref<9x64x64xbf16, #tpu.memory_space<vmem>>, vector<1x64x64xbf16>
    %537 = vector.shape_cast %536 : vector<1x64x64xbf16> to vector<64x64xbf16>
    %cst_485 = arith.constant dense<0.000000e+00> : vector<2x64xf32>
    %538 = tpu.matmul %535, %537, %cst_485 {dimension_numbers = #tpu.dot_dimension_numbers<[1], [0], [0], [1], [0, 0, 1, 1], [], []>} : vector<2x64xbf16>, vector<64x64xbf16>, vector<2x64xf32> -> vector<2x64xf32>
    %539 = arith.addf %533, %538 : vector<2x64xf32>
    %c0_486 = arith.constant 0 : index
    %c0_487 = arith.constant 0 : index
    %540 = vector.load %arg7[%c0_486, %c0_487] : memref<1x64xf32, #tpu.memory_space<vmem>>, vector<1x64xf32>
    %541 = vector.broadcast %540 : vector<1x64xf32> to vector<2x64xf32>
    %542 = arith.addf %539, %541 : vector<2x64xf32>
    %cst_488 = arith.constant 0.000000e+00 : f32
    %543 = vector.broadcast %cst_488 : f32 to vector<2x64xf32>
    %544 = arith.maximumf %542, %543 : vector<2x64xf32>
    %c0_489 = arith.constant 0 : index
    %c1_490 = arith.constant 1 : index
    %c0_491 = arith.constant 0 : index
    %c0_492 = arith.constant 0 : index
    %545 = vector.load %arg8[%c0_489, %c1_490, %c0_491, %c0_492] : memref<1x2x2x64xf32, #tpu.memory_space<vmem>>, vector<1x1x2x64xf32>
    %546 = vector.shape_cast %545 : vector<1x1x2x64xf32> to vector<2x64xf32>
    %547 = vector.shape_cast %544 : vector<2x64xf32> to vector<1x1x2x64xf32>
    tpu.vector_store %arg8[%c0_489, %c1_490, %c0_491, %c0_492], %547 {strides = array<i32>} : memref<1x2x2x64xf32, #tpu.memory_space<vmem>>, vector<1x1x2x64xf32>,
    return
  }
  func.func @transform_0(%arg0: i32) -> (i32, i32, i32) {
    %c0_i32 = arith.constant 0 : i32
    %c0_i32_0 = arith.constant 0 : i32
    %c0_i32_1 = arith.constant 0 : i32
    return %arg0, %c0_i32, %c0_i32_0 : i32, i32, i32
  }
  func.func @transform_1(%arg0: i32) -> (i32, i32) {
    %c0_i32 = arith.constant 0 : i32
    %c0_i32_0 = arith.constant 0 : i32
    %c0_i32_1 = arith.constant 0 : i32
    return %c0_i32, %c0_i32_0 : i32, i32
  }
  func.func @transform_2(%arg0: i32) -> (i32, i32) {
    %c0_i32 = arith.constant 0 : i32
    %c0_i32_0 = arith.constant 0 : i32
    %c0_i32_1 = arith.constant 0 : i32
    return %c0_i32, %c0_i32_0 : i32, i32
  }
  func.func @transform_3(%arg0: i32) -> (i32, i32, i32) {
    %c0_i32 = arith.constant 0 : i32
    %c0_i32_0 = arith.constant 0 : i32
    %c0_i32_1 = arith.constant 0 : i32
    %c0_i32_2 = arith.constant 0 : i32
    return %c0_i32, %c0_i32_0, %c0_i32_1 : i32, i32, i32
  }
  func.func @transform_4(%arg0: i32) -> (i32, i32) {
    %c0_i32 = arith.constant 0 : i32
    %c0_i32_0 = arith.constant 0 : i32
    %c0_i32_1 = arith.constant 0 : i32
    return %c0_i32, %c0_i32_0 : i32, i32
  }
  func.func @transform_5(%arg0: i32) -> (i32, i32, i32) {
    %c0_i32 = arith.constant 0 : i32
    %c0_i32_0 = arith.constant 0 : i32
    %c0_i32_1 = arith.constant 0 : i32
    %c0_i32_2 = arith.constant 0 : i32
    return %c0_i32, %c0_i32_0, %c0_i32_1 : i32, i32, i32
  }
  func.func @transform_6(%arg0: i32) -> (i32, i32) {
    %c0_i32 = arith.constant 0 : i32
    %c0_i32_0 = arith.constant 0 : i32
    %c0_i32_1 = arith.constant 0 : i32
    return %c0_i32, %c0_i32_0 : i32, i32
  }
  func.func @transform_7(%arg0: i32) -> (i32, i32, i32, i32) {
    %c0_i32 = arith.constant 0 : i32
    %c0_i32_0 = arith.constant 0 : i32
    %c0_i32_1 = arith.constant 0 : i32
    %c0_i32_2 = arith.constant 0 : i32
    return %arg0, %c0_i32, %c0_i32_0, %c0_i32_1 : i32, i32, i32, i32
  }
}

</mosaic_0001>

<bundles_post_ra>
// kernel: feature_extractor.1
= control target key start
LH: loop header
LB: loop body
LE: loop exit
PB: predicated region body
PF: predicated region fallthrough
CT: control target
= control target key end

     0   :  { %12 = vsyncpa [#allocation5], 0  ;;  %s9641_s0 = inlined_call_operand.vmem [shape: bf16[2,100,256], index: 0, kind: input, shape index: {}]   ;;  %s9642_s1 = inlined_call_operand.vmem [shape: bf16[256,32], index: 1, kind: input, shape index: {}]   ;;  %s9643_s2 = inlined_call_operand.vmem [shape: f32[1,32], index: 2, kind: input, shape index: {}]   ;;  %s9644_s3 = inlined_call_operand.vmem [shape: bf16[16,32,64], index: 3, kind: input, shape index: {}]   ;;  %s9645_s4 = inlined_call_operand.vmem [shape: f32[1,64], index: 4, kind: input, shape index: {}]   ;;  %s9646_s5 = inlined_call_operand.vmem [shape: bf16[9,64,64], index: 5, kind: input, shape index: {}]   ;;  %s9647_s6 = inlined_call_operand.vmem [shape: f32[1,64], index: 6, kind: input, shape index: {}]   ;;  %s9648_s7 = inlined_call_operand.hbm [shape: f32[2,2,2,64], index: 7, kind: output, shape index: {}]  }
   0x1   :  { %14 = vsyncpa [#allocation5 + $0x1], 0  ;;  %s8289_s24 = smov 0   ;;  %s8291_s25 = smov 0  }
   0x2   :  { %s8293_s26 = smov 0   ;;  %s8295_s27 = smov 0  }
   0x3 LB: > { %s8310_s28 = sadd.s32 4294967295, %s8242_s27   ;;  %s6132_s29 = sadd.s32 4294967294, %s8242_s27   ;;  %s8242_s27 = sphi %s8295_s27, %s9654_s27   ;;  %s8238_s26 = sphi %s8293_s26, %s9653_s26   ;;  %s8234_s25 = sphi %s8291_s25, %s9652_s25   ;;  %s8230_s24 = sphi %s8289_s24, %s9651_s24  }
   0x4   : > { %s8314_s30 = sadd.s32 1, %s8242_s27   ;;  %s179_s8 = sadd.s32 1, %s8238_s26 }
   0x5   : > { %s176_s9 = ssub.s32 %s8242_s27, %s8314_s30  ;;  %p189_p0 = scmp.ne.s32.totalorder %s8238_s26, %s8234_s25 }
   0x6   : > { %p177_p1 = scmp.eq.s32.totalorder %s176_s9, 0  ;;  %p190_p2 = scmp.eq.s32.totalorder %s8310_s28, 1 }
   0x7   : > { %p195_p3 = scmp.ne.s32.totalorder %s8234_s25, %s8230_s24  ;;  %p196_p4 = scmp.eq.s32.totalorder %s6132_s29, 1 }
   0x8   : > { %s8325_s10 = scalar_select %p177_p1, %s8238_s26, %s179_s8  }
   0x9   : > { %p8327_p5 = por %p190_p2, %p189_p0  ;;  %p8331_p6 = por %p196_p4, %p195_p3 }
   0xa   : > { %p6135_p7 = scmp.ge.s32.totalorder %s8242_s27, 1  ;;  %p240_p8 = scmp.lt.s32.totalorder %s8242_s27, 3 }
   0xc   : > { %p241_p9 = pnand %p6135_p7, %p240_p8 }
   0xd   : > { %v7944_v0 = vld [vmem:[%s9642_s1 + $0x40] sm:$0xff] (!%p241_p9)   ;;  %v7946_v2 = vld [vmem:[%s9642_s1 + $0x48] sm:$0xff] (!%p241_p9)   ;;  %p272_p10 = scmp.lt.s32.totalorder (!%p241_p9), %s8310_s28, 1  ;;  %v7948_v4 = vld [vmem:[%s9642_s1 + $0x50] sm:$0xff] (!%p241_p9)   ;;  %v8244_v29 = vmov (!%p241_p9), 0.0   ;;  %vm8245_vm0 = vmmov (!%p241_p9), 0  }
   0xe   : > { %244 = sbr.rel (%p241_p9) target bundleno = 1044 (0x414), region = 48  ;;  %v7945_v1 = vld [vmem:[%s9642_s1] sm:$0xff] (!%p241_p9)   ;;  %6832 = vmatprep.subr.bf16.mxu0 (!%p241_p9), %v7944_v0  ;;  %v7947_v3 = vld [vmem:[%s9642_s1 + $0x8] sm:$0xff] (!%p241_p9)   ;;  %v7949_v5 = vld [vmem:[%s9642_s1 + $0x10] sm:$0xff] (!%p241_p9)   ;;  %7172 = vmatprep.subr.bf16.mxu1 (!%p241_p9), %v8244_v29  ;;  %vm594_vm1 = vcmask (!%p241_p9), 261120   ;;  %vm607_vm2 = vcmask (!%p241_p9), 257024  }
   0xf   : > { %6833 = vmatpush3.bf16.msra.mxu0 (!%p241_p9), %v7945_v1  ;;  %v7950_v6 = vld [vmem:[%s9642_s1 + $0x58] sm:$0xff] (!%p241_p9)   ;;  %v7952_v8 = vld [vmem:[%s9642_s1 + $0x60] sm:$0xff] (!%p241_p9)   ;;  %v7954_v10 = vld [vmem:[%s9642_s1 + $0x68] sm:$0xff] (!%p241_p9)   ;;  %7176 = vmatprep.mubr.msk.bf16.mxu1 (!%p241_p9), %vm8245_vm0, %v8244_v29  ;;  %vm1623_vm3 = vcmask (!%p241_p9), 519168   ;;  %vm4670_vm4 = vcmask (!%p241_p9), 523264   ;;  %s269_s29 = sand.u32 (!%p241_p9), 1, %s8234_s25  }
  0x10   : > { %6834 = vmatprep.subr.bf16.mxu0 (!%p241_p9), %v7946_v2  ;;  %v7951_v7 = vld [vmem:[%s9642_s1 + $0x18] sm:$0xff] (!%p241_p9)   ;;  %v7953_v9 = vld [vmem:[%s9642_s1 + $0x20] sm:$0xff] (!%p241_p9)   ;;  %v7955_v12 = vld [vmem:[%s9642_s1 + $0x28] sm:$0xff] (!%p241_p9)   ;;  %s6136_s9 = sshll.u32 (!%p241_p9), %s269_s29, 2  ;;  %vm5343_vm5 = vcmask (!%p241_p9), 517120   ;;  %s9600_s18 = scalar_lea.sflag (!%p241_p9), [#allocation5], %s269_s29 }
  0x11   : > { %v7956_v13 = vld [vmem:[%s9642_s1 + $0x70] sm:$0xff] (!%p241_p9)   ;;  %v7958_v15 = vld [vmem:[%s9642_s1 + $0x78] sm:$0xff] (!%p241_p9)   ;;  %v7983_v34 = vld [vmem:[%s9644_s3 + $0xa0] sm:$0xff] (!%p241_p9)   ;;  %s9583_s13 = scalar_lea.vmem (!%p241_p9), [#allocation4], %s6136_s9 }
  0x12   : > { %v7957_v14 = vld [vmem:[%s9642_s1 + $0x30] sm:$0xff] (!%p241_p9)   ;;  %v7959_v16 = vld [vmem:[%s9642_s1 + $0x38] sm:$0xff] (!%p241_p9)   ;;  %v7985_v35 = vld [vmem:[%s9644_s3 + $0xa8] sm:$0xff] (!%p241_p9)  }
  0x13   : > { %6835 = vmatpush3.bf16.msra.mxu0 (!%p241_p9), %v7947_v3  ;;  %v7978_v28 = vld [vmem:[%s9644_s3 + $0x10] sm:$0xff] (!%p241_p9)   ;;  %v7979_v30 = vld [vmem:[%s9644_s3 + $0x18] sm:$0xff] (!%p241_p9)   ;;  %v8430_v37 = vld [vmem:[%s9643_s2] ss:$0 sm:$0xff] (!%p241_p9) }
  0x14   : > { %6836 = vmatprep.subr.bf16.mxu0 (!%p241_p9), %v7948_v4  ;;  %7173 = vmatpush3.bf16.msra.mxu1 (!%p241_p9), %v7978_v28  ;;  %v7982_v60 = vld [vmem:[%s9644_s3] sm:$0xff] (!%p241_p9)   ;;  %v7984_v3 = vld [vmem:[%s9644_s3 + $0x8] sm:$0xff] (!%p241_p9)   ;;  %v7990_v28 = vld [vmem:[%s9644_s3 + $0x30] sm:$0xff] (!%p241_p9)  }
  0x15   : > { %s273_s23 = scalar_select %p272_p10, %s8310_s28, 1  ;;  %7174 = vmatprep.subr.bf16.mxu1 %v8244_v29 }
  0x17   : > { %s7900_s14 = smul.u32 104, %s273_s23  ;;  %6837 = vmatpush3.bf16.msra.mxu0 %v7949_v5 }
  0x18   : > { %6838 = vmatprep.subr.bf16.mxu0 %v7950_v6  ;;  %7175 = vmatpush3.bf16.msra.mxu1 %v7979_v30  ;;  %v7991_v30 = vld [vmem:[%s9644_s3 + $0xe0] sm:$0xff]  }
  0x19   : > { %s8369_s21 = scalar_lea.vmem %s9641_s0, %s7900_s14  ;;  %7180 = vmatprep.subr.bf16.mxu1 %v8244_v29  ;;  %s6831_s14 = sshll.u32 %s8310_s28, 6 }
  0x1a   : > { %v7962_v11 = vld [vmem:[%s8369_s21 + $0x4] ss:$8 sps:$4 sm:$0xff]   ;;  %v7960_v17 = vld [vmem:[%s8369_s21] ss:$8 sps:$4 sm:$0xff]   ;;  %v7963_v18 = vld [vmem:[%s8369_s21 + $0x14] ss:$8 sps:$4 sm:$0xff]   ;;  %s9592_s17 = scalar_lea.hbm %s9648_s7, %s6831_s14 }
  0x1b   : > { %6839 = vmatpush3.bf16.msra.mxu0 %v7951_v7  ;;  %525 = vmatprep.mubr.bf16.mxu0 %v7962_v11  ;;  %v7965_v19 = vld [vmem:[%s8369_s21 + $0x10] ss:$8 sps:$4 sm:$0xff]   ;;  %v7966_v20 = vld [vmem:[%s8369_s21 + $0x24] ss:$8 sps:$4 sm:$0xff]   ;;  %v7968_v21 = vld [vmem:[%s8369_s21 + $0x20] ss:$8 sps:$4 sm:$0xff]  }
  0x1c   : > { %6840 = vmatprep.subr.bf16.mxu0 %v7952_v8  ;;  %v7969_v22 = vld [vmem:[%s8369_s21 + $0x34] ss:$8 sps:$4 sm:$0xff]   ;;  %v7971_v23 = vld [vmem:[%s8369_s21 + $0x30] ss:$8 sps:$4 sm:$0xff]   ;;  %v7972_v24 = vld [vmem:[%s8369_s21 + $0x44] ss:$8 sps:$4 sm:$0xff]  }
  0x1d   : > { %v7974_v25 = vld [vmem:[%s8369_s21 + $0x40] ss:$8 sps:$4 sm:$0xff]   ;;  %v7975_v26 = vld [vmem:[%s8369_s21 + $0x54] ss:$8 sps:$4 sm:$0xff]   ;;  %v7977_v27 = vld [vmem:[%s8369_s21 + $0x50] ss:$8 sps:$4 sm:$0xff]  }
  0x1e   : > { %v290_v31 = vld [vmem:[%s8369_s21 + $0x60] sm:$0x33]  ;;  %s6070_s21 = sshll.u32 %s9583_s13, 4  ;;  %s8246_s28 = smov [#allocation4]   ;;  %s9594_s21 = int_to_ptr.vmem [resolvable:$true] %s6070_s21 }
  0x1f   : > { %6841 = vmatpush3.bf16.msra.mxu0 %v7953_v9  ;;  %v6152_v32 = vcombine.high %v290_v31, %v290_v31  ;;  %v6151_v33 = vcombine.low %v290_v31, %v290_v31  ;;  %v7986_v9 = vld [vmem:[%s9644_s3 + $0x20] sm:$0xff]   ;;  %s8180_s19 = scalar_lea.vmem %s9594_s21, 64  ;;  %s8184_s20 = sshll.u32 %s8246_s28, 4  ;;  %s8185_s20 = int_to_ptr.vmem [resolvable:$false] %s8184_s20 }
  0x20   : > { %6842 = vmatprep.subr.bf16.mxu0 %v7954_v10  ;;  %v7987_v11 = vld [vmem:[%s9644_s3 + $0xc0] sm:$0xff]   ;;  %p8181_p11 = scmp.ne.s32.totalorder %s9594_s21, %s8180_s19  ;;  %s8186_s22 = scalar_lea.vmem %s8185_s20, 128 }
  0x21   : > { %p8187_p0 = scmp.lt.s32.totalorder %s9594_s21, %s8185_s20  ;;  %p8188_p1 = scmp.lt.s32.totalorder %s8186_s22, %s8180_s19 }
  0x22   : > { %p8182_p12 = pnand %p8181_p11, %p8327_p5 }
  0x23   : > { %6843 = vmatpush3.bf16.msra.mxu0 %v7955_v12  ;;  %p8189_p2 = por %p8188_p1, %p8187_p0 }
  0x24   : > { %6844 = vmatprep.subr.bf16.mxu0 %v7956_v13  ;;  %p8183_p13 = pneg %p8182_p12 }
  0x26   : > { %p8190_p3 = pnand %p8189_p2, %p8183_p13 }
  0x27   : > { %6845 = vmatpush3.bf16.msra.mxu0 %v7957_v14 }
  0x28   : > { %6846 = vmatprep.subr.bf16.mxu0 %v7958_v15 }
  0x2b   : > { %6847 = vmatpush3.bf16.msra.mxu0 %v7959_v16 }
  0x2c   : > { %7252 = vmatprep.subr.bf16.mxu0 %v8244_v29 }
  0x2e   : > { %526 = vmatmul.mubr.bf16.vlgmr.msra.gmra.mrb[0].mxu0 %v7960_v17 }
  0x2f   : > { %533 = vmatprep.mubr.bf16.mxu0 %v7963_v18  ;;  %7253 = vmatpush3.bf16.msra.mxu0 %v7983_v34  ;;  %v7988_v18 = vld [vmem:[%s9644_s3 + $0x28] sm:$0xff]  }
  0x30   : > { %7254 = vmatprep.subr.bf16.mxu0 %v8244_v29 }
  0x33   : > { %7255 = vmatpush3.bf16.msra.mxu0 %v7985_v35 }
  0x34   : > { %7268 = vmatprep.subr.bf16.mxu0 %v8244_v29 }
  0x36   : > { %534 = vmatmul.mubr.bf16.gmra.mrb[4].mxu0 %v7965_v19  ;;  %v7989_v19 = vld [vmem:[%s9644_s3 + $0xc8] sm:$0xff]  }
  0x37   : > { %541 = vmatprep.mubr.bf16.mxu0 %v7966_v20 }
  0x3e   : > { %542 = vmatmul.mubr.bf16.gmra.mrb[8].mxu0 %v7968_v21 }
  0x3f   : > { %549 = vmatprep.mubr.bf16.mxu0 %v7969_v22 }
  0x46   : > { %550 = vmatmul.mubr.bf16.gmra.mrb[12].mxu0 %v7971_v23 }
  0x47   : > { %557 = vmatprep.mubr.bf16.mxu0 %v7972_v24 }
  0x4e   : > { %558 = vmatmul.mubr.bf16.gmra.mrb[16].mxu0 %v7974_v25 }
  0x4f   : > { %565 = vmatprep.mubr.bf16.mxu0 %v7975_v26 }
  0x56   : > { %566 = vmatmul.mubr.bf16.gmra.mrb[20].mxu0 %v7977_v27 }
  0x57   : > { %573 = vmatprep.mubr.bf16.mxu0 %v6152_v32 }
  0x5e   : > { %574 = vmatmul.mubr.bf16.gmra.mrb[24].mxu0 %v6151_v33 }
  0x5f   : > { %7256 = vmatprep.mubr.msk.bf16.mxu0 %vm8245_vm0, %v8244_v29 }
 0x101   : > { %v6848_v36 = vpop.f32.mrb[0].mxu0 }
 0x102   : > { %v6849_v38 = vpop.f32.mrb[1].mxu0 }
 0x103   : > { %v6850_v39 = vadd.f32 %v6849_v38, %v6848_v36  ;;  %v6851_v40 = vpop.f32.mrb[2].mxu0  ;;  %v7992_v38 = vld [vmem:[%s9644_s3 + $0x38] sm:$0xff]  }
 0x104   : > { %v6852_v41 = vpop.f32.mrb[3].mxu0 }
 0x105   : > { %v528_v42 = vadd.f32 %v6850_v39, %v8430_v37  ;;  %v6853_v43 = vadd.f32 %v6852_v41, %v6851_v40  ;;  %v7993_v39 = vld [vmem:[%s9644_s3 + $0xe8] sm:$0xff]  }
 0x107   : > { %v581_v44 = vmax.f32 %v528_v42, 0.0  ;;  %v531_v45 = vadd.f32 %v6853_v43, %v8430_v37 }
 0x109   : > { %595 = vst.msk [vmem:[#allocation2] sm:$0xff] %vm594_vm1, %v581_v44  ;;  %v582_v46 = vmax.f32 %v531_v45, 0.0  ;;  %v6854_v47 = vpop.f32.mrb[4].mxu0 }
 0x10a   : > { %v6855_v48 = vpop.f32.mrb[5].mxu0 }
 0x10b   : > { %596 = vst.msk [vmem:[#allocation2 + $0x8] sm:$0xff] %vm594_vm1, %v582_v46  ;;  %v6856_v49 = vadd.f32 %v6855_v48, %v6854_v47  ;;  %v6857_v50 = vpop.f32.mrb[6].mxu0  ;;  %v7994_v47 = vld [vmem:[%s9644_s3 + $0x40] sm:$0xff]   ;;  %v7995_v48 = vld [vmem:[%s9644_s3 + $0x10] sm:$0xff]  }
 0x10c   : > { %v6858_v51 = vpop.f32.mrb[7].mxu0 }
 0x10d   : > { %v536_v52 = vadd.f32 %v6856_v49, %v8430_v37  ;;  %v6859_v53 = vadd.f32 %v6858_v51, %v6857_v50  ;;  %v7996_v51 = vld [vmem:[%s9644_s3 + $0x48] sm:$0xff]  }
 0x10f   : > { %v583_v54 = vmax.f32 %v536_v52, 0.0  ;;  %v539_v55 = vadd.f32 %v6859_v53, %v8430_v37  ;;  %v7997_v52 = vld [vmem:[%s9644_s3 + $0x18] sm:$0xff]  }
 0x110   : > { %v609_v6 = vld [vmem:[#allocation2] sm:$0xf] }
 0x111   : > { %597 = vst.msk [vmem:[#allocation2 + $0x10] sm:$0xff] %vm594_vm1, %v583_v54  ;;  %v584_v56 = vmax.f32 %v539_v55, 0.0  ;;  %v6860_v57 = vpop.f32.mrb[8].mxu0  ;;  %v610_v12 = vpack.c.bf16 %v609_v6, %v609_v6  ;;  %v732_v22 = vld [vmem:[#allocation2 + $0x1] sm:$0xf] }
 0x112   : > { %v6861_v58 = vpop.f32.mrb[9].mxu0  ;;  %v615_v59 = vld [vmem:[#allocation2 + $0x5] sm:$0xf]  ;;  %v733_v31 = vpack.c.bf16 %v732_v22, %v732_v22  ;;  %v858_v54 = vld [vmem:[#allocation2 + $0xa] sm:$0xf] }
 0x113   : > { %598 = vst.msk [vmem:[#allocation2 + $0x18] sm:$0xff] %vm594_vm1, %v584_v56  ;;  %v6862_v61 = vadd.f32 %v6861_v58, %v6860_v57  ;;  %v616_v62 = vpack.c.bf16 %v615_v59, %v615_v59  ;;  %v6863_v63 = vpop.f32.mrb[10].mxu0  ;;  %v795_v43 = vld [vmem:[#allocation2 + $0x6] sm:$0xf]  ;;  %v7998_v56 = vld [vmem:[%s9644_s3 + $0x50] sm:$0xff]   ;;  %v859_v58 = vpack.c.bf16 %v858_v54, %v858_v54  ;;  %v8000_v59 = vld [vmem:[%s9644_s3 + $0x58] sm:$0xff]  }
 0x114   : > { %v6864_v0 = vpop.f32.mrb[11].mxu0  ;;  %v796_v49 = vpack.c.bf16 %v795_v43, %v795_v43  ;;  %v7999_v57 = vld [vmem:[%s9644_s3 + $0x20] sm:$0xff]   ;;  %v8029_v54 = vld [vmem:[%s9644_s3 + $0x18] sm:$0xff]  }
 0x115   : > { %v544_v1 = vadd.f32 %v6862_v61, %v8430_v37  ;;  %7177 = vmatmul.mubr.msk.bf16.vlgmr.msra.gmra.mrb[0].mxu1 %vm594_vm1, %v616_v62  ;;  %v6865_v2 = vadd.f32 %v6864_v0, %v6863_v63  ;;  %v8002_v0 = vld [vmem:[%s9644_s3 + $0x60] sm:$0xff]  }
 0x116   : > { %7181 = vmatpush3.bf16.msra.mxu1 %v7982_v60  ;;  %7184 = vmatprep.mubr.msk.bf16.mxu1 %vm8245_vm0, %v8244_v29  ;;  %v8001_v60 = vld [vmem:[%s9644_s3 + $0x28] sm:$0xff]   ;;  %v8023_v43 = vld [vmem:[%s9644_s3 + $0xe0] sm:$0xff]  }
 0x117   : > { %v585_v4 = vmax.f32 %v544_v1, 0.0  ;;  %7182 = vmatprep.subr.bf16.mxu1 %v8244_v29  ;;  %v547_v5 = vadd.f32 %v6865_v2, %v8430_v37  ;;  %v8003_v1 = vld [vmem:[%s9644_s3 + $0x40] sm:$0xff]  }
 0x118   : > { %v921_v62 = vld [vmem:[#allocation2 + $0xf] sm:$0xf]  ;;  %v1110_v22 = vld [vmem:[#allocation2 + $0x14] sm:$0xf] }
 0x119   : > { %599 = vst.msk [vmem:[#allocation2 + $0x20] sm:$0xff] %vm594_vm1, %v585_v4  ;;  %v586_v7 = vmax.f32 %v547_v5, 0.0  ;;  %v6866_v8 = vpop.f32.mrb[12].mxu0  ;;  %v922_v2 = vpack.c.bf16 %v921_v62, %v921_v62  ;;  %v8005_v4 = vld [vmem:[%s9644_s3 + $0x48] sm:$0xff]  }
 0x11a   : > { %7183 = vmatpush3.bf16.msra.mxu1 %v7984_v3  ;;  %v1236_v10 = vld [vmem:[#allocation2 + $0x15] sm:$0xf]  ;;  %v6867_v14 = vpop.f32.mrb[13].mxu0  ;;  %v1631_v53 = vld [vmem:[#allocation2 + $0x19] sm:$0xf]  ;;  %v8004_v3 = vld [vmem:[%s9644_s3 + $0x68] sm:$0xff]  }
 0x11b   : > { %7188 = vmatprep.subr.bf16.mxu1 %v8244_v29  ;;  %v1237_v13 = vpack.c.bf16 %v1236_v10, %v1236_v10  ;;  %600 = vst.msk [vmem:[#allocation2 + $0x28] sm:$0xff] %vm594_vm1, %v586_v7  ;;  %v6868_v15 = vadd.f32 %v6867_v14, %v6866_v8  ;;  %v6869_v16 = vpop.f32.mrb[14].mxu0  ;;  %v1632_v55 = vpack.c.bf16 %v1631_v53, %v1631_v53  ;;  %v1747_v61 = vld [vmem:[#allocation2 + $0x15] sm:$0xf]  ;;  %v984_v5 = vld [vmem:[#allocation2 + $0xb] sm:$0xf] }
 0x11c   : > { %v6870_v17 = vpop.f32.mrb[15].mxu0  ;;  %v1748_v63 = vpack.c.bf16 %v1747_v61, %v1747_v61  ;;  %v8006_v7 = vld [vmem:[%s9644_s3 + $0x70] sm:$0xff]   ;;  %v8007_v8 = vld [vmem:[%s9644_s3 + $0x60] sm:$0xff]   ;;  %v8028_v53 = vld [vmem:[%s9644_s3 + $0xf8] sm:$0xff]  }
 0x11d   : > { %7185 = vmatmul.mubr.msk.bf16.vlgmr.msra.gmra.mrb[4].mxu1 %vm594_vm1, %v610_v12  ;;  %7257 = vmatmul.mubr.msk.bf16.vlgmr.msra.gmra.mrb[28].mxu0 %vm594_vm1, %v1237_v13  ;;  %v552_v20 = vadd.f32 %v6868_v15, %v8430_v37  ;;  %v6871_v21 = vadd.f32 %v6870_v17, %v6869_v16  ;;  %v8009_v12 = vld [vmem:[%s9644_s3 + $0x68] sm:$0xff]   ;;  %v1047_v13 = vld [vmem:[#allocation2 + $0x10] sm:$0xf]  ;;  %v8010_v15 = vld [vmem:[%s9644_s3 + $0x80] sm:$0xff]  }
 0x11e   : > { %7189 = vmatpush3.bf16.msra.mxu1 %v7986_v9  ;;  %7269 = vmatpush3.bf16.msra.mxu0 %v7987_v11  ;;  %v985_v9 = vpack.c.bf16 %v984_v5, %v984_v5  ;;  %v8008_v11 = vld [vmem:[%s9644_s3 + $0x78] sm:$0xff]   ;;  %v8011_v16 = vld [vmem:[%s9644_s3 + $0x80] sm:$0xff]   ;;  %v1048_v17 = vpack.c.bf16 %v1047_v13, %v1047_v13 }
 0x11f   : > { %7190 = vmatprep.subr.bf16.mxu1 %v8244_v29  ;;  %7270 = vmatprep.subr.bf16.mxu0 %v8244_v29  ;;  %v555_v24 = vadd.f32 %v6871_v21, %v8430_v37  ;;  %v587_v26 = vmax.f32 %v552_v20, 0.0  ;;  %v8013_v20 = vld [vmem:[%s9644_s3 + $0x88] sm:$0xff]   ;;  %v8031_v61 = vld [vmem:[%s9644_s3 + $0x20] sm:$0xff]  }
 0x120   : > { %7192 = vmatprep.mubr.msk.bf16.mxu1 %vm8245_vm0, %v8244_v29  ;;  %7272 = vmatprep.mubr.msk.bf16.mxu0 %vm8245_vm0, %v8244_v29  ;;  %v1362_v23 = vld [vmem:[#allocation2 + $0x1e] sm:$0xf] }
 0x121   : > { %v1363_v25 = vpack.c.bf16 %v1362_v23, %v1362_v23  ;;  %v6872_v27 = vpop.f32.mrb[16].mxu0  ;;  %601 = vst.msk [vmem:[#allocation2 + $0x30] sm:$0xff] %vm594_vm1, %v587_v26  ;;  %v588_v32 = vmax.f32 %v555_v24, 0.0  ;;  %v1488_v40 = vld [vmem:[#allocation2 + $0x1f] sm:$0xf]  ;;  %v8014_v24 = vld [vmem:[%s9644_s3 + $0x90] sm:$0xff]   ;;  %v1111_v26 = vpack.c.bf16 %v1110_v22, %v1110_v22 }
 0x122   : > { %7191 = vmatpush3.bf16.msra.mxu1 %v7988_v18  ;;  %7271 = vmatpush3.bf16.msra.mxu0 %v7989_v19  ;;  %v6873_v33 = vpop.f32.mrb[17].mxu0  ;;  %v1489_v46 = vpack.c.bf16 %v1488_v40, %v1488_v40  ;;  %v1871_v6 = vld [vmem:[#allocation2 + $0x1e] sm:$0xf]  ;;  %v8012_v19 = vld [vmem:[%s9644_s3 + $0x88] sm:$0xff]   ;;  %v1299_v40 = vld [vmem:[#allocation2 + $0x1a] sm:$0xf] }
 0x123   : > { %7196 = vmatprep.subr.bf16.mxu1 %v8244_v29  ;;  %7284 = vmatprep.subr.bf16.mxu0 %v8244_v29  ;;  %v6874_v34 = vadd.f32 %v6873_v33, %v6872_v27  ;;  %v6875_v35 = vpop.f32.mrb[18].mxu0  ;;  %602 = vst.msk [vmem:[#allocation2 + $0x38] sm:$0xff] %vm594_vm1, %v588_v32  ;;  %v1872_v10 = vpack.c.bf16 %v1871_v6, %v1871_v6  ;;  %v1995_v14 = vld [vmem:[#allocation2 + $0x1f] sm:$0xf]  ;;  %v2119_v21 = vld [vmem:[#allocation2 + $0x28] sm:$0xf] }
 0x124   : > { %v6876_v36 = vpop.f32.mrb[19].mxu0  ;;  %v1996_v18 = vpack.c.bf16 %v1995_v14, %v1995_v14  ;;  %v2120_v23 = vpack.c.bf16 %v2119_v21, %v2119_v21  ;;  %v8016_v27 = vld [vmem:[%s9644_s3 + $0x98] sm:$0xff]   ;;  %v8018_v33 = vld [vmem:[%s9644_s3 + $0xb0] sm:$0xff]   ;;  %v2747_v5 = vld [vmem:[#allocation2 + $0x29] sm:$0xf] }
 0x125   : > { %7193 = vmatmul.mubr.msk.bf16.vlgmr.msra.gmra.mrb[8].mxu1 %vm594_vm1, %v733_v31  ;;  %7273 = vmatmul.mubr.msk.bf16.vlgmr.msra.gmra.mrb[32].mxu0 %vm594_vm1, %v1363_v25  ;;  %v560_v41 = vadd.f32 %v6874_v34, %v8430_v37  ;;  %v6877_v42 = vadd.f32 %v6876_v36, %v6875_v35  ;;  %v8015_v25 = vld [vmem:[%s9644_s3 + $0xa0] sm:$0xff]   ;;  %v1173_v31 = vld [vmem:[#allocation2 + $0x19] sm:$0xf] }
 0x126   : > { %7197 = vmatpush3.bf16.msra.mxu1 %v7990_v28  ;;  %7285 = vmatpush3.bf16.msra.mxu0 %v7991_v30  ;;  %v8017_v28 = vld [vmem:[%s9644_s3 + $0xa8] sm:$0xff]   ;;  %v8019_v34 = vld [vmem:[%s9644_s3 + $0xc0] sm:$0xff]   ;;  %v1174_v35 = vpack.c.bf16 %v1173_v31, %v1173_v31  ;;  %v8020_v36 = vld [vmem:[%s9644_s3 + $0xb8] sm:$0xff]  }
 0x127   : > { %7198 = vmatprep.subr.bf16.mxu1 %v8244_v29  ;;  %7286 = vmatprep.subr.bf16.mxu0 %v8244_v29  ;;  %v589_v44 = vmax.f32 %v560_v41, 0.0  ;;  %v563_v45 = vadd.f32 %v6877_v42, %v8430_v37  ;;  %v2243_v30 = vld [vmem:[#allocation2 + $0x29] sm:$0xf]  ;;  %v8022_v42 = vld [vmem:[%s9644_s3 + $0xd0] sm:$0xff]  }
 0x128   : > { %7200 = vmatprep.mubr.msk.bf16.mxu1 %vm8245_vm0, %v8244_v29  ;;  %7288 = vmatprep.mubr.msk.bf16.mxu0 %vm8245_vm0, %v8244_v29  ;;  %v2244_v32 = vpack.c.bf16 %v2243_v30, %v2243_v30  ;;  %v8040_v30 = vld [vmem:[%s9644_s3 + $0x58] sm:$0xff]   ;;  %v8041_v31 = vld [vmem:[%s9644_s3 + $0x68] sm:$0xff]  }
 0x129   : > { %603 = vst.msk [vmem:[#allocation2 + $0x40] sm:$0xff] %vm594_vm1, %v589_v44  ;;  %v590_v50 = vmax.f32 %v563_v45, 0.0  ;;  %v1300_v44 = vpack.c.bf16 %v1299_v40, %v1299_v40  ;;  %v8024_v45 = vld [vmem:[%s9644_s3 + $0xd8] sm:$0xff]   ;;  %v8045_v40 = vld [vmem:[%s9644_s3 + $0x88] sm:$0xff]  }
 0x12a   : > { %7199 = vmatpush3.bf16.msra.mxu1 %v7992_v38  ;;  %7287 = vmatpush3.bf16.msra.mxu0 %v7993_v39  ;;  %v8021_v38 = vld [vmem:[%s9644_s3 + $0xc8] sm:$0xff]   ;;  %v2367_v39 = vld [vmem:[#allocation2 + $0x32] sm:$0xf] }
 0x12b   : > { %7204 = vmatprep.subr.bf16.mxu1 %v8244_v29  ;;  %7300 = vmatprep.subr.bf16.mxu0 %v8244_v29  ;;  %604 = vst.msk [vmem:[#allocation2 + $0x48] sm:$0xff] %vm594_vm1, %v590_v50  ;;  %v2368_v41 = vpack.c.bf16 %v2367_v39, %v2367_v39  ;;  %v8026_v50 = vld [vmem:[%s9644_s3 + $0xf0] sm:$0xff]   ;;  %v8044_v39 = vld [vmem:[%s9644_s3 + $0x78] sm:$0xff]  }
 0x12d   : > { %7201 = vmatmul.mubr.msk.bf16.vlgmr.msra.gmra.mrb[12].mxu1 %vm594_vm1, %v796_v49  ;;  %7289 = vmatmul.mubr.msk.bf16.vlgmr.msra.gmra.mrb[36].mxu0 %vm594_vm1, %v1489_v46  ;;  %v8025_v46 = vld [vmem:[%s9644_s3 + $0xe8] sm:$0xff]  }
 0x12e   : > { %7205 = vmatpush3.bf16.msra.mxu1 %v7994_v47  ;;  %7301 = vmatpush3.bf16.msra.mxu0 %v7995_v48  ;;  %v2491_v47 = vld [vmem:[#allocation2 + $0x33] sm:$0xf]  ;;  %v1425_v48 = vld [vmem:[#allocation2 + $0x23] sm:$0xf] }
 0x12f   : > { %7206 = vmatprep.subr.bf16.mxu1 %v8244_v29  ;;  %7302 = vmatprep.subr.bf16.mxu0 %v8244_v29  ;;  %v2492_v49 = vpack.c.bf16 %v2491_v47, %v2491_v47  ;;  %v8048_v47 = vld [vmem:[%s9644_s3 + $0x98] sm:$0xff]  }
 0x130   : > { %7208 = vmatprep.mubr.msk.bf16.mxu1 %vm8245_vm0, %v8244_v29  ;;  %7304 = vmatprep.mubr.msk.bf16.mxu0 %vm8245_vm0, %v8244_v29 }
 0x132   : > { %7207 = vmatpush3.bf16.msra.mxu1 %v7996_v51  ;;  %7303 = vmatpush3.bf16.msra.mxu0 %v7997_v52  ;;  %v8027_v51 = vld [vmem:[%s9644_s3 + $0x10] sm:$0xff]   ;;  %v1426_v52 = vpack.c.bf16 %v1425_v48, %v1425_v48  ;;  %v8049_v48 = vld [vmem:[%s9644_s3 + $0xa8] sm:$0xff]  }
 0x133   : > { %7212 = vmatprep.subr.bf16.mxu1 %v8244_v29  ;;  %7316 = vmatprep.subr.bf16.mxu0 %v8244_v29 }
 0x135   : > { %7209 = vmatmul.mubr.msk.bf16.vlgmr.msra.gmra.mrb[16].mxu1 %vm594_vm1, %v859_v58  ;;  %7305 = vmatmul.mubr.msk.bf16.vlgmr.msra.gmra.mrb[40].mxu0 %vm594_vm1, %v1632_v55  ;;  %v6878_v55 = vpop.f32.mrb[20].mxu0  ;;  %v2631_v58 = vld [vmem:[#allocation2 + $0x2d] sm:$0xf] }
 0x136   : > { %7213 = vmatpush3.bf16.msra.mxu1 %v7998_v56  ;;  %7317 = vmatpush3.bf16.msra.mxu0 %v7999_v57  ;;  %v6879_v56 = vpop.f32.mrb[21].mxu0  ;;  %v1551_v57 = vld [vmem:[#allocation2 + $0x24] sm:$0xf] }
 0x137   : > { %7214 = vmatprep.subr.bf16.mxu1 %v8244_v29  ;;  %7318 = vmatprep.subr.bf16.mxu0 %v8244_v29  ;;  %v6881_v6 = vpop.f32.mrb[22].mxu0 }
 0x138   : > { %7216 = vmatprep.mubr.msk.bf16.mxu1 %vm8245_vm0, %v8244_v29  ;;  %7320 = vmatprep.mubr.msk.bf16.mxu0 %vm8245_vm0, %v8244_v29 }
 0x13a   : > { %7215 = vmatpush3.bf16.msra.mxu1 %v8000_v59  ;;  %7319 = vmatpush3.bf16.msra.mxu0 %v8001_v60  ;;  %v6880_v59 = vadd.f32 %v6879_v56, %v6878_v55  ;;  %v8030_v60 = vld [vmem:[%s9644_s3] sm:$0xff]   ;;  %v8052_v55 = vld [vmem:[%s9644_s3 + $0xb8] sm:$0xff]   ;;  %v8053_v56 = vld [vmem:[%s9644_s3 + $0xc8] sm:$0xff]  }
 0x13b   : > { %7220 = vmatprep.subr.bf16.mxu1 %v8244_v29  ;;  %7332 = vmatprep.subr.bf16.mxu0 %v8244_v29 }
 0x13c   : > { %v568_v62 = vadd.f32 %v6880_v59, %v8430_v37 }
 0x13d   : > { %7217 = vmatmul.mubr.msk.bf16.vlgmr.msra.gmra.mrb[20].mxu1 %vm594_vm1, %v922_v2  ;;  %7321 = vmatmul.mubr.msk.bf16.vlgmr.msra.gmra.mrb[44].mxu0 %vm594_vm1, %v1748_v63  ;;  %v1552_v63 = vpack.c.bf16 %v1551_v57, %v1551_v57  ;;  %v8032_v2 = vld [vmem:[%s9644_s3 + $0x8] sm:$0xff]  }
 0x13e   : > { %7221 = vmatpush3.bf16.msra.mxu1 %v8002_v0  ;;  %7333 = vmatpush3.bf16.msra.mxu0 %v8003_v1  ;;  %v2632_v0 = vpack.c.bf16 %v2631_v58, %v2631_v58  ;;  %v591_v1 = vmax.f32 %v568_v62, 0.0  ;;  %v3367_v57 = vld [vmem:[#allocation2 + $0x46] sm:$0xf]  ;;  %v2305_v58 = vld [vmem:[#allocation2 + $0x2e] sm:$0xf] }
 0x13f   : > { %7222 = vmatprep.subr.bf16.mxu1 %v8244_v29  ;;  %7334 = vmatprep.subr.bf16.mxu0 %v8244_v29  ;;  %v3368_v59 = vpack.c.bf16 %v3367_v57, %v3367_v57  ;;  %v2306_v62 = vpack.c.bf16 %v2305_v58, %v2305_v58  ;;  %v3305_v57 = vld [vmem:[#allocation2 + $0x42] sm:$0xf]  ;;  %v8096_v58 = vld [vmem:[%s9644_s3 + $0xc8] sm:$0xff]  }
 0x140   : > { %7224 = vmatprep.mubr.msk.bf16.mxu1 %vm8245_vm0, %v8244_v29  ;;  %7336 = vmatprep.mubr.msk.bf16.mxu0 %vm8245_vm0, %v8244_v29  ;;  %605 = vst.msk [vmem:[#allocation2 + $0x50] sm:$0xff] %vm594_vm1, %v591_v1  ;;  %v3491_v1 = vld [vmem:[#allocation2 + $0x47] sm:$0xf] }
 0x142   : > { %7223 = vmatpush3.bf16.msra.mxu1 %v8004_v3  ;;  %7335 = vmatpush3.bf16.msra.mxu0 %v8005_v4  ;;  %v8033_v3 = vld [vmem:[%s9644_s3 + $0x28] sm:$0xff]   ;;  %v1625_v4 = vld [vmem:[#allocation2 + $0x14] sm:$0xf] }
 0x143   : > { %7228 = vmatprep.subr.bf16.mxu1 %v8244_v29  ;;  %7348 = vmatprep.subr.bf16.mxu0 %v8244_v29 }
 0x145   : > { %7225 = vmatmul.mubr.msk.bf16.vlgmr.msra.gmra.mrb[24].mxu1 %vm594_vm1, %v985_v9  ;;  %7337 = vmatmul.mubr.msk.bf16.vlgmr.msra.gmra.mrb[48].mxu0 %vm594_vm1, %v1872_v10  ;;  %v6882_v9 = vpop.f32.mrb[23].mxu0  ;;  %v1626_v10 = vpack.c.bf16 %v1625_v4, %v1625_v4  ;;  %v8058_v4 = vld [vmem:[%s9644_s3 + $0xf0] sm:$0xff]  }
 0x146   : > { %7229 = vmatpush3.bf16.msra.mxu1 %v8006_v7  ;;  %7349 = vmatpush3.bf16.msra.mxu0 %v8007_v8  ;;  %v8034_v7 = vld [vmem:[%s9644_s3 + $0x30] sm:$0xff]   ;;  %v8035_v8 = vld [vmem:[%s9644_s3 + $0x40] sm:$0xff]   ;;  %v6884_v13 = vpop.f32.mrb[24].mxu0 }
 0x147   : > { %7230 = vmatprep.subr.bf16.mxu1 %v8244_v29  ;;  %7350 = vmatprep.subr.bf16.mxu0 %v8244_v29  ;;  %v6885_v14 = vpop.f32.mrb[25].mxu0 }
 0x148   : > { %7232 = vmatprep.mubr.msk.bf16.mxu1 %vm8245_vm0, %v8244_v29  ;;  %7352 = vmatprep.mubr.msk.bf16.mxu0 %vm8245_vm0, %v8244_v29 }
 0x14a   : > { %7231 = vmatpush3.bf16.msra.mxu1 %v8008_v11  ;;  %7351 = vmatpush3.bf16.msra.mxu0 %v8009_v12  ;;  %v2748_v11 = vpack.c.bf16 %v2747_v5, %v2747_v5  ;;  %v6883_v12 = vadd.f32 %v6882_v9, %v6881_v6  ;;  %v8059_v5 = vld [vmem:[%s9644_s3 + $0x10] sm:$0xff]   ;;  %v3631_v9 = vld [vmem:[#allocation2 + $0x41] sm:$0xf] }
 0x14b   : > { %7236 = vmatprep.subr.bf16.mxu1 %v8244_v29  ;;  %7364 = vmatprep.subr.bf16.mxu0 %v8244_v29 }
 0x14d   : > { %7233 = vmatmul.mubr.msk.bf16.vlgmr.msra.gmra.mrb[28].mxu1 %vm594_vm1, %v1048_v17  ;;  %7353 = vmatmul.mubr.msk.bf16.vlgmr.msra.gmra.mrb[52].mxu0 %vm594_vm1, %v1996_v18  ;;  %v6887_v17 = vpop.f32.mrb[26].mxu0  ;;  %v8036_v18 = vld [vmem:[%s9644_s3 + $0x38] sm:$0xff]  }
 0x14e   : > { %7237 = vmatpush3.bf16.msra.mxu1 %v8010_v15  ;;  %7365 = vmatpush3.bf16.msra.mxu0 %v8011_v16  ;;  %v571_v15 = vadd.f32 %v6883_v12, %v8430_v37  ;;  %v6886_v16 = vadd.f32 %v6885_v14, %v6884_v13  ;;  %v6888_v21 = vpop.f32.mrb[27].mxu0  ;;  %v8062_v12 = vld [vmem:[%s9644_s3] sm:$0xff]   ;;  %v2625_v17 = vld [vmem:[#allocation2 + $0x28] sm:$0xf] }
 0x14f   : > { %7238 = vmatprep.subr.bf16.mxu1 %v8244_v29  ;;  %7366 = vmatprep.subr.bf16.mxu0 %v8244_v29  ;;  %v8063_v13 = vld [vmem:[%s9644_s3 + $0x20] sm:$0xff]  }
 0x150   : > { %7240 = vmatprep.mubr.msk.bf16.mxu1 %vm8245_vm0, %v8244_v29  ;;  %7368 = vmatprep.mubr.msk.bf16.mxu0 %vm8245_vm0, %v8244_v29  ;;  %v592_v22 = vmax.f32 %v571_v15, 0.0  ;;  %v8064_v15 = vld [vmem:[%s9644_s3 + $0x8] sm:$0xff]  }
 0x152   : > { %7239 = vmatpush3.bf16.msra.mxu1 %v8012_v19  ;;  %7367 = vmatpush3.bf16.msra.mxu0 %v8013_v20  ;;  %v8037_v19 = vld [vmem:[%s9644_s3 + $0x48] sm:$0xff]   ;;  %v2871_v20 = vld [vmem:[#allocation2 + $0x32] sm:$0xf]  ;;  %606 = vst.msk [vmem:[#allocation2 + $0x58] sm:$0xff] %vm594_vm1, %v592_v22  ;;  %v8070_v22 = vld [vmem:[%s9644_s3 + $0x40] sm:$0xff]  }
 0x153   : > { %7244 = vmatprep.subr.bf16.mxu1 %v8244_v29  ;;  %7380 = vmatprep.subr.bf16.mxu0 %v8244_v29 }
 0x155   : > { %7241 = vmatmul.mubr.msk.bf16.vlgmr.msra.gmra.mrb[32].mxu1 %vm594_vm1, %v1111_v26  ;;  %7369 = vmatmul.mubr.msk.bf16.vlgmr.msra.gmra.mrb[56].mxu0 %vm594_vm1, %v2120_v23  ;;  %v576_v23 = vadd.f32 %v6886_v16, %v8430_v37  ;;  %v8039_v37 = vld [vmem:[%s9644_s3 + $0x60] sm:$0xff]   ;;  %v8065_v16 = vld [vmem:[%s9644_s3 + $0x28] sm:$0xff]  }
 0x156   : > { %7245 = vmatpush3.bf16.msra.mxu1 %v8014_v24  ;;  %7381 = vmatpush3.bf16.msra.mxu0 %v8015_v25  ;;  %v1809_v24 = vld [vmem:[#allocation2 + $0x1a] sm:$0xf]  ;;  %v2872_v25 = vpack.c.bf16 %v2871_v20, %v2871_v20  ;;  %v2626_v20 = vpack.c.bf16 %v2625_v17, %v2625_v17 }
 0x157   : > { %7246 = vmatprep.subr.bf16.mxu1 %v8244_v29  ;;  %7382 = vmatprep.subr.bf16.mxu0 %v8244_v29  ;;  %v593_v26 = vmax.f32 %v576_v23, 0.0  ;;  %v8067_v23 = vld [vmem:[%s9644_s3 + $0x38] sm:$0xff]  }
 0x158   : > { %7248 = vmatprep.mubr.msk.bf16.mxu1 %vm8245_vm0, %v8244_v29  ;;  %7384 = vmatprep.mubr.msk.bf16.mxu0 %vm8245_vm0, %v8244_v29 }
 0x159   : > { %608 = vst.msk [vmem:[#allocation2 + $0x60] sm:$0xf] %vm607_vm2, %v593_v26  ;;  %v3871_v26 = vld [vmem:[#allocation2 + $0x46] sm:$0xf] }
 0x15a   : > { %7247 = vmatpush3.bf16.msra.mxu1 %v8016_v27  ;;  %7383 = vmatpush3.bf16.msra.mxu0 %v8017_v28  ;;  %v8038_v27 = vld [vmem:[%s9644_s3 + $0x50] sm:$0xff]   ;;  %v1810_v28 = vpack.c.bf16 %v1809_v24, %v1809_v24  ;;  %v8072_v24 = vld [vmem:[%s9644_s3 + $0x48] sm:$0xff]  }
 0x15b   : > { %7260 = vmatprep.subr.bf16.mxu1 %v8244_v29  ;;  %7396 = vmatprep.subr.bf16.mxu0 %v8244_v29 }
 0x15d   : > { %7249 = vmatmul.mubr.msk.bf16.vlgmr.msra.gmra.mrb[36].mxu1 %vm594_vm1, %v1174_v35  ;;  %7385 = vmatmul.mubr.msk.bf16.vlgmr.msra.gmra.mrb[60].mxu0 %vm594_vm1, %v2244_v32  ;;  %v2995_v32 = vld [vmem:[#allocation2 + $0x33] sm:$0xf] }
 0x15e   : > { %7261 = vmatpush3.bf16.msra.mxu1 %v8018_v33  ;;  %7397 = vmatpush3.bf16.msra.mxu0 %v8019_v34  ;;  %v1933_v33 = vld [vmem:[#allocation2 + $0x23] sm:$0xf]  ;;  %v2996_v34 = vpack.c.bf16 %v2995_v32, %v2995_v32  ;;  %v8042_v35 = vld [vmem:[%s9644_s3 + $0x70] sm:$0xff]  }
 0x15f   : > { %7262 = vmatprep.subr.bf16.mxu1 %v8244_v29  ;;  %7398 = vmatprep.subr.bf16.mxu0 %v8244_v29  ;;  %v2933_v32 = vld [vmem:[#allocation2 + $0x37] sm:$0xf] }
 0x160   : > { %7264 = vmatprep.mubr.msk.bf16.mxu1 %vm8245_vm0, %v8244_v29  ;;  %7400 = vmatprep.mubr.msk.bf16.mxu0 %vm8245_vm0, %v8244_v29 }
 0x162   : > { %7263 = vmatpush3.bf16.msra.mxu1 %v8020_v36  ;;  %7399 = vmatpush3.bf16.msra.mxu0 %v8021_v38  ;;  %v8043_v36 = vld [vmem:[%s9644_s3 + $0x80] sm:$0xff]   ;;  %v1934_v38 = vpack.c.bf16 %v1933_v33, %v1933_v33  ;;  %v8076_v33 = vld [vmem:[%s9644_s3 + $0x68] sm:$0xff]  }
 0x163   : > { %7276 = vmatprep.subr.bf16.mxu1 %v8244_v29  ;;  %7412 = vmatprep.subr.bf16.mxu0 %v8244_v29 }
 0x165   : > { %7265 = vmatmul.mubr.msk.bf16.vlgmr.msra.gmra.mrb[40].mxu1 %vm594_vm1, %v1300_v44  ;;  %7401 = vmatmul.mubr.msk.bf16.vlgmr.msra.gmra.mrb[64].mxu0 %vm594_vm1, %v2368_v41  ;;  %v3119_v41 = vld [vmem:[#allocation2 + $0x3c] sm:$0xf]  ;;  %v8046_v44 = vld [vmem:[%s9644_s3 + $0x90] sm:$0xff]  }
 0x166   : > { %7277 = vmatpush3.bf16.msra.mxu1 %v8022_v42  ;;  %7413 = vmatpush3.bf16.msra.mxu0 %v8023_v43  ;;  %v2057_v42 = vld [vmem:[#allocation2 + $0x24] sm:$0xf]  ;;  %v3120_v43 = vpack.c.bf16 %v3119_v41, %v3119_v41  ;;  %v3057_v41 = vld [vmem:[#allocation2 + $0x38] sm:$0xf] }
 0x167   : > { %7278 = vmatprep.subr.bf16.mxu1 %v8244_v29  ;;  %7414 = vmatprep.subr.bf16.mxu0 %v8244_v29 }
 0x168   : > { %7280 = vmatprep.mubr.msk.bf16.mxu1 %vm8245_vm0, %v8244_v29  ;;  %7416 = vmatprep.mubr.msk.bf16.mxu0 %vm8245_vm0, %v8244_v29 }
 0x16a   : > { %7279 = vmatpush3.bf16.msra.mxu1 %v8024_v45  ;;  %7415 = vmatpush3.bf16.msra.mxu0 %v8025_v46  ;;  %v8047_v45 = vld [vmem:[%s9644_s3 + $0xa0] sm:$0xff]   ;;  %v2058_v46 = vpack.c.bf16 %v2057_v42, %v2057_v42  ;;  %v8088_v42 = vld [vmem:[%s9644_s3 + $0x88] sm:$0xff]  }
 0x16b   : > { %7292 = vmatprep.subr.bf16.mxu1 %v8244_v29  ;;  %7428 = vmatprep.subr.bf16.mxu0 %v8244_v29 }
 0x16d   : > { %7281 = vmatmul.mubr.msk.bf16.vlgmr.msra.gmra.mrb[44].mxu1 %vm594_vm1, %v1426_v52  ;;  %7417 = vmatmul.mubr.msk.bf16.vlgmr.msra.gmra.mrb[68].mxu0 %vm594_vm1, %v2492_v49  ;;  %v3243_v49 = vld [vmem:[#allocation2 + $0x3d] sm:$0xf]  ;;  %v8050_v52 = vld [vmem:[%s9644_s3 + $0xb0] sm:$0xff]  }
 0x16e   : > { %7293 = vmatpush3.bf16.msra.mxu1 %v8026_v50  ;;  %7429 = vmatpush3.bf16.msra.mxu0 %v8027_v51  ;;  %v2181_v50 = vld [vmem:[#allocation2 + $0x2d] sm:$0xf]  ;;  %v3244_v51 = vpack.c.bf16 %v3243_v49, %v3243_v49  ;;  %v3181_v49 = vld [vmem:[#allocation2 + $0x41] sm:$0xf] }
 0x16f   : > { %7294 = vmatprep.subr.bf16.mxu1 %v8244_v29  ;;  %7430 = vmatprep.subr.bf16.mxu0 %v8244_v29 }
 0x170   : > { %7296 = vmatprep.mubr.msk.bf16.mxu1 %vm8245_vm0, %v8244_v29  ;;  %7432 = vmatprep.mubr.msk.bf16.mxu0 %vm8245_vm0, %v8244_v29 }
 0x172   : > { %7295 = vmatpush3.bf16.msra.mxu1 %v8028_v53  ;;  %7431 = vmatpush3.bf16.msra.mxu0 %v8029_v54  ;;  %v8051_v53 = vld [vmem:[%s9644_s3 + $0xc0] sm:$0xff]   ;;  %v2182_v54 = vpack.c.bf16 %v2181_v50, %v2181_v50  ;;  %v8092_v50 = vld [vmem:[%s9644_s3 + $0xa8] sm:$0xff]  }
 0x173   : > { %7308 = vmatprep.subr.bf16.mxu1 %v8244_v29  ;;  %7444 = vmatprep.subr.bf16.mxu0 %v8244_v29 }
 0x175   : > { %7297 = vmatmul.mubr.msk.bf16.vlgmr.msra.gmra.mrb[48].mxu1 %vm594_vm1, %v1552_v63  ;;  %7433 = vmatmul.mubr.msk.bf16.vlgmr.msra.gmra.mrb[72].mxu0 %vm594_vm1, %v2632_v0  ;;  %v8056_v63 = vld [vmem:[%s9644_s3 + $0xd8] sm:$0xff]   ;;  %v8057_v0 = vld [vmem:[%s9644_s3 + $0xe8] sm:$0xff]  }
 0x176   : > { %7309 = vmatpush3.bf16.msra.mxu1 %v8030_v60  ;;  %7445 = vmatpush3.bf16.msra.mxu0 %v8031_v61  ;;  %v8054_v60 = vld [vmem:[%s9644_s3 + $0xd0] sm:$0xff]   ;;  %v8055_v61 = vld [vmem:[%s9644_s3 + $0xe0] sm:$0xff]  }
 0x177   : > { %7310 = vmatprep.subr.bf16.mxu1 %v8244_v29  ;;  %7446 = vmatprep.subr.bf16.mxu0 %v8244_v29 }
 0x178   : > { %7312 = vmatprep.mubr.msk.bf16.mxu1 %vm8245_vm0, %v8244_v29  ;;  %7448 = vmatprep.mubr.msk.bf16.mxu0 %vm8245_vm0, %v8244_v29 }
 0x17a   : > { %7311 = vmatpush3.bf16.msra.mxu1 %v8032_v2  ;;  %7447 = vmatpush3.bf16.msra.mxu0 %v8033_v3  ;;  %v2429_v2 = vld [vmem:[#allocation2 + $0x37] sm:$0xf]  ;;  %v3492_v3 = vpack.c.bf16 %v3491_v1, %v3491_v1 }
 0x17b   : > { %7324 = vmatprep.subr.bf16.mxu1 %v8244_v29  ;;  %7460 = vmatprep.subr.bf16.mxu0 %v8244_v29  ;;  %v2430_v6 = vpack.c.bf16 %v2429_v2, %v2429_v2  ;;  %v3429_v2 = vld [vmem:[#allocation2 + $0x4b] sm:$0xf] }
 0x17d   : > { %7313 = vmatmul.mubr.msk.bf16.vlgmr.msra.gmra.mrb[52].mxu1 %vm594_vm1, %v1626_v10  ;;  %7449 = vmatmul.mubr.msk.bf16.vlgmr.msra.gmra.mrb[76].mxu0 %vm594_vm1, %v2748_v11  ;;  %v2553_v10 = vld [vmem:[#allocation2 + $0x38] sm:$0xf]  ;;  %v3632_v11 = vpack.c.bf16 %v3631_v9, %v3631_v9  ;;  %v3430_v9 = vpack.c.bf16 %v3429_v2, %v3429_v2 }
 0x17e   : > { %7325 = vmatpush3.bf16.msra.mxu1 %v8034_v7  ;;  %7461 = vmatpush3.bf16.msra.mxu0 %v8035_v8  ;;  %v8060_v7 = vld [vmem:[%s9644_s3 + $0xf8] sm:$0xff]   ;;  %v2554_v14 = vpack.c.bf16 %v2553_v10, %v2553_v10 }
 0x17f   : > { %7326 = vmatprep.subr.bf16.mxu1 %v8244_v29  ;;  %7462 = vmatprep.subr.bf16.mxu0 %v8244_v29  ;;  %v8061_v8 = vld [vmem:[%s9644_s3 + $0x18] sm:$0xff]  }
 0x180   : > { %7328 = vmatprep.mubr.msk.bf16.mxu1 %vm8245_vm0, %v8244_v29  ;;  %7464 = vmatprep.mubr.msk.bf16.mxu0 %vm8245_vm0, %v8244_v29 }
 0x182   : > { %7327 = vmatpush3.bf16.msra.mxu1 %v8036_v18  ;;  %7463 = vmatpush3.bf16.msra.mxu0 %v8037_v19  ;;  %v3747_v18 = vld [vmem:[#allocation2 + $0x3d] sm:$0xf]  ;;  %v8066_v19 = vld [vmem:[%s9644_s3 + $0x30] sm:$0xff]  }
 0x183   : > { %7340 = vmatprep.subr.bf16.mxu1 %v8244_v29  ;;  %7476 = vmatprep.subr.bf16.mxu0 %v8244_v29  ;;  %v3748_v21 = vpack.c.bf16 %v3747_v18, %v3747_v18 }
 0x185   : > { %7329 = vmatmul.mubr.msk.bf16.vlgmr.msra.gmra.mrb[56].mxu1 %vm594_vm1, %v1810_v28  ;;  %7465 = vmatmul.mubr.msk.bf16.vlgmr.msra.gmra.mrb[80].mxu0 %vm594_vm1, %v2872_v25  ;;  %v2809_v25 = vld [vmem:[#allocation2 + $0x2e] sm:$0xf]  ;;  %v3872_v28 = vpack.c.bf16 %v3871_v26, %v3871_v26 }
 0x186   : > { %7341 = vmatpush3.bf16.msra.mxu1 %v8038_v27  ;;  %7477 = vmatpush3.bf16.msra.mxu0 %v8039_v37  ;;  %v8068_v27 = vld [vmem:[%s9644_s3 + $0x50] sm:$0xff]   ;;  %v2810_v37 = vpack.c.bf16 %v2809_v25, %v2809_v25 }
 0x187   : > { %7342 = vmatprep.subr.bf16.mxu1 %v8244_v29  ;;  %7478 = vmatprep.subr.bf16.mxu0 %v8244_v29  ;;  %v8112_v26 = vld [vmem:[%s9646_s5 + $0x30] sm:$0xff]  }
 0x188   : > { %7344 = vmatprep.mubr.msk.bf16.mxu1 %vm8245_vm0, %v8244_v29  ;;  %7480 = vmatprep.mubr.msk.bf16.mxu0 %vm8245_vm0, %v8244_v29 }
 0x18a   : > { %7343 = vmatpush3.bf16.msra.mxu1 %v8040_v30  ;;  %7479 = vmatpush3.bf16.msra.mxu0 %v8041_v31  ;;  %v8074_v30 = vld [vmem:[%s9644_s3 + $0x60] sm:$0xff]   ;;  %v8069_v31 = vld [vmem:[%s9644_s3 + $0x58] sm:$0xff]  }
 0x18b   : > { %7356 = vmatprep.subr.bf16.mxu1 %v8244_v29  ;;  %7492 = vmatprep.subr.bf16.mxu0 %v8244_v29 }
 0x18d   : > { %7345 = vmatmul.mubr.msk.bf16.vlgmr.msra.gmra.mrb[60].mxu1 %vm594_vm1, %v1934_v38  ;;  %7481 = vmatmul.mubr.msk.bf16.vlgmr.msra.gmra.mrb[84].mxu0 %vm594_vm1, %v2996_v34  ;;  %v3995_v34 = vld [vmem:[#allocation2 + $0x47] sm:$0xf] }
 0x18e   : > { %7357 = vmatpush3.bf16.msra.mxu1 %v8042_v35  ;;  %7493 = vmatpush3.bf16.msra.mxu0 %v8043_v36  ;;  %v8071_v35 = vld [vmem:[%s9644_s3 + $0x70] sm:$0xff]   ;;  %v2934_v36 = vpack.c.bf16 %v2933_v32, %v2933_v32  ;;  %v3996_v38 = vpack.c.bf16 %v3995_v34, %v3995_v34 }
 0x18f   : > { %7358 = vmatprep.subr.bf16.mxu1 %v8244_v29  ;;  %7494 = vmatprep.subr.bf16.mxu0 %v8244_v29 }
 0x190   : > { %7360 = vmatprep.mubr.msk.bf16.mxu1 %vm8245_vm0, %v8244_v29  ;;  %7496 = vmatprep.mubr.msk.bf16.mxu0 %vm8245_vm0, %v8244_v29 }
 0x192   : > { %7359 = vmatpush3.bf16.msra.mxu1 %v8044_v39  ;;  %7495 = vmatpush3.bf16.msra.mxu0 %v8045_v40  ;;  %v8086_v39 = vld [vmem:[%s9644_s3 + $0x80] sm:$0xff]   ;;  %v8073_v40 = vld [vmem:[%s9644_s3 + $0x78] sm:$0xff]  }
 0x193   : > { %7372 = vmatprep.subr.bf16.mxu1 %v8244_v29  ;;  %7508 = vmatprep.subr.bf16.mxu0 %v8244_v29 }
 0x195   : > { %7361 = vmatmul.mubr.msk.bf16.vlgmr.msra.gmra.mrb[64].mxu1 %vm594_vm1, %v2058_v46  ;;  %7497 = vmatmul.mubr.msk.bf16.vlgmr.msra.gmra.mrb[88].mxu0 %vm594_vm1, %v3120_v43  ;;  %v4119_v43 = vld [vmem:[#allocation2 + $0x50] sm:$0xf] }
 0x196   : > { %7373 = vmatpush3.bf16.msra.mxu1 %v8046_v44  ;;  %7509 = vmatpush3.bf16.msra.mxu0 %v8047_v45  ;;  %v8075_v44 = vld [vmem:[%s9644_s3 + $0x90] sm:$0xff]   ;;  %v3058_v45 = vpack.c.bf16 %v3057_v41, %v3057_v41  ;;  %v4120_v46 = vpack.c.bf16 %v4119_v43, %v4119_v43 }
 0x197   : > { %7374 = vmatprep.subr.bf16.mxu1 %v8244_v29  ;;  %7510 = vmatprep.subr.bf16.mxu0 %v8244_v29 }
 0x198   : > { %7376 = vmatprep.mubr.msk.bf16.mxu1 %vm8245_vm0, %v8244_v29  ;;  %7512 = vmatprep.mubr.msk.bf16.mxu0 %vm8245_vm0, %v8244_v29 }
 0x19a   : > { %7375 = vmatpush3.bf16.msra.mxu1 %v8048_v47  ;;  %7511 = vmatpush3.bf16.msra.mxu0 %v8049_v48  ;;  %v8090_v47 = vld [vmem:[%s9644_s3 + $0xa0] sm:$0xff]   ;;  %v8077_v48 = vld [vmem:[%s9644_s3 + $0x98] sm:$0xff]  }
 0x19b   : > { %7388 = vmatprep.subr.bf16.mxu1 %v8244_v29  ;;  %7524 = vmatprep.subr.bf16.mxu0 %v8244_v29 }
 0x19d   : > { %7377 = vmatmul.mubr.msk.bf16.vlgmr.msra.gmra.mrb[68].mxu1 %vm594_vm1, %v2182_v54  ;;  %7513 = vmatmul.mubr.msk.bf16.vlgmr.msra.gmra.mrb[92].mxu0 %vm594_vm1, %v3244_v51  ;;  %v4243_v51 = vld [vmem:[#allocation2 + $0x51] sm:$0xf] }
 0x19e   : > { %7389 = vmatpush3.bf16.msra.mxu1 %v8050_v52  ;;  %7525 = vmatpush3.bf16.msra.mxu0 %v8051_v53  ;;  %v3182_v52 = vpack.c.bf16 %v3181_v49, %v3181_v49  ;;  %v8078_v53 = vld [vmem:[%s9644_s3 + $0xb0] sm:$0xff]   ;;  %v4244_v54 = vpack.c.bf16 %v4243_v51, %v4243_v51 }
 0x19f   : > { %7390 = vmatprep.subr.bf16.mxu1 %v8244_v29  ;;  %7526 = vmatprep.subr.bf16.mxu0 %v8244_v29 }
 0x1a0   : > { %7392 = vmatprep.mubr.msk.bf16.mxu1 %vm8245_vm0, %v8244_v29  ;;  %7528 = vmatprep.mubr.msk.bf16.mxu0 %vm8245_vm0, %v8244_v29 }
 0x1a2   : > { %7391 = vmatpush3.bf16.msra.mxu1 %v8052_v55  ;;  %7527 = vmatpush3.bf16.msra.mxu0 %v8053_v56  ;;  %v8094_v55 = vld [vmem:[%s9644_s3 + $0xc0] sm:$0xff]   ;;  %v8079_v56 = vld [vmem:[%s9644_s3 + $0xb8] sm:$0xff]  }
 0x1a3   : > { %7404 = vmatprep.subr.bf16.mxu1 %v8244_v29  ;;  %7540 = vmatprep.subr.bf16.mxu0 %v8244_v29 }
 0x1a5   : > { %7393 = vmatmul.mubr.msk.bf16.vlgmr.msra.gmra.mrb[72].mxu1 %vm594_vm1, %v2306_v62  ;;  %7529 = vmatmul.mubr.msk.bf16.vlgmr.msra.gmra.mrb[96].mxu0 %vm594_vm1, %v3368_v59  ;;  %v4367_v59 = vld [vmem:[#allocation2 + $0x5a] sm:$0xf] }
 0x1a6   : > { %7405 = vmatpush3.bf16.msra.mxu1 %v8054_v60  ;;  %7541 = vmatpush3.bf16.msra.mxu0 %v8055_v61  ;;  %v8080_v60 = vld [vmem:[%s9644_s3 + $0xd0] sm:$0xff]   ;;  %v3306_v61 = vpack.c.bf16 %v3305_v57, %v3305_v57  ;;  %v4368_v62 = vpack.c.bf16 %v4367_v59, %v4367_v59 }
 0x1a7   : > { %7406 = vmatprep.subr.bf16.mxu1 %v8244_v29  ;;  %7542 = vmatprep.subr.bf16.mxu0 %v8244_v29 }
 0x1a8   : > { %7408 = vmatprep.mubr.msk.bf16.mxu1 %vm8245_vm0, %v8244_v29  ;;  %7544 = vmatprep.mubr.msk.bf16.mxu0 %vm8245_vm0, %v8244_v29 }
 0x1aa   : > { %7407 = vmatpush3.bf16.msra.mxu1 %v8056_v63  ;;  %7543 = vmatpush3.bf16.msra.mxu0 %v8057_v0  ;;  %v8098_v63 = vld [vmem:[%s9644_s3 + $0xe0] sm:$0xff]   ;;  %v8081_v0 = vld [vmem:[%s9644_s3 + $0xd8] sm:$0xff]  }
 0x1ab   : > { %7420 = vmatprep.subr.bf16.mxu1 %v8244_v29  ;;  %7556 = vmatprep.subr.bf16.mxu0 %v8244_v29 }
 0x1ad   : > { %7409 = vmatmul.mubr.msk.bf16.vlgmr.msra.gmra.mrb[76].mxu1 %vm594_vm1, %v2430_v6  ;;  %7545 = vmatmul.mubr.msk.bf16.vlgmr.msra.gmra.mrb[100].mxu0 %vm594_vm1, %v3492_v3  ;;  %v8100_v3 = vld [vmem:[%s9644_s3 + $0xe8] sm:$0xff]  }
 0x1ae   : > { %7421 = vmatpush3.bf16.msra.mxu1 %v8058_v4  ;;  %7557 = vmatpush3.bf16.msra.mxu0 %v8059_v5  ;;  %v4491_v4 = vld [vmem:[#allocation2 + $0x5b] sm:$0xf] }
 0x1af   : > { %7422 = vmatprep.subr.bf16.mxu1 %v8244_v29  ;;  %7558 = vmatprep.subr.bf16.mxu0 %v8244_v29  ;;  %v4492_v10 = vpack.c.bf16 %v4491_v4, %v4491_v4  ;;  %v8097_v4 = vld [vmem:[%s9644_s3 + $0x78] sm:$0xff]  }
 0x1b0   : > { %7424 = vmatprep.mubr.msk.bf16.mxu1 %vm8245_vm0, %v8244_v29  ;;  %7560 = vmatprep.mubr.msk.bf16.mxu0 %vm8245_vm0, %v8244_v29 }
 0x1b2   : > { %7423 = vmatpush3.bf16.msra.mxu1 %v8060_v7  ;;  %7559 = vmatpush3.bf16.msra.mxu0 %v8061_v8  ;;  %v8082_v7 = vld [vmem:[%s9644_s3 + $0xf0] sm:$0xff]  }
 0x1b3   : > { %7436 = vmatprep.subr.bf16.mxu1 %v8244_v29  ;;  %7572 = vmatprep.subr.bf16.mxu0 %v8244_v29 }
 0x1b5   : > { %7425 = vmatmul.mubr.msk.bf16.vlgmr.msra.gmra.mrb[80].mxu1 %vm594_vm1, %v2554_v14  ;;  %7561 = vmatmul.mubr.msk.bf16.vlgmr.msra.gmra.mrb[104].mxu0 %vm594_vm1, %v3632_v11  ;;  %v8108_v11 = vld [vmem:[%s9646_s5 + $0x20] sm:$0xff]   ;;  %v3553_v14 = vld [vmem:[#allocation2 + $0x4c] sm:$0xf] }
 0x1b6   : > { %7437 = vmatpush3.bf16.msra.mxu1 %v8062_v12  ;;  %7573 = vmatpush3.bf16.msra.mxu0 %v8063_v13  ;;  %v8083_v12 = vld [vmem:[%s9644_s3 + $0xf8] sm:$0xff]  }
 0x1b7   : > { %7438 = vmatprep.subr.bf16.mxu1 %v8244_v29  ;;  %7574 = vmatprep.subr.bf16.mxu0 %v8244_v29 }
 0x1b8   : > { %7440 = vmatprep.mubr.msk.bf16.mxu1 %vm8245_vm0, %v8244_v29  ;;  %7576 = vmatprep.mubr.msk.bf16.mxu0 %vm8245_vm0, %v8244_v29 }
 0x1ba   : > { %7439 = vmatpush3.bf16.msra.mxu1 %v8064_v15  ;;  %7575 = vmatpush3.bf16.msra.mxu0 %v8065_v16  ;;  %v8110_v16 = vld [vmem:[%s9646_s5 + $0x28] sm:$0xff]  }
 0x1bb   : > { %7452 = vmatprep.subr.bf16.mxu1 %v8244_v29  ;;  %7588 = vmatprep.subr.bf16.mxu0 %v8244_v29 }
 0x1bd   : > { %7441 = vmatmul.mubr.msk.bf16.vlgmr.msra.gmra.mrb[84].mxu1 %vm594_vm1, %v2626_v20  ;;  %7577 = vmatmul.mubr.msk.bf16.vlgmr.msra.gmra.mrb[108].mxu0 %vm594_vm1, %v3748_v21  ;;  %v8084_v21 = vld [vmem:[%s9644_s3] sm:$0xff]  }
 0x1be   : > { %7453 = vmatpush3.bf16.msra.mxu1 %v8066_v19  ;;  %7456 = vmatprep.mubr.msk.bf16.mxu1 %vm8245_vm0, %v8244_v29 }
 0x1bf   : > { %7454 = vmatprep.subr.bf16.mxu1 %v8244_v29  ;;  %7589 = vmatpush3.bf16.msra.mxu0 %v8070_v22 }
 0x1c0   : > { %7590 = vmatprep.subr.bf16.mxu0 %v8244_v29  ;;  %7592 = vmatprep.mubr.msk.bf16.mxu0 %vm8245_vm0, %v8244_v29 }
 0x1c2   : > { %7455 = vmatpush3.bf16.msra.mxu1 %v8067_v23 }
 0x1c3   : > { %7468 = vmatprep.subr.bf16.mxu1 %v8244_v29  ;;  %7591 = vmatpush3.bf16.msra.mxu0 %v8072_v24  ;;  %v3554_v24 = vpack.c.bf16 %v3553_v14, %v3553_v14 }
 0x1c4   : > { %7604 = vmatprep.subr.bf16.mxu0 %v8244_v29 }
 0x1c5   : > { %7457 = vmatmul.mubr.msk.bf16.vlgmr.msra.gmra.mrb[88].mxu1 %vm594_vm1, %v2810_v37 }
 0x1c6   : > { %7469 = vmatpush3.bf16.msra.mxu1 %v8068_v27  ;;  %7472 = vmatprep.mubr.msk.bf16.mxu1 %vm8245_vm0, %v8244_v29  ;;  %v8085_v27 = vld [vmem:[%s9644_s3 + $0x8] sm:$0xff]  }
 0x1c7   : > { %7470 = vmatprep.subr.bf16.mxu1 %v8244_v29  ;;  %7593 = vmatmul.mubr.msk.bf16.vlgmr.msra.gmra.mrb[112].mxu0 %vm594_vm1, %v3872_v28  ;;  %v3625_v28 = vld [vmem:[#allocation2 + $0x3c] sm:$0xf] }
 0x1c8   : > { %7605 = vmatpush3.bf16.msra.mxu0 %v8074_v30  ;;  %7608 = vmatprep.mubr.msk.bf16.mxu0 %vm8245_vm0, %v8244_v29 }
 0x1c9   : > { %7606 = vmatprep.subr.bf16.mxu0 %v8244_v29 }
 0x1ca   : > { %7471 = vmatpush3.bf16.msra.mxu1 %v8069_v31  ;;  %v8114_v31 = vld [vmem:[%s9646_s5 + $0x38] sm:$0xff]  }
 0x1cb   : > { %7484 = vmatprep.subr.bf16.mxu1 %v8244_v29 }
 0x1cc   : > { %7607 = vmatpush3.bf16.msra.mxu0 %v8076_v33 }
 0x1cd   : > { %7473 = vmatmul.mubr.msk.bf16.vlgmr.msra.gmra.mrb[92].mxu1 %vm594_vm1, %v2934_v36  ;;  %7620 = vmatprep.subr.bf16.mxu0 %v8244_v29  ;;  %v8087_v36 = vld [vmem:[%s9644_s3 + $0x30] sm:$0xff]  }
 0x1ce   : > { %7485 = vmatpush3.bf16.msra.mxu1 %v8071_v35  ;;  %7488 = vmatprep.mubr.msk.bf16.mxu1 %vm8245_vm0, %v8244_v29 }
 0x1cf   : > { %7486 = vmatprep.subr.bf16.mxu1 %v8244_v29  ;;  %7609 = vmatmul.mubr.msk.bf16.vlgmr.msra.gmra.mrb[116].mxu0 %vm594_vm1, %v3996_v38 }
 0x1d0   : > { %7621 = vmatpush3.bf16.msra.mxu0 %v8086_v39  ;;  %7624 = vmatprep.mubr.msk.bf16.mxu0 %vm8245_vm0, %v8244_v29 }
 0x1d1   : > { %7622 = vmatprep.subr.bf16.mxu0 %v8244_v29 }
 0x1d2   : > { %7487 = vmatpush3.bf16.msra.mxu1 %v8073_v40  ;;  %v3626_v40 = vpack.c.bf16 %v3625_v28, %v3625_v28 }
 0x1d3   : > { %7500 = vmatprep.subr.bf16.mxu1 %v8244_v29 }
 0x1d4   : > { %7623 = vmatpush3.bf16.msra.mxu0 %v8088_v42  ;;  %v8089_v42 = vld [vmem:[%s9644_s3 + $0x38] sm:$0xff]  }
 0x1d5   : > { %7489 = vmatmul.mubr.msk.bf16.vlgmr.msra.gmra.mrb[96].mxu1 %vm594_vm1, %v3058_v45  ;;  %7636 = vmatprep.subr.bf16.mxu0 %v8244_v29 }
 0x1d6   : > { %7501 = vmatpush3.bf16.msra.mxu1 %v8075_v44  ;;  %7504 = vmatprep.mubr.msk.bf16.mxu1 %vm8245_vm0, %v8244_v29  ;;  %v3809_v44 = vld [vmem:[#allocation2 + $0x42] sm:$0xf] }
 0x1d7   : > { %7502 = vmatprep.subr.bf16.mxu1 %v8244_v29  ;;  %7625 = vmatmul.mubr.msk.bf16.vlgmr.msra.gmra.mrb[120].mxu0 %vm594_vm1, %v4120_v46 }
 0x1d8   : > { %7637 = vmatpush3.bf16.msra.mxu0 %v8090_v47  ;;  %7640 = vmatprep.mubr.msk.bf16.mxu0 %vm8245_vm0, %v8244_v29 }
 0x1d9   : > { %7638 = vmatprep.subr.bf16.mxu0 %v8244_v29 }
 0x1da   : > { %7503 = vmatpush3.bf16.msra.mxu1 %v8077_v48 }
 0x1db   : > { %7516 = vmatprep.subr.bf16.mxu1 %v8244_v29 }
 0x1dc   : > { %7639 = vmatpush3.bf16.msra.mxu0 %v8092_v50  ;;  %v8091_v50 = vld [vmem:[%s9644_s3 + $0x50] sm:$0xff]  }
 0x1dd   : > { %7505 = vmatmul.mubr.msk.bf16.vlgmr.msra.gmra.mrb[100].mxu1 %vm594_vm1, %v3182_v52  ;;  %7652 = vmatprep.subr.bf16.mxu0 %v8244_v29 }
 0x1de   : > { %7517 = vmatpush3.bf16.msra.mxu1 %v8078_v53  ;;  %7520 = vmatprep.mubr.msk.bf16.mxu1 %vm8245_vm0, %v8244_v29  ;;  %v3810_v53 = vpack.c.bf16 %v3809_v44, %v3809_v44 }
 0x1df   : > { %7518 = vmatprep.subr.bf16.mxu1 %v8244_v29  ;;  %7641 = vmatmul.mubr.msk.bf16.vlgmr.msra.gmra.mrb[124].mxu0 %vm594_vm1, %v4244_v54 }
 0x1e0   : > { %7653 = vmatpush3.bf16.msra.mxu0 %v8094_v55  ;;  %7656 = vmatprep.mubr.msk.bf16.mxu0 %vm8245_vm0, %v8244_v29  ;;  %v8093_v55 = vld [vmem:[%s9644_s3 + $0x58] sm:$0xff]  }
 0x1e1   : > { %7654 = vmatprep.subr.bf16.mxu0 %v8244_v29 }
 0x1e2   : > { %7519 = vmatpush3.bf16.msra.mxu1 %v8079_v56 }
 0x1e3   : > { %7532 = vmatprep.subr.bf16.mxu1 %v8244_v29 }
 0x1e4   : > { %7655 = vmatpush3.bf16.msra.mxu0 %v8096_v58  ;;  %v3933_v58 = vld [vmem:[#allocation2 + $0x4b] sm:$0xf] }
 0x1e5   : > { %7521 = vmatmul.mubr.msk.bf16.vlgmr.msra.gmra.mrb[104].mxu1 %vm594_vm1, %v3306_v61  ;;  %7668 = vmatprep.subr.bf16.mxu0 %v8244_v29  ;;  %v3934_v2 = vpack.c.bf16 %v3933_v58, %v3933_v58 }
 0x1e6   : > { %7533 = vmatpush3.bf16.msra.mxu1 %v8080_v60  ;;  %7536 = vmatprep.mubr.msk.bf16.mxu1 %vm8245_vm0, %v8244_v29 }
 0x1e7   : > { %7534 = vmatprep.subr.bf16.mxu1 %v8244_v29  ;;  %7657 = vmatmul.mubr.msk.bf16.vlgmr.msra.gmra.mrb[128].mxu0 %vm594_vm1, %v4368_v62 }
 0x1e8   : > { %v671_v1 = vpop.f32.mrb[0].mxu1  ;;  %7669 = vmatpush3.bf16.msra.mxu0 %v8098_v63  ;;  %7672 = vmatprep.mubr.msk.bf16.mxu0 %vm8245_vm0, %v8244_v29 }
 0x1e9   : > { %v7178_v5 = vpop.f32.mrb[1].mxu1  ;;  %7670 = vmatprep.subr.bf16.mxu0 %v8244_v29 }
 0x1ea   : > { %7535 = vmatpush3.bf16.msra.mxu1 %v8081_v0  ;;  %v674_v6 = vpop.f32.mrb[2].mxu1  ;;  %v8095_v0 = vld [vmem:[%s9644_s3 + $0x70] sm:$0xff]  }
 0x1eb   : > { %v7179_v8 = vpop.f32.mrb[3].mxu1  ;;  %7548 = vmatprep.subr.bf16.mxu1 %v8244_v29 }
 0x1ec   : > { %7671 = vmatpush3.bf16.msra.mxu0 %v8100_v3 }
 0x1ed   : > { %7537 = vmatmul.mubr.msk.bf16.vlgmr.msra.gmra.mrb[108].mxu1 %vm594_vm1, %v3430_v9  ;;  %7684 = vmatprep.subr.bf16.mxu0 %v8244_v29 }
 0x1ee   : > { %7549 = vmatpush3.bf16.msra.mxu1 %v8082_v7  ;;  %7552 = vmatprep.mubr.msk.bf16.mxu1 %vm8245_vm0, %v8244_v29  ;;  %v4057_v7 = vld [vmem:[#allocation2 + $0x4c] sm:$0xf] }
 0x1ef   : > { %7550 = vmatprep.subr.bf16.mxu1 %v8244_v29  ;;  %7673 = vmatmul.mubr.msk.bf16.vlgmr.msra.gmra.mrb[132].mxu0 %vm594_vm1, %v4492_v10 }
 0x1f0   : > { %v726_v13 = vpop.f32.mrb[4].mxu1  ;;  %v9054_v15 = vpop.f32.mrb[28].mxu0  ;;  %7685 = vmatpush3.bf16.msra.mxu0 %v8108_v11  ;;  %7692 = vmatprep.mubr.msk.bf16.mxu0 %vm8245_vm0, %v8244_v29 }
 0x1f1   : > { %v727_v17 = vadd.f32 %v726_v13, %v671_v1  ;;  %v7186_v18 = vpop.f32.mrb[5].mxu1  ;;  %v7258_v19 = vpop.f32.mrb[29].mxu0  ;;  %7686 = vmatprep.subr.bf16.mxu0 %v8244_v29  ;;  %v8099_v13 = vld [vmem:[%s9644_s3 + $0x90] sm:$0xff]  }
 0x1f2   : > { %7551 = vmatpush3.bf16.msra.mxu1 %v8083_v12  ;;  %v729_v20 = vpop.f32.mrb[6].mxu1  ;;  %v1295_v22 = vpop.f32.mrb[30].mxu0  ;;  %v8101_v18 = vld [vmem:[%s9644_s3 + $0x98] sm:$0xff]  }
 0x1f3   : > { %v7187_v23 = vpop.f32.mrb[7].mxu1  ;;  %7564 = vmatprep.subr.bf16.mxu1 %v8244_v29  ;;  %v7259_v25 = vpop.f32.mrb[31].mxu0  ;;  %v4181_v19 = vld [vmem:[#allocation2 + $0x55] sm:$0xf] }
 0x1f4   : > { %7687 = vmatpush3.bf16.msra.mxu0 %v8110_v16  ;;  %v4182_v25 = vpack.c.bf16 %v4181_v19, %v4181_v19 }
 0x1f5   : > { %7553 = vmatmul.mubr.msk.bf16.vlgmr.msra.gmra.mrb[112].mxu1 %vm594_vm1, %v3554_v24  ;;  %7688 = vmatprep.subr.bf16.mxu0 %v8244_v29 }
 0x1f6   : > { %7565 = vmatpush3.bf16.msra.mxu1 %v8084_v21  ;;  %7568 = vmatprep.mubr.msk.bf16.mxu1 %vm8245_vm0, %v8244_v29 }
 0x1f7   : > { %7566 = vmatprep.subr.bf16.mxu1 %v8244_v29 }
 0x1f8   : > { %v788_v37 = vpop.f32.mrb[8].mxu1  ;;  %v9077_v30 = vpop.f32.mrb[32].mxu0  ;;  %7689 = vmatpush3.bf16.msra.mxu0 %v8112_v26 }
 0x1f9   : > { %v794_v32 = vadd.f32 %v788_v37, %v727_v17  ;;  %v7194_v33 = vpop.f32.mrb[9].mxu1  ;;  %v7274_v34 = vpop.f32.mrb[33].mxu0  ;;  %7690 = vmatprep.subr.bf16.mxu0 %v8244_v29  ;;  %v4058_v17 = vpack.c.bf16 %v4057_v7, %v4057_v7  ;;  %v8102_v37 = vld [vmem:[%s9644_s3 + $0xb0] sm:$0xff]   ;;  %v8109_v7 = vld [vmem:[%s9646_s5] sm:$0xff]  }
 0x1fa   : > { %v791_v35 = vpop.f32.mrb[10].mxu1  ;;  %7567 = vmatpush3.bf16.msra.mxu1 %v8085_v27  ;;  %v1421_v38 = vpop.f32.mrb[34].mxu0 }
 0x1fb   : > { %v7195_v39 = vpop.f32.mrb[11].mxu1  ;;  %7580 = vmatprep.subr.bf16.mxu1 %v8244_v29  ;;  %v7275_v41 = vpop.f32.mrb[35].mxu0  ;;  %v4305_v35 = vld [vmem:[#allocation2 + $0x56] sm:$0xf] }
 0x1fc   : > { %7691 = vmatpush3.bf16.msra.mxu0 %v8114_v31 }
 0x1fd   : > { %7569 = vmatmul.mubr.msk.bf16.vlgmr.msra.gmra.mrb[116].mxu1 %vm594_vm1, %v3626_v40  ;;  %7708 = vmatprep.subr.bf16.mxu0 %v8244_v29 }
 0x1fe   : > { %7581 = vmatpush3.bf16.msra.mxu1 %v8087_v36  ;;  %7584 = vmatprep.mubr.msk.bf16.mxu1 %vm8245_vm0, %v8244_v29 }
 0x1ff   : > { %7582 = vmatprep.subr.bf16.mxu1 %v8244_v29 }
 0x200   : > { %v851_v43 = vpop.f32.mrb[12].mxu1  ;;  %v9095_v45 = vpop.f32.mrb[36].mxu0 }
 0x201   : > { %v857_v46 = vadd.f32 %v851_v43, %v794_v32  ;;  %v7202_v47 = vpop.f32.mrb[13].mxu1  ;;  %v7290_v48 = vpop.f32.mrb[37].mxu0  ;;  %v8103_v32 = vld [vmem:[%s9644_s3 + $0xb8] sm:$0xff]  }
 0x202   : > { %v854_v49 = vpop.f32.mrb[14].mxu1  ;;  %7583 = vmatpush3.bf16.msra.mxu1 %v8089_v42  ;;  %v1547_v51 = vpop.f32.mrb[38].mxu0  ;;  %v8104_v42 = vld [vmem:[%s9644_s3 + $0xd0] sm:$0xff]   ;;  %v8105_v47 = vld [vmem:[%s9644_s3 + $0xd8] sm:$0xff]  }
 0x203   : > { %v7203_v52 = vpop.f32.mrb[15].mxu1  ;;  %7596 = vmatprep.subr.bf16.mxu1 %v8244_v29  ;;  %v7291_v54 = vpop.f32.mrb[39].mxu0  ;;  %v4429_v49 = vld [vmem:[#allocation2 + $0x5f] sm:$0xf] }
 0x205   : > { %7585 = vmatmul.mubr.msk.bf16.vlgmr.msra.gmra.mrb[120].mxu1 %vm594_vm1, %v3810_v53 }
 0x206   : > { %7597 = vmatpush3.bf16.msra.mxu1 %v8091_v50  ;;  %7600 = vmatprep.mubr.msk.bf16.mxu1 %vm8245_vm0, %v8244_v29 }
 0x207   : > { %7598 = vmatprep.subr.bf16.mxu1 %v8244_v29 }
 0x208   : > { %v914_v56 = vpop.f32.mrb[16].mxu1  ;;  %v9108_v57 = vpop.f32.mrb[40].mxu0 }
 0x209   : > { %v920_v59 = vadd.f32 %v914_v56, %v857_v46  ;;  %v7210_v60 = vpop.f32.mrb[17].mxu1  ;;  %v7306_v61 = vpop.f32.mrb[41].mxu0  ;;  %v4306_v46 = vpack.c.bf16 %v4305_v35, %v4305_v35 }
 0x20a   : > { %v917_v62 = vpop.f32.mrb[18].mxu1  ;;  %7599 = vmatpush3.bf16.msra.mxu1 %v8093_v55  ;;  %v1689_v63 = vpop.f32.mrb[42].mxu0  ;;  %v8106_v55 = vld [vmem:[%s9644_s3 + $0xf0] sm:$0xff]   ;;  %v8107_v61 = vld [vmem:[%s9644_s3 + $0xf8] sm:$0xff]  }
 0x20b   : > { %v7211_v1 = vpop.f32.mrb[19].mxu1  ;;  %7612 = vmatprep.subr.bf16.mxu1 %v8244_v29  ;;  %v7307_v3 = vpop.f32.mrb[43].mxu0  ;;  %v4553_v63 = vld [vmem:[#allocation2 + $0x60] sm:$0xf] }
 0x20d   : > { %7601 = vmatmul.mubr.msk.bf16.vlgmr.msra.gmra.mrb[124].mxu1 %vm594_vm1, %v3934_v2 }
 0x20e   : > { %7613 = vmatpush3.bf16.msra.mxu1 %v8095_v0  ;;  %7616 = vmatprep.mubr.msk.bf16.mxu1 %vm8245_vm0, %v8244_v29 }
 0x20f   : > { %7614 = vmatprep.subr.bf16.mxu1 %v8244_v29 }
 0x210   : > { %v977_v5 = vpop.f32.mrb[20].mxu1  ;;  %v9121_v6 = vpop.f32.mrb[44].mxu0 }
 0x211   : > { %v983_v8 = vadd.f32 %v977_v5, %v920_v59  ;;  %v7218_v9 = vpop.f32.mrb[21].mxu1  ;;  %v7322_v10 = vpop.f32.mrb[45].mxu0  ;;  %v4430_v59 = vpack.c.bf16 %v4429_v49, %v4429_v49 }
 0x212   : > { %v980_v11 = vpop.f32.mrb[22].mxu1  ;;  %v1805_v12 = vpop.f32.mrb[46].mxu0  ;;  %7615 = vmatpush3.bf16.msra.mxu1 %v8097_v4  ;;  %v4554_v9 = vpack.c.bf16 %v4553_v63, %v4553_v63 }
 0x213   : > { %v7219_v14 = vpop.f32.mrb[23].mxu1  ;;  %v7323_v16 = vpop.f32.mrb[47].mxu0  ;;  %7628 = vmatprep.subr.bf16.mxu1 %v8244_v29  ;;  %v8111_v12 = vld [vmem:[%s9646_s5 + $0x8] sm:$0xff]  }
 0x215   : > { %7617 = vmatmul.mubr.msk.bf16.vlgmr.msra.gmra.mrb[128].mxu1 %vm594_vm1, %v4058_v17 }
 0x216   : > { %7629 = vmatpush3.bf16.msra.mxu1 %v8099_v13  ;;  %7632 = vmatprep.mubr.msk.bf16.mxu1 %vm8245_vm0, %v8244_v29 }
 0x217   : > { %7630 = vmatprep.subr.bf16.mxu1 %v8244_v29 }
 0x218   : > { %v1040_v20 = vpop.f32.mrb[24].mxu1  ;;  %v9134_v21 = vpop.f32.mrb[48].mxu0 }
 0x219   : > { %v1046_v22 = vadd.f32 %v1040_v20, %v983_v8  ;;  %v7226_v23 = vpop.f32.mrb[25].mxu1  ;;  %v7338_v24 = vpop.f32.mrb[49].mxu0  ;;  %v8113_v20 = vld [vmem:[%s9646_s5 + $0x10] sm:$0xff]  }
 0x21a   : > { %v1043_v26 = vpop.f32.mrb[26].mxu1  ;;  %v1929_v27 = vpop.f32.mrb[50].mxu0  ;;  %7631 = vmatpush3.bf16.msra.mxu1 %v8101_v18 }
 0x21b   : > { %v7227_v28 = vpop.f32.mrb[27].mxu1  ;;  %v7339_v31 = vpop.f32.mrb[51].mxu0  ;;  %7644 = vmatprep.subr.bf16.mxu1 %v8244_v29 }
 0x21d   : > { %7633 = vmatmul.mubr.msk.bf16.vlgmr.msra.gmra.mrb[132].mxu1 %vm594_vm1, %v4182_v25  ;;  %v8115_v25 = vld [vmem:[%s9646_s5 + $0x18] sm:$0xff]  }
 0x21e   : > { %7645 = vmatpush3.bf16.msra.mxu1 %v8102_v37  ;;  %7648 = vmatprep.mubr.msk.bf16.mxu1 %vm8245_vm0, %v8244_v29 }
 0x21f   : > { %7646 = vmatprep.subr.bf16.mxu1 %v8244_v29 }
 0x220   : > { %v1103_v33 = vpop.f32.mrb[28].mxu1  ;;  %v9147_v34 = vpop.f32.mrb[52].mxu0 }
 0x221   : > { %v1109_v36 = vadd.f32 %v1103_v33, %v1046_v22  ;;  %v7234_v38 = vpop.f32.mrb[29].mxu1  ;;  %v7354_v39 = vpop.f32.mrb[53].mxu0 }
 0x222   : > { %v1106_v40 = vpop.f32.mrb[30].mxu1  ;;  %v2053_v41 = vpop.f32.mrb[54].mxu0  ;;  %7647 = vmatpush3.bf16.msra.mxu1 %v8103_v32  ;;  %v9205_v39 = vld [vmem:[%s9645_s4] ss:$0 sm:$0xff] }
 0x223   : > { %v7235_v43 = vpop.f32.mrb[31].mxu1  ;;  %v7355_v44 = vpop.f32.mrb[55].mxu0  ;;  %7660 = vmatprep.subr.bf16.mxu1 %v8244_v29 }
 0x225   : > { %7649 = vmatmul.mubr.msk.bf16.vlgmr.msra.gmra.mrb[136].mxu1 %vm594_vm1, %v4306_v46 }
 0x226   : > { %7661 = vmatpush3.bf16.msra.mxu1 %v8104_v42  ;;  %7664 = vmatprep.mubr.msk.bf16.mxu1 %vm8245_vm0, %v8244_v29 }
 0x227   : > { %7662 = vmatprep.subr.bf16.mxu1 %v8244_v29 }
 0x228   : > { %v1166_v48 = vpop.f32.mrb[32].mxu1  ;;  %v9160_v50 = vpop.f32.mrb[56].mxu0 }
 0x229   : > { %v1172_v51 = vadd.f32 %v1166_v48, %v1109_v36  ;;  %v7242_v52 = vpop.f32.mrb[33].mxu1  ;;  %v7370_v53 = vpop.f32.mrb[57].mxu0 }
 0x22a   : > { %v1169_v54 = vpop.f32.mrb[34].mxu1  ;;  %7663 = vmatpush3.bf16.msra.mxu1 %v8105_v47  ;;  %v2177_v56 = vpop.f32.mrb[58].mxu0 }
 0x22b   : > { %v7243_v58 = vpop.f32.mrb[35].mxu1  ;;  %7676 = vmatprep.subr.bf16.mxu1 %v8244_v29  ;;  %v7371_v60 = vpop.f32.mrb[59].mxu0 }
 0x22d   : > { %7665 = vmatmul.mubr.msk.bf16.vlgmr.msra.gmra.mrb[140].mxu1 %vm594_vm1, %v4430_v59 }
 0x22e   : > { %7677 = vmatpush3.bf16.msra.mxu1 %v8106_v55  ;;  %7680 = vmatprep.mubr.msk.bf16.mxu1 %vm8245_vm0, %v8244_v29 }
 0x22f   : > { %7678 = vmatprep.subr.bf16.mxu1 %v8244_v29 }
 0x230   : > { %v1229_v62 = vpop.f32.mrb[36].mxu1  ;;  %v9173_v0 = vpop.f32.mrb[60].mxu0 }
 0x231   : > { %v1235_v1 = vadd.f32 %v1229_v62, %v1172_v51  ;;  %v7250_v2 = vpop.f32.mrb[37].mxu1  ;;  %v7386_v3 = vpop.f32.mrb[61].mxu0 }
 0x232   : > { %v1232_v4 = vpop.f32.mrb[38].mxu1  ;;  %7679 = vmatpush3.bf16.msra.mxu1 %v8107_v61  ;;  %v2301_v5 = vpop.f32.mrb[62].mxu0 }
 0x233   : > { %v7251_v8 = vpop.f32.mrb[39].mxu1  ;;  %v1298_v10 = vadd.f32 %v9054_v15, %v1235_v1  ;;  %v7387_v11 = vpop.f32.mrb[63].mxu0  ;;  %7696 = vmatprep.subr.bf16.mxu1 %v8244_v29  ;;  %v8116_v1 = vld [vmem:[%s9646_s5 + $0x40] sm:$0xff]  }
 0x235   : > { %7681 = vmatmul.mubr.msk.bf16.vlgmr.msra.gmra.mrb[144].mxu1 %vm594_vm1, %v4554_v9 }
 0x236   : > { %7697 = vmatpush3.bf16.msra.mxu1 %v8109_v7  ;;  %7704 = vmatprep.mubr.msk.bf16.mxu1 %vm8245_vm0, %v8244_v29 }
 0x237   : > { %7698 = vmatprep.subr.bf16.mxu1 %v8244_v29 }
 0x238   : > { %v1355_v13 = vpop.f32.mrb[40].mxu1  ;;  %v9187_v14 = vpop.f32.mrb[64].mxu0 }
 0x239   : > { %v1361_v16 = vadd.f32 %v1355_v13, %v1298_v10  ;;  %v7266_v15 = vpop.f32.mrb[41].mxu1  ;;  %v7402_v17 = vpop.f32.mrb[65].mxu0  ;;  %v8117_v10 = vld [vmem:[%s9646_s5 + $0x48] sm:$0xff]  }
 0x23a   : > { %v1358_v18 = vpop.f32.mrb[42].mxu1  ;;  %v2425_v19 = vpop.f32.mrb[66].mxu0  ;;  %7699 = vmatpush3.bf16.msra.mxu1 %v8111_v12  ;;  %v8122_v15 = vld [vmem:[%s9646_s5 + $0x68] sm:$0xff]   ;;  %v8118_v17 = vld [vmem:[%s9646_s5 + $0x50] sm:$0xff]  }
 0x23b   : > { %v7267_v22 = vpop.f32.mrb[43].mxu1  ;;  %v1424_v23 = vadd.f32 %v9077_v30, %v1361_v16  ;;  %v7403_v24 = vpop.f32.mrb[67].mxu0  ;;  %7700 = vmatprep.subr.bf16.mxu1 %v8244_v29 }
 0x23e   : > { %7701 = vmatpush3.bf16.msra.mxu1 %v8113_v20 }
 0x23f   : > { %7702 = vmatprep.subr.bf16.mxu1 %v8244_v29 }
 0x240   : > { %v1481_v26 = vpop.f32.mrb[44].mxu1  ;;  %v9198_v27 = vpop.f32.mrb[68].mxu0 }
 0x241   : > { %v1487_v37 = vadd.f32 %v1481_v26, %v1424_v23  ;;  %v7282_v28 = vpop.f32.mrb[45].mxu1  ;;  %v7418_v31 = vpop.f32.mrb[69].mxu0 }
 0x242   : > { %v1484_v32 = vpop.f32.mrb[46].mxu1  ;;  %v2549_v33 = vpop.f32.mrb[70].mxu0  ;;  %7703 = vmatpush3.bf16.msra.mxu1 %v8115_v25  ;;  %v8119_v25 = vld [vmem:[%s9646_s5 + $0x58] sm:$0xff]  }
 0x243   : > { %v7283_v30 = vpop.f32.mrb[47].mxu1  ;;  %v7419_v35 = vpop.f32.mrb[71].mxu0  ;;  %v1550_v36 = vadd.f32 %v9095_v45, %v1487_v37  ;;  %7720 = vmatprep.subr.bf16.mxu1 %v8244_v29  ;;  %v8126_v32 = vld [vmem:[%s9646_s5 + $0x78] sm:$0xff]  }
 0x244   : > { %v8121_v30 = vld [vmem:[%s9646_s5 + $0x80] sm:$0xff]  }
 0x248   : > { %v1607_v38 = vpop.f32.mrb[48].mxu1  ;;  %v9207_v40 = vpop.f32.mrb[72].mxu0 }
 0x249   : > { %v1613_v41 = vadd.f32 %v1607_v38, %v1550_v36  ;;  %v7298_v42 = vpop.f32.mrb[49].mxu1  ;;  %v7434_v43 = vpop.f32.mrb[73].mxu0 }
 0x24a   : > { %v1610_v44 = vpop.f32.mrb[50].mxu1  ;;  %v2689_v46 = vpop.f32.mrb[74].mxu0 }
 0x24b   : > { %v1621_v47 = vadd.f32 %v9205_v39, %v1613_v41  ;;  %v7299_v48 = vpop.f32.mrb[51].mxu1  ;;  %v7435_v49 = vpop.f32.mrb[75].mxu0  ;;  %v8123_v46 = vld [vmem:[%s9646_s5 + $0x88] sm:$0xff]  }
 0x24d   : > { %v1622_v45 = vmax.f32 %v1621_v47, 0.0 }
 0x24f   : > { %1624 = vst.msk [vmem:[#allocation3] sm:$0xf] %vm1623_vm3, %v1622_v45  ;;  %v8125_v45 = vld [vmem:[%s9646_s5 + $0x90] sm:$0xff]  }
 0x250   : > { %v1741_v51 = vpop.f32.mrb[52].mxu1  ;;  %v9211_v52 = vpop.f32.mrb[76].mxu0 }
 0x251   : > { %v1742_v53 = vadd.f32 %v1741_v51, %v9108_v57  ;;  %v7314_v54 = vpop.f32.mrb[53].mxu1  ;;  %v7450_v55 = vpop.f32.mrb[77].mxu0  ;;  %v8120_v57 = vld [vmem:[%s9646_s5 + $0x60] sm:$0xff]  }
 0x252   : > { %v1744_v56 = vpop.f32.mrb[54].mxu1  ;;  %v2805_v58 = vpop.f32.mrb[78].mxu0 }
 0x253   : > { %v7315_v59 = vpop.f32.mrb[55].mxu1  ;;  %v7451_v60 = vpop.f32.mrb[79].mxu0  ;;  %v1808_v61 = vadd.f32 %v9121_v6, %v1742_v53 }
 0x256   : > { %v4635_v62 = vld [vmem:[#allocation3 + $0x1] sm:$0x3] }
 0x257   : > { %v4625_v63 = vld [vmem:[#allocation3] sm:$0x3]  ;;  %v4636_v2 = vpack.c.bf16 %v4635_v62, %v4635_v62  ;;  %v4781_v33 = vld [vmem:[#allocation3 + $0x2] sm:$0x3] }
 0x258   : > { %v4626_v3 = vpack.c.bf16 %v4625_v63, %v4625_v63  ;;  %v1864_v4 = vpop.f32.mrb[56].mxu1  ;;  %v9221_v5 = vpop.f32.mrb[80].mxu0  ;;  %v4782_v35 = vpack.c.bf16 %v4781_v33, %v4781_v33 }
 0x259   : > { %v1870_v7 = vadd.f32 %v1864_v4, %v1808_v61  ;;  %v7330_v8 = vpop.f32.mrb[57].mxu1  ;;  %7693 = vmatmul.mubr.msk.bf16.vlgmr.msra.gmra.mrb[136].mxu0 %vm4670_vm4, %v4636_v2  ;;  %v7466_v6 = vpop.f32.mrb[81].mxu0 }
 0x25a   : > { %7705 = vmatmul.mubr.msk.bf16.vlgmr.msra.gmra.mrb[148].mxu1 %vm4670_vm4, %v4626_v3  ;;  %7709 = vmatpush3.bf16.msra.mxu0 %v8116_v1  ;;  %v1867_v9 = vpop.f32.mrb[58].mxu1  ;;  %v2929_v11 = vpop.f32.mrb[82].mxu0 }
 0x25b   : > { %7716 = vmatprep.mubr.msk.bf16.mxu0 %vm8245_vm0, %v8244_v29  ;;  %v7331_v12 = vpop.f32.mrb[59].mxu1  ;;  %7710 = vmatprep.subr.bf16.mxu0 %v8244_v29  ;;  %v1932_v13 = vadd.f32 %v9134_v21, %v1870_v7  ;;  %v7467_v16 = vpop.f32.mrb[83].mxu0  ;;  %v8124_v21 = vld [vmem:[%s9646_s5 + $0x70] sm:$0xff]  }
 0x25c   : > { %7721 = vmatpush3.bf16.msra.mxu1 %v8120_v57  ;;  %7728 = vmatprep.mubr.msk.bf16.mxu1 %vm8245_vm0, %v8244_v29 }
 0x25d   : > { %7722 = vmatprep.subr.bf16.mxu1 %v8244_v29 }
 0x25e   : > { %7711 = vmatpush3.bf16.msra.mxu0 %v8117_v10 }
 0x25f   : > { %7712 = vmatprep.subr.bf16.mxu0 %v8244_v29 }
 0x260   : > { %7723 = vmatpush3.bf16.msra.mxu1 %v8122_v15  ;;  %v1988_v18 = vpop.f32.mrb[60].mxu1  ;;  %v9245_v19 = vpop.f32.mrb[84].mxu0 }
 0x261   : > { %7724 = vmatprep.subr.bf16.mxu1 %v8244_v29  ;;  %v1994_v20 = vadd.f32 %v1988_v18, %v1932_v13  ;;  %v7346_v22 = vpop.f32.mrb[61].mxu1  ;;  %v7482_v23 = vpop.f32.mrb[85].mxu0 }
 0x262   : > { %7713 = vmatpush3.bf16.msra.mxu0 %v8118_v17  ;;  %v1991_v24 = vpop.f32.mrb[62].mxu1  ;;  %v3053_v26 = vpop.f32.mrb[86].mxu0 }
 0x263   : > { %v7347_v37 = vpop.f32.mrb[63].mxu1  ;;  %7714 = vmatprep.subr.bf16.mxu0 %v8244_v29  ;;  %v2056_v28 = vadd.f32 %v9147_v34, %v1994_v20  ;;  %v7483_v31 = vpop.f32.mrb[87].mxu0 }
 0x264   : > { %7725 = vmatpush3.bf16.msra.mxu1 %v8124_v21 }
 0x265   : > { %7726 = vmatprep.subr.bf16.mxu1 %v8244_v29 }
 0x266   : > { %7715 = vmatpush3.bf16.msra.mxu0 %v8119_v25 }
 0x267   : > { %7732 = vmatprep.subr.bf16.mxu0 %v8244_v29 }
 0x268   : > { %7727 = vmatpush3.bf16.msra.mxu1 %v8126_v32  ;;  %v2112_v36 = vpop.f32.mrb[64].mxu1  ;;  %v9261_v34 = vpop.f32.mrb[88].mxu0 }
 0x269   : > { %7744 = vmatprep.subr.bf16.mxu1 %v8244_v29  ;;  %v2118_v38 = vadd.f32 %v2112_v36, %v2056_v28  ;;  %7717 = vmatmul.mubr.msk.bf16.vlgmr.msra.gmra.mrb[140].mxu0 %vm4670_vm4, %v4782_v35  ;;  %v7362_v41 = vpop.f32.mrb[65].mxu1  ;;  %v7498_v42 = vpop.f32.mrb[89].mxu0 }
 0x26a   : > { %v2115_v43 = vpop.f32.mrb[66].mxu1  ;;  %v3177_v44 = vpop.f32.mrb[90].mxu0  ;;  %7733 = vmatpush3.bf16.msra.mxu0 %v8121_v30  ;;  %7740 = vmatprep.mubr.msk.bf16.mxu0 %vm8245_vm0, %v8244_v29 }
 0x26b   : > { %v7363_v47 = vpop.f32.mrb[67].mxu1  ;;  %v7499_v48 = vpop.f32.mrb[91].mxu0  ;;  %v2180_v49 = vadd.f32 %v9160_v50, %v2118_v38  ;;  %7734 = vmatprep.subr.bf16.mxu0 %v8244_v29  ;;  %v8127_v50 = vld [vmem:[%s9646_s5 + $0x98] sm:$0xff]  }
 0x26c   : > { %v8128_v48 = vld [vmem:[%s9646_s5 + $0xa0] sm:$0xff]  }
 0x26e   : > { %7735 = vmatpush3.bf16.msra.mxu0 %v8123_v46 }
 0x26f   : > { %7736 = vmatprep.subr.bf16.mxu0 %v8244_v29 }
 0x270   : > { %v2236_v51 = vpop.f32.mrb[68].mxu1  ;;  %v9276_v53 = vpop.f32.mrb[92].mxu0 }
 0x271   : > { %v2242_v54 = vadd.f32 %v2236_v51, %v2180_v49  ;;  %v7378_v55 = vpop.f32.mrb[69].mxu1  ;;  %v7514_v56 = vpop.f32.mrb[93].mxu0 }
 0x272   : > { %v2239_v58 = vpop.f32.mrb[70].mxu1  ;;  %v3301_v59 = vpop.f32.mrb[94].mxu0  ;;  %7737 = vmatpush3.bf16.msra.mxu0 %v8125_v45  ;;  %v8129_v56 = vld [vmem:[%s9646_s5 + $0xa8] sm:$0xff]  }
 0x273   : > { %v7379_v60 = vpop.f32.mrb[71].mxu1  ;;  %v7515_v61 = vpop.f32.mrb[95].mxu0  ;;  %v2304_v62 = vadd.f32 %v9173_v0, %v2242_v54  ;;  %7738 = vmatprep.subr.bf16.mxu0 %v8244_v29 }
 0x274   : > { %v8134_v61 = vld [vmem:[%s9646_s5 + $0xc8] sm:$0xff]  }
 0x276   : > { %7739 = vmatpush3.bf16.msra.mxu0 %v8127_v50 }
 0x277   : > { %7756 = vmatprep.subr.bf16.mxu0 %v8244_v29 }
 0x278   : > { %v2360_v63 = vpop.f32.mrb[72].mxu1  ;;  %v9284_v1 = vpop.f32.mrb[96].mxu0 }
 0x279   : > { %v2366_v2 = vadd.f32 %v2360_v63, %v2304_v62  ;;  %v7394_v3 = vpop.f32.mrb[73].mxu1  ;;  %v7530_v57 = vpop.f32.mrb[97].mxu0 }
 0x27a   : > { %v2363_v4 = vpop.f32.mrb[74].mxu1  ;;  %v3425_v7 = vpop.f32.mrb[98].mxu0 }
 0x27b   : > { %v7395_v8 = vpop.f32.mrb[75].mxu1  ;;  %v2428_v6 = vadd.f32 %v9187_v14, %v2366_v2  ;;  %v7531_v9 = vpop.f32.mrb[99].mxu0  ;;  %v8130_v2 = vld [vmem:[%s9646_s5 + $0xb0] sm:$0xff]  }
 0x27c   : > { %v8131_v8 = vld [vmem:[%s9646_s5 + $0xb8] sm:$0xff]  }
 0x280   : > { %v2484_v10 = vpop.f32.mrb[76].mxu1  ;;  %v9287_v11 = vpop.f32.mrb[100].mxu0 }
 0x281   : > { %v2490_v0 = vadd.f32 %v2484_v10, %v2428_v6  ;;  %v7410_v12 = vpop.f32.mrb[77].mxu1  ;;  %v7546_v13 = vpop.f32.mrb[101].mxu0 }
 0x282   : > { %v2487_v16 = vpop.f32.mrb[78].mxu1  ;;  %v3549_v15 = vpop.f32.mrb[102].mxu0  ;;  %v8138_v12 = vld [vmem:[%s9646_s5 + $0xd8] sm:$0xff]  }
 0x283   : > { %v7411_v17 = vpop.f32.mrb[79].mxu1  ;;  %v2552_v21 = vadd.f32 %v9198_v27, %v2490_v0  ;;  %v7547_v18 = vpop.f32.mrb[103].mxu0 }
 0x284   : > { %v8133_v17 = vld [vmem:[%s9646_s5 + $0xe0] sm:$0xff]  }
 0x288   : > { %v2608_v20 = vpop.f32.mrb[80].mxu1  ;;  %v9290_v22 = vpop.f32.mrb[104].mxu0 }
 0x289   : > { %v2614_v23 = vadd.f32 %v2608_v20, %v2552_v21  ;;  %v7426_v24 = vpop.f32.mrb[81].mxu1  ;;  %v7562_v25 = vpop.f32.mrb[105].mxu0 }
 0x28a   : > { %v2611_v14 = vpop.f32.mrb[82].mxu1  ;;  %v3689_v26 = vpop.f32.mrb[106].mxu0  ;;  %v8135_v24 = vld [vmem:[%s9646_s5 + $0xe8] sm:$0xff]  }
 0x28b   : > { %v2622_v37 = vadd.f32 %v9205_v39, %v2614_v23  ;;  %v7427_v28 = vpop.f32.mrb[83].mxu1  ;;  %v7563_v31 = vpop.f32.mrb[107].mxu0 }
 0x28d   : > { %v2623_v32 = vmax.f32 %v2622_v37, 0.0 }
 0x28f   : > { %2624 = vst.msk [vmem:[#allocation3 + $0x4] sm:$0xf] %vm1623_vm3, %v2623_v32  ;;  %v8137_v32 = vld [vmem:[%s9646_s5 + $0xf0] sm:$0xff]  }
 0x290   : > { %v2741_v33 = vpop.f32.mrb[84].mxu1  ;;  %v9294_v30 = vpop.f32.mrb[108].mxu0 }
 0x291   : > { %v2742_v27 = vadd.f32 %v2741_v33, %v9207_v40  ;;  %v7442_v35 = vpop.f32.mrb[85].mxu1  ;;  %v7578_v36 = vpop.f32.mrb[109].mxu0  ;;  %v8132_v40 = vld [vmem:[%s9646_s5 + $0xc0] sm:$0xff]  }
 0x292   : > { %v2744_v38 = vpop.f32.mrb[86].mxu1  ;;  %v3805_v41 = vpop.f32.mrb[110].mxu0 }
 0x293   : > { %v7443_v42 = vpop.f32.mrb[87].mxu1  ;;  %v7579_v43 = vpop.f32.mrb[111].mxu0  ;;  %v2808_v44 = vadd.f32 %v9211_v52, %v2742_v27 }
 0x296   : > { %v4860_v46 = vld [vmem:[#allocation3 + $0x4] sm:$0x3]  ;;  %v5018_v13 = vld [vmem:[#allocation3 + $0x6] sm:$0x3] }
 0x297   : > { %v4939_v47 = vld [vmem:[#allocation3 + $0x5] sm:$0x3]  ;;  %v4861_v49 = vpack.c.bf16 %v4860_v46, %v4860_v46  ;;  %v5019_v21 = vpack.c.bf16 %v5018_v13, %v5018_v13 }
 0x298   : > { %v4940_v45 = vpack.c.bf16 %v4939_v47, %v4939_v47  ;;  %v2864_v51 = vpop.f32.mrb[88].mxu1 }
 0x299   : > { %v2870_v54 = vadd.f32 %v2864_v51, %v2808_v44  ;;  %v7458_v55 = vpop.f32.mrb[89].mxu1  ;;  %7729 = vmatmul.mubr.msk.bf16.vlgmr.msra.gmra.mrb[152].mxu1 %vm4670_vm4, %v4861_v49 }
 0x29a   : > { %7741 = vmatmul.mubr.msk.bf16.vlgmr.msra.gmra.mrb[144].mxu0 %vm4670_vm4, %v4940_v45  ;;  %7745 = vmatpush3.bf16.msra.mxu1 %v8128_v48  ;;  %v2867_v52 = vpop.f32.mrb[90].mxu1  ;;  %v9311_v58 = vpop.f32.mrb[112].mxu0 }
 0x29b   : > { %7752 = vmatprep.mubr.msk.bf16.mxu1 %vm8245_vm0, %v8244_v29  ;;  %v7459_v59 = vpop.f32.mrb[91].mxu1  ;;  %7746 = vmatprep.subr.bf16.mxu1 %v8244_v29  ;;  %v2932_v50 = vadd.f32 %v9221_v5, %v2870_v54  ;;  %v7594_v60 = vpop.f32.mrb[113].mxu0  ;;  %v8136_v5 = vld [vmem:[%s9646_s5 + $0xd0] sm:$0xff]  }
 0x29c   : > { %7757 = vmatpush3.bf16.msra.mxu0 %v8132_v40  ;;  %v3929_v62 = vpop.f32.mrb[114].mxu0  ;;  %7764 = vmatprep.mubr.msk.bf16.mxu0 %vm8245_vm0, %v8244_v29 }
 0x29d   : > { %7758 = vmatprep.subr.bf16.mxu0 %v8244_v29  ;;  %v7595_v63 = vpop.f32.mrb[115].mxu0 }
 0x29e   : > { %7747 = vmatpush3.bf16.msra.mxu1 %v8129_v56 }
 0x29f   : > { %7748 = vmatprep.subr.bf16.mxu1 %v8244_v29 }
 0x2a0   : > { %7759 = vmatpush3.bf16.msra.mxu0 %v8134_v61  ;;  %v2988_v3 = vpop.f32.mrb[92].mxu1 }
 0x2a1   : > { %7760 = vmatprep.subr.bf16.mxu0 %v8244_v29  ;;  %v2994_v57 = vadd.f32 %v2988_v3, %v2932_v50  ;;  %v7474_v4 = vpop.f32.mrb[93].mxu1 }
 0x2a2   : > { %7749 = vmatpush3.bf16.msra.mxu1 %v8130_v2  ;;  %v2991_v7 = vpop.f32.mrb[94].mxu1  ;;  %v9332_v6 = vpop.f32.mrb[116].mxu0 }
 0x2a3   : > { %v7475_v9 = vpop.f32.mrb[95].mxu1  ;;  %7750 = vmatprep.subr.bf16.mxu1 %v8244_v29  ;;  %v3056_v10 = vadd.f32 %v9245_v19, %v2994_v57  ;;  %v7610_v0 = vpop.f32.mrb[117].mxu0 }
 0x2a4   : > { %7761 = vmatpush3.bf16.msra.mxu0 %v8136_v5  ;;  %v4053_v16 = vpop.f32.mrb[118].mxu0 }
 0x2a5   : > { %7762 = vmatprep.subr.bf16.mxu0 %v8244_v29  ;;  %v7611_v15 = vpop.f32.mrb[119].mxu0 }
 0x2a6   : > { %7751 = vmatpush3.bf16.msra.mxu1 %v8131_v8 }
 0x2a7   : > { %7768 = vmatprep.subr.bf16.mxu1 %v8244_v29 }
 0x2a8   : > { %7763 = vmatpush3.bf16.msra.mxu0 %v8138_v12  ;;  %v3112_v19 = vpop.f32.mrb[96].mxu1 }
 0x2a9   : > { %7780 = vmatprep.subr.bf16.mxu0 %v8244_v29  ;;  %v3118_v18 = vadd.f32 %v3112_v19, %v3056_v10  ;;  %7753 = vmatmul.mubr.msk.bf16.vlgmr.msra.gmra.mrb[156].mxu1 %vm4670_vm4, %v5019_v21  ;;  %v7490_v20 = vpop.f32.mrb[97].mxu1 }
 0x2aa   : > { %v3115_v23 = vpop.f32.mrb[98].mxu1  ;;  %7769 = vmatpush3.bf16.msra.mxu1 %v8133_v17  ;;  %7776 = vmatprep.mubr.msk.bf16.mxu1 %vm8245_vm0, %v8244_v29  ;;  %v9351_v25 = vpop.f32.mrb[120].mxu0  ;;  %v8140_v17 = vld [vmem:[%s9646_s5 + $0x100] sm:$0xff]  }
 0x2ab   : > { %v7491_v14 = vpop.f32.mrb[99].mxu1  ;;  %v3180_v26 = vadd.f32 %v9261_v34, %v3118_v18  ;;  %7770 = vmatprep.subr.bf16.mxu1 %v8244_v29  ;;  %v7626_v37 = vpop.f32.mrb[121].mxu0  ;;  %v8139_v34 = vld [vmem:[%s9646_s5 + $0xf8] sm:$0xff]  }
 0x2ac   : > { %v4177_v28 = vpop.f32.mrb[122].mxu0  ;;  %v8142_v14 = vld [vmem:[%s9646_s5 + $0x108] sm:$0xff]  }
 0x2ad   : > { %v7627_v31 = vpop.f32.mrb[123].mxu0 }
 0x2ae   : > { %7771 = vmatpush3.bf16.msra.mxu1 %v8135_v24  ;;  %v8144_v31 = vld [vmem:[%s9646_s5 + $0x110] sm:$0xff]  }
 0x2af   : > { %7772 = vmatprep.subr.bf16.mxu1 %v8244_v29 }
 0x2b0   : > { %v3236_v33 = vpop.f32.mrb[100].mxu1 }
 0x2b1   : > { %v3242_v27 = vadd.f32 %v3236_v33, %v3180_v26  ;;  %v7506_v35 = vpop.f32.mrb[101].mxu1  ;;  %v8143_v26 = vld [vmem:[%s9646_s5 + $0x28] sm:$0xff]  }
 0x2b2   : > { %v3239_v36 = vpop.f32.mrb[102].mxu1  ;;  %7773 = vmatpush3.bf16.msra.mxu1 %v8137_v32  ;;  %v9362_v38 = vpop.f32.mrb[124].mxu0  ;;  %v8145_v32 = vld [vmem:[%s9646_s5 + $0x30] sm:$0xff]  }
 0x2b3   : > { %v7507_v41 = vpop.f32.mrb[103].mxu1  ;;  %v3304_v42 = vadd.f32 %v9276_v53, %v3242_v27  ;;  %7774 = vmatprep.subr.bf16.mxu1 %v8244_v29  ;;  %v7642_v43 = vpop.f32.mrb[125].mxu0  ;;  %v8146_v36 = vld [vmem:[%s9646_s5 + $0x118] sm:$0xff]  }
 0x2b4   : > { %v4301_v44 = vpop.f32.mrb[126].mxu0 }
 0x2b5   : > { %v7643_v46 = vpop.f32.mrb[127].mxu0  ;;  %v5355_v44 = vld [vmem:[#allocation3 + $0x5] sm:$0x3] }
 0x2b6   : > { %7775 = vmatpush3.bf16.msra.mxu1 %v8139_v34  ;;  %v8147_v34 = vld [vmem:[%s9646_s5 + $0x38] sm:$0xff]   ;;  %v8148_v46 = vld [vmem:[%s9646_s5] sm:$0xff]  }
 0x2b7   : > { %7792 = vmatprep.subr.bf16.mxu1 %v8244_v29 }
 0x2b8   : > { %v3360_v47 = vpop.f32.mrb[104].mxu1 }
 0x2b9   : > { %v3366_v48 = vadd.f32 %v3360_v47, %v3304_v42  ;;  %v7522_v49 = vpop.f32.mrb[105].mxu1  ;;  %v8149_v47 = vld [vmem:[%s9646_s5 + $0x40] sm:$0xff]  }
 0x2ba   : > { %v3363_v45 = vpop.f32.mrb[106].mxu1  ;;  %v9367_v40 = vpop.f32.mrb[128].mxu0  ;;  %v5356_v49 = vpack.c.bf16 %v5355_v44, %v5355_v44  ;;  %v8168_v44 = vld [vmem:[%s9646_s5 + $0xb0] sm:$0xff]  }
 0x2bb   : > { %v7523_v51 = vpop.f32.mrb[107].mxu1  ;;  %v3428_v54 = vadd.f32 %v9284_v1, %v3366_v48  ;;  %v7658_v55 = vpop.f32.mrb[129].mxu0 }
 0x2bc   : > { %v4425_v52 = vpop.f32.mrb[130].mxu0  ;;  %v8150_v55 = vld [vmem:[%s9646_s5 + $0x8] sm:$0xff]  }
 0x2bd   : > { %v7659_v53 = vpop.f32.mrb[131].mxu0  ;;  %v8151_v52 = vld [vmem:[%s9646_s5 + $0x48] sm:$0xff]  }
 0x2c0   : > { %v3484_v56 = vpop.f32.mrb[108].mxu1 }
 0x2c1   : > { %v3490_v59 = vadd.f32 %v3484_v56, %v3428_v54  ;;  %v7538_v50 = vpop.f32.mrb[109].mxu1 }
 0x2c2   : > { %v3487_v60 = vpop.f32.mrb[110].mxu1  ;;  %v9370_v61 = vpop.f32.mrb[132].mxu0  ;;  %v8153_v50 = vld [vmem:[%s9646_s5 + $0x50] sm:$0xff]  }
 0x2c3   : > { %v7539_v62 = vpop.f32.mrb[111].mxu1  ;;  %v3552_v63 = vadd.f32 %v9287_v11, %v3490_v59  ;;  %v7674_v2 = vpop.f32.mrb[133].mxu0  ;;  %v8152_v59 = vld [vmem:[%s9646_s5 + $0x10] sm:$0xff]  }
 0x2c4   : > { %v4549_v5 = vpop.f32.mrb[134].mxu0  ;;  %v8154_v2 = vld [vmem:[%s9646_s5 + $0x18] sm:$0xff]  }
 0x2c5   : > { %v7675_v3 = vpop.f32.mrb[135].mxu0  ;;  %v8155_v5 = vld [vmem:[%s9646_s5 + $0x58] sm:$0xff]  }
 0x2c8   : > { %v3608_v57 = vpop.f32.mrb[112].mxu1 }
 0x2c9   : > { %v3614_v4 = vadd.f32 %v3608_v57, %v3552_v63  ;;  %v7554_v7 = vpop.f32.mrb[113].mxu1 }
 0x2ca   : > { %v3611_v8 = vpop.f32.mrb[114].mxu1  ;;  %v5499_v7 = vld [vmem:[#allocation3 + $0x6] sm:$0x3] }
 0x2cb   : > { %v3622_v1 = vadd.f32 %v9205_v39, %v3614_v4  ;;  %v7555_v9 = vpop.f32.mrb[115].mxu1  ;;  %v8141_v39 = vld [vmem:[%s9646_s5 + $0x20] sm:$0xff]   ;;  %v5345_v4 = vld [vmem:[#allocation3 + $0x4] sm:$0x3] }
 0x2cc   : > { %v8156_v8 = vld [vmem:[%s9646_s5 + $0x60] sm:$0xff]   ;;  %v5346_v9 = vpack.c.bf16 %v5345_v4, %v5345_v4 }
 0x2cd   : > { %v3623_v10 = vmax.f32 %v3622_v1, 0.0  ;;  %v8157_v1 = vld [vmem:[%s9646_s5 + $0x80] sm:$0xff]  }
 0x2cf   : > { %3624 = vst.msk [vmem:[#allocation3 + $0x8] sm:$0xf] %vm1623_vm3, %v3623_v10  ;;  %v5500_v10 = vpack.c.bf16 %v5499_v7, %v5499_v7 }
 0x2d0   : > { %v3741_v0 = vpop.f32.mrb[116].mxu1 }
 0x2d1   : > { %v3742_v12 = vadd.f32 %v3741_v0, %v9290_v22  ;;  %v7570_v13 = vpop.f32.mrb[117].mxu1 }
 0x2d2   : > { %v3744_v16 = vpop.f32.mrb[118].mxu1 }
 0x2d3   : > { %v7571_v15 = vpop.f32.mrb[119].mxu1  ;;  %v3808_v11 = vadd.f32 %v9294_v30, %v3742_v12  ;;  %v8158_v16 = vld [vmem:[%s9646_s5 + $0x68] sm:$0xff]  }
 0x2d4   : > { %v8159_v15 = vld [vmem:[%s9646_s5 + $0x88] sm:$0xff]  }
 0x2d6   : > { %v5097_v21 = vld [vmem:[#allocation3 + $0x8] sm:$0x3]  ;;  %v5255_v43 = vld [vmem:[#allocation3 + $0xa] sm:$0x3] }
 0x2d7   : > { %v5176_v19 = vld [vmem:[#allocation3 + $0x9] sm:$0x3]  ;;  %v5098_v18 = vpack.c.bf16 %v5097_v21, %v5097_v21  ;;  %v5256_v48 = vpack.c.bf16 %v5255_v43, %v5255_v43 }
 0x2d8   : > { %v5177_v20 = vpack.c.bf16 %v5176_v19, %v5176_v19  ;;  %v3864_v23 = vpop.f32.mrb[120].mxu1  ;;  %v8160_v21 = vld [vmem:[%s9646_s5 + $0x70] sm:$0xff]  }
 0x2d9   : > { %v3870_v24 = vadd.f32 %v3864_v23, %v3808_v11  ;;  %v7586_v22 = vpop.f32.mrb[121].mxu1  ;;  %7765 = vmatmul.mubr.msk.bf16.vlgmr.msra.gmra.mrb[148].mxu0 %vm4670_vm4, %v5098_v18  ;;  %v8161_v19 = vld [vmem:[%s9646_s5 + $0x90] sm:$0xff]   ;;  %v8162_v23 = vld [vmem:[%s9646_s5 + $0x78] sm:$0xff]  }
 0x2da   : > { %7777 = vmatmul.mubr.msk.bf16.vlgmr.msra.gmra.mrb[160].mxu1 %vm4670_vm4, %v5177_v20  ;;  %7781 = vmatpush3.bf16.msra.mxu0 %v8140_v17  ;;  %v3867_v30 = vpop.f32.mrb[122].mxu1 }
 0x2db   : > { %7793 = vmatpush3.bf16.msra.mxu1 %v8141_v39  ;;  %v7587_v37 = vpop.f32.mrb[123].mxu1  ;;  %7782 = vmatprep.subr.bf16.mxu0 %v8244_v29  ;;  %v3932_v28 = vadd.f32 %v9311_v58, %v3870_v24  ;;  %v8163_v24 = vld [vmem:[%s9646_s5 + $0x98] sm:$0xff]  }
 0x2dc   : > { %7794 = vmatprep.subr.bf16.mxu1 %v8244_v29  ;;  %7788 = vmatprep.mubr.msk.bf16.mxu0 %vm8245_vm0, %v8244_v29  ;;  %v8164_v37 = vld [vmem:[%s9646_s5 + $0xa0] sm:$0xff]  }
 0x2dd   : > { %7800 = vmatprep.mubr.msk.bf16.mxu1 %vm8245_vm0, %v8244_v29 }
 0x2de   : > { %7783 = vmatpush3.bf16.msra.mxu0 %v8142_v14  ;;  %v5577_v14 = vld [vmem:[#allocation3 + $0x8] sm:$0x3] }
 0x2df   : > { %7795 = vmatpush3.bf16.msra.mxu1 %v8143_v26  ;;  %7784 = vmatprep.subr.bf16.mxu0 %v8244_v29  ;;  %v5655_v26 = vld [vmem:[#allocation3 + $0x9] sm:$0x3] }
 0x2e0   : > { %7796 = vmatprep.subr.bf16.mxu1 %v8244_v29  ;;  %v3988_v58 = vpop.f32.mrb[124].mxu1 }
 0x2e1   : > { %v3994_v33 = vadd.f32 %v3988_v58, %v3932_v28  ;;  %v7602_v27 = vpop.f32.mrb[125].mxu1  ;;  %v8165_v28 = vld [vmem:[%s9646_s5 + $0xc0] sm:$0xff]  }
 0x2e2   : > { %7785 = vmatpush3.bf16.msra.mxu0 %v8144_v31  ;;  %v3991_v35 = vpop.f32.mrb[126].mxu1  ;;  %v5578_v31 = vpack.c.bf16 %v5577_v14, %v5577_v14 }
 0x2e3   : > { %7797 = vmatpush3.bf16.msra.mxu1 %v8145_v32  ;;  %v7603_v41 = vpop.f32.mrb[127].mxu1  ;;  %7786 = vmatprep.subr.bf16.mxu0 %v8244_v29  ;;  %v4056_v42 = vadd.f32 %v9332_v6, %v3994_v33  ;;  %v5656_v32 = vpack.c.bf16 %v5655_v26, %v5655_v26 }
 0x2e4   : > { %7798 = vmatprep.subr.bf16.mxu1 %v8244_v29 }
 0x2e6   : > { %7787 = vmatpush3.bf16.msra.mxu0 %v8146_v36  ;;  %v8166_v36 = vld [vmem:[%s9646_s5 + $0xa8] sm:$0xff]  }
 0x2e7   : > { %7799 = vmatpush3.bf16.msra.mxu1 %v8147_v34  ;;  %7804 = vmatprep.subr.bf16.mxu0 %v8244_v29  ;;  %v8167_v34 = vld [vmem:[%s9646_s5 + $0xc8] sm:$0xff]  }
 0x2e8   : > { %7816 = vmatprep.subr.bf16.mxu1 %v8244_v29  ;;  %v4112_v45 = vpop.f32.mrb[128].mxu1 }
 0x2e9   : > { %v4118_v6 = vadd.f32 %v4112_v45, %v4056_v42  ;;  %7789 = vmatmul.mubr.msk.bf16.vlgmr.msra.gmra.mrb[152].mxu0 %vm4670_vm4, %v5256_v48  ;;  %v7618_v51 = vpop.f32.mrb[129].mxu1  ;;  %v8171_v48 = vld [vmem:[%s9646_s5 + $0xd8] sm:$0xff]  }
 0x2ea   : > { %7801 = vmatmul.mubr.msk.bf16.vlgmr.msra.gmra.mrb[164].mxu1 %vm4670_vm4, %v5356_v49  ;;  %7805 = vmatpush3.bf16.msra.mxu0 %v8148_v46  ;;  %v4115_v54 = vpop.f32.mrb[130].mxu1  ;;  %v8169_v46 = vld [vmem:[%s9646_s5 + $0xd0] sm:$0xff]   ;;  %v8173_v51 = vld [vmem:[%s9646_s5 + $0x100] sm:$0xff]  }
 0x2eb   : > { %7817 = vmatpush3.bf16.msra.mxu1 %v8149_v47  ;;  %v7619_v53 = vpop.f32.mrb[131].mxu1  ;;  %7806 = vmatprep.subr.bf16.mxu0 %v8244_v29  ;;  %v4180_v56 = vadd.f32 %v9351_v25, %v4118_v6  ;;  %v8170_v47 = vld [vmem:[%s9646_s5 + $0xb8] sm:$0xff]   ;;  %v5733_v49 = vld [vmem:[#allocation3 + $0xa] sm:$0x3]  ;;  %v8172_v6 = vld [vmem:[%s9646_s5 + $0xe0] sm:$0xff]  }
 0x2ec   : > { %7818 = vmatprep.subr.bf16.mxu1 %v8244_v29  ;;  %7812 = vmatprep.mubr.msk.bf16.mxu0 %vm8245_vm0, %v8244_v29  ;;  %v5734_v54 = vpack.c.bf16 %v5733_v49, %v5733_v49  ;;  %v8175_v53 = vld [vmem:[%s9646_s5 + $0x108] sm:$0xff]  }
 0x2ed   : > { %7824 = vmatprep.mubr.msk.bf16.mxu1 %vm8245_vm0, %v8244_v29 }
 0x2ee   : > { %7807 = vmatpush3.bf16.msra.mxu0 %v8150_v55 }
 0x2ef   : > { %7819 = vmatpush3.bf16.msra.mxu1 %v8151_v52  ;;  %7808 = vmatprep.subr.bf16.mxu0 %v8244_v29  ;;  %v8174_v52 = vld [vmem:[%s9646_s5 + $0xe8] sm:$0xff]  }
 0x2f0   : > { %7820 = vmatprep.subr.bf16.mxu1 %v8244_v29  ;;  %v4236_v25 = vpop.f32.mrb[132].mxu1 }
 0x2f1   : > { %v4242_v60 = vadd.f32 %v4236_v25, %v4180_v56  ;;  %v7634_v62 = vpop.f32.mrb[133].mxu1  ;;  %v8176_v56 = vld [vmem:[%s9646_s5 + $0xf0] sm:$0xff]   ;;  %v8179_v25 = vld [vmem:[%s9646_s5 + $0x118] sm:$0xff]  }
 0x2f2   : > { %7809 = vmatpush3.bf16.msra.mxu0 %v8152_v59  ;;  %v4239_v63 = vpop.f32.mrb[134].mxu1  ;;  %v8177_v59 = vld [vmem:[%s9646_s5 + $0x110] sm:$0xff]  }
 0x2f3   : > { %7821 = vmatpush3.bf16.msra.mxu1 %v8153_v50  ;;  %v7635_v3 = vpop.f32.mrb[135].mxu1  ;;  %7810 = vmatprep.subr.bf16.mxu0 %v8244_v29  ;;  %v4304_v57 = vadd.f32 %v9362_v38, %v4242_v60  ;;  %v8178_v50 = vld [vmem:[%s9646_s5 + $0xf8] sm:$0xff]  }
 0x2f4   : > { %7822 = vmatprep.subr.bf16.mxu1 %v8244_v29 }
 0x2f6   : > { %7811 = vmatpush3.bf16.msra.mxu0 %v8154_v2 }
 0x2f7   : > { %7823 = vmatpush3.bf16.msra.mxu1 %v8155_v5  ;;  %7828 = vmatprep.subr.bf16.mxu0 %v8244_v29 }
 0x2f8   : > { %7840 = vmatprep.subr.bf16.mxu1 %v8244_v29  ;;  %v4360_v0 = vpop.f32.mrb[136].mxu1 }
 0x2f9   : > { %v4366_v38 = vadd.f32 %v4360_v0, %v4304_v57  ;;  %7813 = vmatmul.mubr.msk.bf16.vlgmr.msra.gmra.mrb[156].mxu0 %vm4670_vm4, %v5346_v9  ;;  %v7650_v12 = vpop.f32.mrb[137].mxu1 }
 0x2fa   : > { %7825 = vmatmul.mubr.msk.bf16.vlgmr.msra.gmra.mrb[168].mxu1 %vm4670_vm4, %v5500_v10  ;;  %7829 = vmatpush3.bf16.msra.mxu0 %v8156_v8  ;;  %v4363_v13 = vpop.f32.mrb[138].mxu1 }
 0x2fb   : > { %7841 = vmatpush3.bf16.msra.mxu1 %v8157_v1  ;;  %v7651_v11 = vpop.f32.mrb[139].mxu1  ;;  %7830 = vmatprep.subr.bf16.mxu0 %v8244_v29  ;;  %v4428_v17 = vadd.f32 %v9367_v40, %v4366_v38 }
 0x2fc   : > { %7842 = vmatprep.subr.bf16.mxu1 %v8244_v29  ;;  %7836 = vmatprep.mubr.msk.bf16.mxu0 %vm8245_vm0, %v8244_v29 }
 0x2fd   : > { %7848 = vmatprep.mubr.msk.bf16.mxu1 %vm8245_vm0, %v8244_v29 }
 0x2fe   : > { %7831 = vmatpush3.bf16.msra.mxu0 %v8158_v16 }
 0x2ff   : > { %7843 = vmatpush3.bf16.msra.mxu1 %v8159_v15  ;;  %7832 = vmatprep.subr.bf16.mxu0 %v8244_v29 }
 0x300   : > { %7844 = vmatprep.subr.bf16.mxu1 %v8244_v29  ;;  %v4484_v40 = vpop.f32.mrb[140].mxu1 }
 0x301   : > { %v4490_v39 = vadd.f32 %v4484_v40, %v4428_v17  ;;  %v7666_v18 = vpop.f32.mrb[141].mxu1 }
 0x302   : > { %7833 = vmatpush3.bf16.msra.mxu0 %v8160_v21  ;;  %v4487_v20 = vpop.f32.mrb[142].mxu1 }
 0x303   : > { %7845 = vmatpush3.bf16.msra.mxu1 %v8161_v19  ;;  %v7667_v22 = vpop.f32.mrb[143].mxu1  ;;  %7834 = vmatprep.subr.bf16.mxu0 %v8244_v29  ;;  %v4552_v30 = vadd.f32 %v9370_v61, %v4490_v39  ;;  %v6604_v61 = vld [vmem:[%s9645_s4] ss:$0 sm:$0xff] }
 0x304   : > { %7846 = vmatprep.subr.bf16.mxu1 %v8244_v29 }
 0x306   : > { %7835 = vmatpush3.bf16.msra.mxu0 %v8162_v23 }
 0x307   : > { %7847 = vmatpush3.bf16.msra.mxu1 %v8163_v24  ;;  %7852 = vmatprep.subr.bf16.mxu0 %v8244_v29 }
 0x308   : > { %7864 = vmatprep.subr.bf16.mxu1 %v8244_v29  ;;  %v4608_v58 = vpop.f32.mrb[144].mxu1 }
 0x309   : > { %v4614_v33 = vadd.f32 %v4608_v58, %v4552_v30  ;;  %7837 = vmatmul.mubr.msk.bf16.vlgmr.msra.gmra.mrb[160].mxu0 %vm4670_vm4, %v5578_v31  ;;  %v7682_v27 = vpop.f32.mrb[145].mxu1 }
 0x30a   : > { %7849 = vmatmul.mubr.msk.bf16.vlgmr.msra.gmra.mrb[172].mxu1 %vm4670_vm4, %v5656_v32  ;;  %7853 = vmatpush3.bf16.msra.mxu0 %v8164_v37  ;;  %v4611_v35 = vpop.f32.mrb[146].mxu1 }
 0x30b   : > { %7865 = vmatpush3.bf16.msra.mxu1 %v8165_v28  ;;  %v4622_v41 = vadd.f32 %v6604_v61, %v4614_v33  ;;  %v7683_v42 = vpop.f32.mrb[147].mxu1  ;;  %7854 = vmatprep.subr.bf16.mxu0 %v8244_v29 }
 0x30c   : > { %7866 = vmatprep.subr.bf16.mxu1 %v8244_v29  ;;  %7860 = vmatprep.mubr.msk.bf16.mxu0 %vm8245_vm0, %v8244_v29 }
 0x30d   : > { %7872 = vmatprep.mubr.msk.bf16.mxu1 %vm8245_vm0, %v8244_v29  ;;  %v4623_v43 = vmax.f32 %v4622_v41, 0.0 }
 0x30e   : > { %7855 = vmatpush3.bf16.msra.mxu0 %v8166_v36 }
 0x30f   : > { %7867 = vmatpush3.bf16.msra.mxu1 %v8167_v34  ;;  %4624 = vst.msk [vmem:[#allocation3 + $0xc] sm:$0xf] %vm1623_vm3, %v4623_v43  ;;  %7856 = vmatprep.subr.bf16.mxu0 %v8244_v29  ;;  %v6714_v34 = vld [vmem:[%s9647_s6] ss:$0 sm:$0xff] }
 0x310   : > { %7868 = vmatprep.subr.bf16.mxu1 %v8244_v29 }
 0x312   : > { %7857 = vmatpush3.bf16.msra.mxu0 %v8168_v44 }
 0x313   : > { %7869 = vmatpush3.bf16.msra.mxu1 %v8169_v46  ;;  %7858 = vmatprep.subr.bf16.mxu0 %v8244_v29 }
 0x314   : > { %7870 = vmatprep.subr.bf16.mxu1 %v8244_v29 }
 0x316   : > { %7859 = vmatpush3.bf16.msra.mxu0 %v8170_v47  ;;  %v5811_v45 = vld [vmem:[#allocation3 + $0xc] sm:$0x3]  ;;  %v5967_v62 = vld [vmem:[#allocation3 + $0xe] sm:$0x3] }
 0x317   : > { %7871 = vmatpush3.bf16.msra.mxu1 %v8171_v48  ;;  %7876 = vmatprep.subr.bf16.mxu0 %v8244_v29  ;;  %v5812_v55 = vpack.c.bf16 %v5811_v45, %v5811_v45  ;;  %v5889_v60 = vld [vmem:[#allocation3 + $0xd] sm:$0x3]  ;;  %v5968_v2 = vpack.c.bf16 %v5967_v62, %v5967_v62 }
 0x318   : > { %7888 = vmatprep.subr.bf16.mxu1 %v8244_v29  ;;  %v5890_v63 = vpack.c.bf16 %v5889_v60, %v5889_v60 }
 0x319   : > { %7861 = vmatmul.mubr.msk.bf16.vlgmr.msra.gmra.mrb[164].mxu0 %vm4670_vm4, %v5734_v54 }
 0x31a   : > { %7873 = vmatmul.mubr.msk.bf16.vlgmr.msra.gmra.mrb[176].mxu1 %vm4670_vm4, %v5812_v55  ;;  %7877 = vmatpush3.bf16.msra.mxu0 %v8172_v6 }
 0x31b   : > { %7889 = vmatpush3.bf16.msra.mxu1 %v8173_v51  ;;  %7878 = vmatprep.subr.bf16.mxu0 %v8244_v29 }
 0x31c   : > { %7890 = vmatprep.subr.bf16.mxu1 %v8244_v29  ;;  %7884 = vmatprep.mubr.msk.bf16.mxu0 %vm8245_vm0, %v8244_v29 }
 0x31d   : > { %7896 = vmatprep.mubr.msk.bf16.mxu1 %vm8245_vm0, %v8244_v29 }
 0x31e   : > { %7879 = vmatpush3.bf16.msra.mxu0 %v8174_v52 }
 0x31f   : > { %7891 = vmatpush3.bf16.msra.mxu1 %v8175_v53  ;;  %7880 = vmatprep.subr.bf16.mxu0 %v8244_v29 }
 0x320   : > { %7892 = vmatprep.subr.bf16.mxu1 %v8244_v29 }
 0x322   : > { %7881 = vmatpush3.bf16.msra.mxu0 %v8176_v56 }
 0x323   : > { %7893 = vmatpush3.bf16.msra.mxu1 %v8177_v59  ;;  %7882 = vmatprep.subr.bf16.mxu0 %v8244_v29 }
 0x324   : > { %7894 = vmatprep.subr.bf16.mxu1 %v8244_v29 }
 0x326   : > { %7883 = vmatpush3.bf16.msra.mxu0 %v8178_v50 }
 0x327   : > { %7895 = vmatpush3.bf16.msra.mxu1 %v8179_v25 }
 0x329   : > { %7885 = vmatmul.mubr.msk.bf16.vlgmr.msra.gmra.mrb[168].mxu0 %vm4670_vm4, %v5890_v63 }
 0x32a   : > { %7897 = vmatmul.mubr.msk.bf16.vlgmr.msra.gmra.mrb[180].mxu1 %vm4670_vm4, %v5968_v2 }
 0x32c   : > { %v4708_v5 = vpop.f32.mrb[136].mxu0 }
 0x32d   : > { %v4775_v3 = vpop.f32.mrb[148].mxu1  ;;  %v7694_v4 = vpop.f32.mrb[137].mxu0 }
 0x32e   : > { %v4776_v57 = vadd.f32 %v4775_v3, %v4708_v5  ;;  %v7706_v7 = vpop.f32.mrb[149].mxu1  ;;  %v4711_v8 = vpop.f32.mrb[138].mxu0 }
 0x32f   : > { %v4778_v1 = vpop.f32.mrb[150].mxu1  ;;  %v7695_v9 = vpop.f32.mrb[139].mxu0 }
 0x330   : > { %v7707_v10 = vpop.f32.mrb[151].mxu1 }
 0x33c   : > { %v4853_v29 = vpop.f32.mrb[140].mxu0 }
 0x33d   : > { %v4859_v0 = vadd.f32 %v4853_v29, %v4776_v57  ;;  %v7718_v38 = vpop.f32.mrb[141].mxu0 }
 0x33e   : > { %v4856_v12 = vpop.f32.mrb[142].mxu0 }
 0x33f   : > { %v7719_v13 = vpop.f32.mrb[143].mxu0 }
 0x36c   : > { %v4932_v16 = vpop.f32.mrb[152].mxu1 }
 0x36d   : > { %v5011_v15 = vpop.f32.mrb[144].mxu0  ;;  %v4938_v11 = vadd.f32 %v4932_v16, %v4859_v0  ;;  %v7730_v17 = vpop.f32.mrb[153].mxu1 }
 0x36e   : > { %v7742_v21 = vpop.f32.mrb[145].mxu0  ;;  %v4935_v19 = vpop.f32.mrb[154].mxu1 }
 0x36f   : > { %v5014_v40 = vpop.f32.mrb[146].mxu0  ;;  %v5017_v39 = vadd.f32 %v5011_v15, %v4938_v11  ;;  %v7731_v18 = vpop.f32.mrb[155].mxu1 }
 0x370   : > { %v7743_v20 = vpop.f32.mrb[147].mxu0 }
 0x37c   : > { %v5090_v23 = vpop.f32.mrb[156].mxu1 }
 0x37d   : > { %v5096_v24 = vadd.f32 %v5090_v23, %v5017_v39  ;;  %v7754_v22 = vpop.f32.mrb[157].mxu1 }
 0x37e   : > { %v5093_v30 = vpop.f32.mrb[158].mxu1 }
 0x37f   : > { %v7755_v14 = vpop.f32.mrb[159].mxu1 }
 0x3ac   : > { %v5169_v26 = vpop.f32.mrb[148].mxu0 }
 0x3ad   : > { %v5248_v37 = vpop.f32.mrb[160].mxu1  ;;  %v5175_v28 = vadd.f32 %v5169_v26, %v5096_v24  ;;  %v7766_v31 = vpop.f32.mrb[149].mxu0 }
 0x3ae   : > { %v7778_v32 = vpop.f32.mrb[161].mxu1  ;;  %v5172_v58 = vpop.f32.mrb[150].mxu0 }
 0x3af   : > { %v5251_v61 = vpop.f32.mrb[162].mxu1  ;;  %v5254_v33 = vadd.f32 %v5248_v37, %v5175_v28  ;;  %v7767_v27 = vpop.f32.mrb[151].mxu0 }
 0x3b0   : > { %v7779_v35 = vpop.f32.mrb[163].mxu1 }
 0x3bc   : > { %v5327_v36 = vpop.f32.mrb[152].mxu0 }
 0x3bd   : > { %v5426_v41 = vpop.f32.mrb[164].mxu1  ;;  %v5333_v42 = vadd.f32 %v5327_v36, %v5254_v33  ;;  %v7790_v43 = vpop.f32.mrb[153].mxu0 }
 0x3be   : > { %v7802_v44 = vpop.f32.mrb[165].mxu1  ;;  %v5330_v46 = vpop.f32.mrb[154].mxu0 }
 0x3bf   : > { %v5429_v47 = vpop.f32.mrb[166].mxu1  ;;  %v5341_v48 = vadd.f32 %v6714_v34, %v5333_v42  ;;  %v7791_v49 = vpop.f32.mrb[155].mxu0 }
 0x3c0   : > { %v7803_v45 = vpop.f32.mrb[167].mxu1 }
 0x3c1   : > { %v5342_v6 = vmax.f32 %v5341_v48, 0.0 }
 0x3c3   : > { %5344 = vst.msk [vmem:[%s9583_s13] sm:$0x3] %vm5343_vm5, %v5342_v6 }
 0x3cc   : > { %v5493_v51 = vpop.f32.mrb[156].mxu0 }
 0x3cd   : > { %v5570_v54 = vpop.f32.mrb[168].mxu1  ;;  %v5494_v55 = vadd.f32 %v5493_v51, %v5426_v41  ;;  %v7814_v52 = vpop.f32.mrb[157].mxu0 }
 0x3ce   : > { %v7826_v53 = vpop.f32.mrb[169].mxu1  ;;  %v5496_v56 = vpop.f32.mrb[158].mxu0 }
 0x3cf   : > { %v5573_v59 = vpop.f32.mrb[170].mxu1  ;;  %v5576_v50 = vadd.f32 %v5570_v54, %v5494_v55  ;;  %v7815_v25 = vpop.f32.mrb[159].mxu0 }
 0x3d0   : > { %v7827_v60 = vpop.f32.mrb[171].mxu1 }
 0x3dc   : > { %v5648_v62 = vpop.f32.mrb[160].mxu0 }
 0x3dd   : > { %v5726_v63 = vpop.f32.mrb[172].mxu1  ;;  %v5654_v2 = vadd.f32 %v5648_v62, %v5576_v50  ;;  %v7838_v5 = vpop.f32.mrb[161].mxu0 }
 0x3de   : > { %v7850_v3 = vpop.f32.mrb[173].mxu1  ;;  %v5651_v57 = vpop.f32.mrb[162].mxu0 }
 0x3df   : > { %v5729_v4 = vpop.f32.mrb[174].mxu1  ;;  %v5732_v7 = vadd.f32 %v5726_v63, %v5654_v2  ;;  %v7839_v8 = vpop.f32.mrb[163].mxu0 }
 0x3e0   : > { %v7851_v1 = vpop.f32.mrb[175].mxu1 }
 0x3ec   : > { %v5804_v9 = vpop.f32.mrb[164].mxu0 }
 0x3ed   : > { %v5882_v10 = vpop.f32.mrb[176].mxu1  ;;  %v5810_v29 = vadd.f32 %v5804_v9, %v5732_v7  ;;  %v7862_v0 = vpop.f32.mrb[165].mxu0 }
 0x3ee   : > { %v7874_v38 = vpop.f32.mrb[177].mxu1  ;;  %v5807_v12 = vpop.f32.mrb[166].mxu0 }
 0x3ef   : > { %v5885_v13 = vpop.f32.mrb[178].mxu1  ;;  %v5888_v16 = vadd.f32 %v5882_v10, %v5810_v29  ;;  %v7863_v15 = vpop.f32.mrb[167].mxu0 }
 0x3f0   : > { %v7875_v11 = vpop.f32.mrb[179].mxu1 }
 0x3fc   : > { %v5960_v17 = vpop.f32.mrb[168].mxu0 }
 0x3fd   : > { %v6038_v21 = vpop.f32.mrb[180].mxu1  ;;  %v5966_v19 = vadd.f32 %v5960_v17, %v5888_v16  ;;  %v7886_v40 = vpop.f32.mrb[169].mxu0 }
 0x3fe   : > { %v7898_v39 = vpop.f32.mrb[181].mxu1  ;;  %v5963_v18 = vpop.f32.mrb[170].mxu0 }
 0x3ff   : > { %v6041_v20 = vpop.f32.mrb[182].mxu1  ;;  %v6044_v23 = vadd.f32 %v6038_v21, %v5966_v19  ;;  %v7887_v24 = vpop.f32.mrb[171].mxu0 }
 0x400   : > { %v7899_v22 = vpop.f32.mrb[183].mxu1 }
 0x401   : > { %v6052_v30 = vadd.f32 %v6714_v34, %v6044_v23 }
 0x403   : > { %v6053_v14 = vmax.f32 %v6052_v30, 0.0 }
 0x405   : > { %6825 = vst.msk [vmem:[%s9583_s13 + $0x2] sm:$0x3] %vm5343_vm5, %v6053_v14 }
 0x406   : > { %8193 = shalt.err (!%p8190_p3)
}
 0x407   : > { %s8194_s29 = scalar_lea.hbm %s9592_s17, 64  ;;  %s8198_s9 = scalar_lea.hbm %s9648_s7, 128 }
 0x408   : > { %p8195_p4 = scmp.ne.s32.totalorder %s9592_s17, %s8194_s29  ;;  %p8199_p9 = scmp.lt.u32.totalorder %s9592_s17, %s9648_s7 }
 0x409   : > { %p8200_p10 = scmp.lt.u32.totalorder %s8198_s9, %s8194_s29  ;;  %p8202_p12 = scmp.lt.u32.totalorder %s8194_s29, %s9592_s17 }
 0x40a   : > { %p8196_p7 = pnand %p8195_p4, %p8327_p5 }
 0x40b   : > { %p8201_p11 = por %p8200_p10, %p8199_p9 }
 0x40c   : > { %p8197_p8 = pneg %p8196_p7 }
 0x40d   : > { %p8203_p13 = por %p8202_p12, %p8201_p11 }
 0x40f   : > { %p8204_p0 = pnand %p8203_p13, %p8197_p8 }
 0x411   : > { %8207 = shalt.err (!%p8204_p0)
}
 0x412   : > { %s8247_s15 = smov 32   ;;  %s8248_s16 = smov 2  }
 0x413   : > { %7901 = dma.vmem_to_hbm [thread:$0]  (%p8327_p5), %s9594_s21, 64, %s9592_s17, %s9600_s18, %s8247_s15, %s8247_s15, %s8248_s16  }
 0x414 PF: > { %p7907_p1 = scmp.ge.s32.totalorder %s8242_s27, 2  ;;  %s6085_s19 = sand.u32 1, %s8230_s24  }
 0x415   : > { %s6086_s28 = scalar_lea.sflag [#allocation5], %s6085_s19 }
 0x416   : > { %p7904_p2 = pnand %p7907_p1, %p8331_p6 }
 0x418   : > { %8225 = dma.done.wait (!%p7904_p2), %s6086_s28, 64  }
 0x419   : > { %8227 = vsyncadd (!%p7904_p2), %s6086_s28, 4294967232  ;;  %p17_p3 = scmp.ge.s32.totalorder %s8314_s30, 4   ;;  %s9651_s24 = smov %s8234_s25 }
 0x41a   : > { %s9652_s25 = smov %s8238_s26  ;;  %s9653_s26 = smov %s8325_s10 }
 0x41b   : > { %s9654_s27 = smov %s8314_s30  ;;  %19 = sbr.rel (!%p17_p3) target bundleno = 3 (0x3), region = 107 }
 0x422   :  { %6091 = vsyncpa [#allocation5], 1 }
 0x423   :  { %6093 = vsyncpa [#allocation5 + $0x1], 1 }

</bundles_post_ra>
